<compile_context>
chip_gen: v6e
topology: v6e:2x2x1
jax: 0.10.0
libtpu: 0.0.40
codegen_flags: <defaults>
</compile_context>

<pallas_src>
import jax
import jax.numpy as jnp
from jax.experimental import pallas as pl
from jax.experimental.pallas import tpu as pltpu

LANE = 128


def _round_up(n, m):
    return (n + m - 1) // m * m


# ----------------------------------------------------------------------------
# Fused kernel: all GRU layers + final Linear. grid=(1,), state kept in VMEM.
# Ref order: x2, (w_ih, w_hh, b_gi, b_hn) per layer, w_fc, b_fc | out | gi, seq
# All activation rows are time-major: row = t*B + b.
# ----------------------------------------------------------------------------
def make_fused_kernel(num_layers, Hp, S, B):
    def kernel(*refs):
        n_in = 1 + 4 * num_layers + 2
        x_ref = refs[0]
        wfc_ref = refs[n_in - 2]
        bfc_ref = refs[n_in - 1]
        out_ref = refs[n_in]
        gi_ref = refs[n_in + 1]      # (S*B, 3*Hp) scratch
        seq_ref = refs[n_in + 2]     # (S*B, Hp)   scratch (layer output)

        for l in range(num_layers):
            wih_ref, whh_ref, bgi_ref, bhn_ref = refs[1 + 4 * l: 5 + 4 * l]

            # Hoisted input projection for ALL timesteps of this layer:
            # one well-shaped matmul; b_ih and b_hh_{r,z} are pre-folded into bgi.
            src = x_ref[...] if l == 0 else seq_ref[...]
            gi_ref[...] = (
                jnp.dot(src, wih_ref[...], preferred_element_type=jnp.float32)
                + bgi_ref[...]
            )

            # Serial recurrence: only h @ W_hh + gate math per step.
            def step(t, h):
                row = t * B
                gi_t = gi_ref[pl.ds(row, B), :]                       # (B, 3Hp)
                gh = jnp.dot(h, whh_ref[...],
                             preferred_element_type=jnp.float32)      # (B, 3Hp)
                r = jax.nn.sigmoid(gi_t[:, 0:Hp] + gh[:, 0:Hp])
                z = jax.nn.sigmoid(gi_t[:, Hp:2 * Hp] + gh[:, Hp:2 * Hp])
                n = jnp.tanh(gi_t[:, 2 * Hp:] + r * (gh[:, 2 * Hp:] + bhn_ref[...]))
                h_new = n + z * (h - n)                               # (1-z)n + z h
                seq_ref[pl.ds(row, B), :] = h_new
                return h_new

            h0 = jnp.zeros((B, Hp), jnp.float32)
            jax.lax.fori_loop(0, S, step, h0, unroll=True)   # S is small here

        # FC epilogue over the whole sequence: one lane-dense matmul + store.
        out_ref[...] = (
            jnp.dot(seq_ref[...], wfc_ref[...], preferred_element_type=jnp.float32)
            + bfc_ref[...]
        )

    return kernel


def make_forward(num_layers, hidden_pad, out_pad, output_dim):
    @jax.jit
    def forward(x, weights):
        B, S, Din = x.shape
        # batch_first (B,S,Din) -> time-major rows (row = t*B + b); tiny vs. kernel work.
        x2 = jnp.transpose(x, (1, 0, 2)).reshape(S * B, Din)
        in_arrays = (x2,) + tuple(weights)
        kernel = make_fused_kernel(num_layers, hidden_pad, S, B)
        out2 = pl.pallas_call(
            kernel,
            out_shape=jax.ShapeDtypeStruct((S * B, out_pad), jnp.float32),
            grid_spec=pltpu.PrefetchScalarGridSpec(
                num_scalar_prefetch=0,
                grid=(1,),
                in_specs=[pl.BlockSpec(a.shape, lambda i: (0, 0))
                          for a in in_arrays],
                out_specs=pl.BlockSpec((S * B, out_pad), lambda i: (0, 0)),
                scratch_shapes=[
                    pltpu.VMEM((S * B, 3 * hidden_pad), jnp.float32),  # gi
                    pltpu.VMEM((S * B, hidden_pad), jnp.float32),      # seq
                ],
            ),
            compiler_params=pltpu.CompilerParams(
                dimension_semantics=("arbitrary",)),
        )(*in_arrays)
        # Back to batch_first; strip the lane padding of the FC output.
        out = out2.reshape(S, B, out_pad)[:, :, :output_dim]
        return jnp.transpose(out, (1, 0, 2))

    return forward


# ----------------------------------------------------------------------------
# One-time parameter preparation: PyTorch layout -> lane-padded kernel layout.
#   w_ih (3H, Din) -> (Din_or_Hp, 3*Hp)   [per-gate transpose + zero pad]
#   w_hh (3H, H)   -> (Hp, 3*Hp)
#   b_gi = [b_ir+b_hr | b_iz+b_hz | b_in] padded      b_hn = b_hn padded
#   fc   (O, H)    -> (Hp, Op), bias -> (1, Op)
# ----------------------------------------------------------------------------
def prepare_params(params, hidden_dim, output_dim):
    H = hidden_dim
    Hp = _round_up(H, LANE)
    Op = _round_up(output_dim, LANE)
    flat = []
    for li, lp in enumerate(params["gru_layers"]):
        w_ih, w_hh = lp["w_ih"], lp["w_hh"]
        b_ih, b_hh = lp["b_ih"], lp["b_hh"]
        in_rows = w_ih.shape[1] if li == 0 else Hp   # layer>0 input is padded h

        def split_gates_w(w, rows_out):
            blocks = []
            for g in range(3):
                wg = jnp.transpose(w[g * H:(g + 1) * H, :])          # (din, H)
                wg = jnp.pad(wg, ((0, rows_out - wg.shape[0]), (0, Hp - H)))
                blocks.append(wg)
            return jnp.concatenate(blocks, axis=1)                   # (rows, 3Hp)

        wih_k = split_gates_w(w_ih, in_rows)
        whh_k = split_gates_w(w_hh, Hp)

        bir, biz, binn = (b_ih[g * H:(g + 1) * H] for g in range(3))
        bhr, bhz, bhnn = (b_hh[g * H:(g + 1) * H] for g in range(3))
        pad_h = lambda v: jnp.pad(v, (0, Hp - H))
        bgi = jnp.concatenate([pad_h(bir + bhr), pad_h(biz + bhz),
                               pad_h(binn)]).reshape(1, 3 * Hp)
        bhn = pad_h(bhnn).reshape(1, Hp)
        flat += [wih_k, whh_k, bgi, bhn]

    wfc = jnp.pad(jnp.transpose(params["fc_w"]),
                  ((0, Hp - H), (0, Op - output_dim)))
    bfc = jnp.pad(params["fc_b"], (0, Op - output_dim)).reshape(1, Op)
    flat += [wfc, bfc]
    return tuple(flat), Hp, Op


# ----------------------------------------------------------------------------
# Pure-JAX reference (torch.nn.GRU + Linear semantics) for a correctness check.
# ----------------------------------------------------------------------------
def gru_reference(x, params):
    B, S, _ = x.shape
    H = params["gru_layers"][0]["w_hh"].shape[1]
    inp = x
    for lp in params["gru_layers"]:
        h = jnp.zeros((B, H), jnp.float32)
        outs = []
        for t in range(S):
            gi = inp[:, t, :] @ lp["w_ih"].T + lp["b_ih"]
            gh = h @ lp["w_hh"].T + lp["b_hh"]
            r = jax.nn.sigmoid(gi[:, 0:H] + gh[:, 0:H])
            z = jax.nn.sigmoid(gi[:, H:2 * H] + gh[:, H:2 * H])
            n = jnp.tanh(gi[:, 2 * H:] + r * gh[:, 2 * H:])
            h = (1.0 - z) * n + z * h
            outs.append(h)
        inp = jnp.stack(outs, axis=1)
    return inp @ params["fc_w"].T + params["fc_b"]


def init_params(key, input_dim, hidden_dim, layer_dim, output_dim):
    """Deterministic init mimicking PyTorch's U(-1/sqrt(H), 1/sqrt(H))."""
    params = {"gru_layers": []}
    bound = 1.0 / jnp.sqrt(jnp.float32(hidden_dim))
    for l in range(layer_dim):
        din = input_dim if l == 0 else hidden_dim
        key, k1, k2, k3, k4 = jax.random.split(key, 5)
        params["gru_layers"].append({
            "w_ih": jax.random.uniform(k1, (3 * hidden_dim, din),
                                       jnp.float32, -bound, bound),
            "w_hh": jax.random.uniform(k2, (3 * hidden_dim, hidden_dim),
                                       jnp.float32, -bound, bound),
            "b_ih": jax.random.uniform(k3, (3 * hidden_dim,),
                                       jnp.float32, -bound, bound),
            "b_hh": jax.random.uniform(k4, (3 * hidden_dim,),
                                       jnp.float32, -bound, bound),
        })
    key, k5, k6 = jax.random.split(key, 3)
    params["fc_w"] = jax.random.uniform(k5, (output_dim, hidden_dim),
                                        jnp.float32, -bound, bound)
    params["fc_b"] = jax.random.uniform(k6, (output_dim,),
                                        jnp.float32, -bound, bound)
    return params


if __name__ == "__main__":
    batch, seq = 2, 8
    input_dim, hidden_dim, layer_dim, output_dim = 16, 32, 2, 8

    key = jax.random.PRNGKey(0)
    key, xkey = jax.random.split(key)
    x = jax.random.normal(xkey, (batch, seq, input_dim), jnp.float32)
    params = init_params(key, input_dim, hidden_dim, layer_dim, output_dim)

    weights, Hp, Op = prepare_params(params, hidden_dim, output_dim)
    forward = make_forward(layer_dim, Hp, Op, output_dim)

    out = jax.block_until_ready(forward(x, weights))
    assert out.shape == (batch, seq, output_dim), out.shape
    assert bool(jnp.all(jnp.isfinite(out)))

    # Cross-check against a pure-JAX reference of the PyTorch module.
    ref = gru_reference(x, params)
    max_err = float(jnp.max(jnp.abs(out - ref)))
    assert max_err < 2e-2, f"kernel vs reference mismatch: {max_err}"

    print("KERNEL_OK")
</pallas_src>

<mosaic_0001>
module attributes {stable_mosaic.version = 11 : i64} {
  func.func @kernel(%arg0: i32, %arg1: memref<16x16xf32, #tpu.memory_space<vmem>>, %arg2: memref<16x384xf32, #tpu.memory_space<vmem>>, %arg3: memref<128x384xf32, #tpu.memory_space<vmem>>, %arg4: memref<1x384xf32, #tpu.memory_space<vmem>>, %arg5: memref<1x128xf32, #tpu.memory_space<vmem>>, %arg6: memref<128x384xf32, #tpu.memory_space<vmem>>, %arg7: memref<128x384xf32, #tpu.memory_space<vmem>>, %arg8: memref<1x384xf32, #tpu.memory_space<vmem>>, %arg9: memref<1x128xf32, #tpu.memory_space<vmem>>, %arg10: memref<128x128xf32, #tpu.memory_space<vmem>>, %arg11: memref<1x128xf32, #tpu.memory_space<vmem>>, %arg12: memref<16x128xf32, #tpu.memory_space<vmem>>, %arg13: memref<16x384xf32, #tpu.memory_space<vmem>>, %arg14: memref<16x128xf32, #tpu.memory_space<vmem>>) attributes {dimension_semantics = [#tpu.dimension_semantics<arbitrary>], iteration_bounds = array<i64: 1>, scalar_prefetch = 0 : i64, scratch_operands = 2 : i64, tpu.core_type = #tpu.core_type<tc>, window_params = [{pipeline_mode = #tpu.pipeline_mode<synchronous>, transform_indices = @transform_0, window_bounds = array<i64: 16, 16>}, {pipeline_mode = #tpu.pipeline_mode<synchronous>, transform_indices = @transform_1, window_bounds = array<i64: 16, 384>}, {pipeline_mode = #tpu.pipeline_mode<synchronous>, transform_indices = @transform_2, window_bounds = array<i64: 128, 384>}, {pipeline_mode = #tpu.pipeline_mode<synchronous>, transform_indices = @transform_3, window_bounds = array<i64: 1, 384>}, {pipeline_mode = #tpu.pipeline_mode<synchronous>, transform_indices = @transform_4, window_bounds = array<i64: 1, 128>}, {pipeline_mode = #tpu.pipeline_mode<synchronous>, transform_indices = @transform_5, window_bounds = array<i64: 128, 384>}, {pipeline_mode = #tpu.pipeline_mode<synchronous>, transform_indices = @transform_6, window_bounds = array<i64: 128, 384>}, {pipeline_mode = #tpu.pipeline_mode<synchronous>, transform_indices = @transform_7, window_bounds = array<i64: 1, 384>}, {pipeline_mode = #tpu.pipeline_mode<synchronous>, transform_indices = @transform_8, window_bounds = array<i64: 1, 128>}, {pipeline_mode = #tpu.pipeline_mode<synchronous>, transform_indices = @transform_9, window_bounds = array<i64: 128, 128>}, {pipeline_mode = #tpu.pipeline_mode<synchronous>, transform_indices = @transform_10, window_bounds = array<i64: 1, 128>}, {pipeline_mode = #tpu.pipeline_mode<synchronous>, transform_indices = @transform_11, window_bounds = array<i64: 16, 128>}]} {
    %c0 = arith.constant 0 : index
    %c0_0 = arith.constant 0 : index
    %0 = vector.load %arg1[%c0, %c0_0] : memref<16x16xf32, #tpu.memory_space<vmem>>, vector<16x16xf32>
    %c0_1 = arith.constant 0 : index
    %c0_2 = arith.constant 0 : index
    %1 = vector.load %arg2[%c0_1, %c0_2] : memref<16x384xf32, #tpu.memory_space<vmem>>, vector<16x384xf32>
    %cst = arith.constant dense<0.000000e+00> : vector<16x384xf32>
    %2 = tpu.matmul %0, %1, %cst {dimension_numbers = #tpu.dot_dimension_numbers<[1], [0], [0], [1], [0, 0, 1, 1], [], []>} : vector<16x16xf32>, vector<16x384xf32>, vector<16x384xf32> -> vector<16x384xf32>
    %c0_3 = arith.constant 0 : index
    %c0_4 = arith.constant 0 : index
    %3 = vector.load %arg4[%c0_3, %c0_4] : memref<1x384xf32, #tpu.memory_space<vmem>>, vector<1x384xf32>
    %4 = vector.broadcast %3 : vector<1x384xf32> to vector<16x384xf32>
    %5 = arith.addf %2, %4 : vector<16x384xf32>
    %c0_5 = arith.constant 0 : index
    %c0_6 = arith.constant 0 : index
    %6 = vector.load %arg13[%c0_5, %c0_6] : memref<16x384xf32, #tpu.memory_space<vmem>>, vector<16x384xf32>
    tpu.vector_store %arg13[%c0_5, %c0_6], %5 {strides = array<i32>} : memref<16x384xf32, #tpu.memory_space<vmem>>, vector<16x384xf32>,
    %cst_7 = arith.constant 0.000000e+00 : f32
    %7 = vector.broadcast %cst_7 : f32 to vector<2x128xf32>
    %c0_i32 = arith.constant 0 : i32
    %c2_i32 = arith.constant 2 : i32
    %8 = arith.muli %c0_i32, %c2_i32 : i32
    %9 = arith.index_cast %8 : i32 to index
    %c0_8 = arith.constant 0 : index
    %10 = vector.load %arg13[%9, %c0_8] : memref<16x384xf32, #tpu.memory_space<vmem>>, vector<2x384xf32>
    %c0_9 = arith.constant 0 : index
    %c0_10 = arith.constant 0 : index
    %11 = vector.load %arg3[%c0_9, %c0_10] : memref<128x384xf32, #tpu.memory_space<vmem>>, vector<128x384xf32>
    %cst_11 = arith.constant dense<0.000000e+00> : vector<2x384xf32>
    %12 = tpu.matmul %7, %11, %cst_11 {dimension_numbers = #tpu.dot_dimension_numbers<[1], [0], [0], [1], [0, 0, 1, 1], [], []>} : vector<2x128xf32>, vector<128x384xf32>, vector<2x384xf32> -> vector<2x384xf32>
    %13 = vector.extract_strided_slice %10 {offsets = [0, 0], sizes = [2, 128], strides = [1, 1]} : vector<2x384xf32> to vector<2x128xf32>
    %14 = vector.extract_strided_slice %12 {offsets = [0, 0], sizes = [2, 128], strides = [1, 1]} : vector<2x384xf32> to vector<2x128xf32>
    %15 = arith.addf %13, %14 : vector<2x128xf32>
    %16 = arith.negf %15 : vector<2x128xf32>
    %17 = math.exp %16 : vector<2x128xf32>
    %cst_12 = arith.constant 1.000000e+00 : f32
    %18 = vector.broadcast %cst_12 : f32 to vector<2x128xf32>
    %19 = arith.addf %18, %17 : vector<2x128xf32>
    %20 = arith.divf %18, %19 : vector<2x128xf32>
    %21 = vector.extract_strided_slice %10 {offsets = [0, 128], sizes = [2, 128], strides = [1, 1]} : vector<2x384xf32> to vector<2x128xf32>
    %22 = vector.extract_strided_slice %12 {offsets = [0, 128], sizes = [2, 128], strides = [1, 1]} : vector<2x384xf32> to vector<2x128xf32>
    %23 = arith.addf %21, %22 : vector<2x128xf32>
    %24 = arith.negf %23 : vector<2x128xf32>
    %25 = math.exp %24 : vector<2x128xf32>
    %cst_13 = arith.constant 1.000000e+00 : f32
    %26 = vector.broadcast %cst_13 : f32 to vector<2x128xf32>
    %27 = arith.addf %26, %25 : vector<2x128xf32>
    %28 = arith.divf %26, %27 : vector<2x128xf32>
    %29 = vector.extract_strided_slice %10 {offsets = [0, 256], sizes = [2, 128], strides = [1, 1]} : vector<2x384xf32> to vector<2x128xf32>
    %30 = vector.extract_strided_slice %12 {offsets = [0, 256], sizes = [2, 128], strides = [1, 1]} : vector<2x384xf32> to vector<2x128xf32>
    %c0_14 = arith.constant 0 : index
    %c0_15 = arith.constant 0 : index
    %31 = vector.load %arg5[%c0_14, %c0_15] : memref<1x128xf32, #tpu.memory_space<vmem>>, vector<1x128xf32>
    %32 = vector.broadcast %31 : vector<1x128xf32> to vector<2x128xf32>
    %33 = arith.addf %30, %32 : vector<2x128xf32>
    %34 = arith.mulf %20, %33 : vector<2x128xf32>
    %35 = arith.addf %29, %34 : vector<2x128xf32>
    %36 = math.tanh %35 : vector<2x128xf32>
    %37 = arith.subf %7, %36 : vector<2x128xf32>
    %38 = arith.mulf %28, %37 : vector<2x128xf32>
    %39 = arith.addf %36, %38 : vector<2x128xf32>
    %40 = arith.index_cast %8 : i32 to index
    %c0_16 = arith.constant 0 : index
    %41 = vector.load %arg14[%40, %c0_16] : memref<16x128xf32, #tpu.memory_space<vmem>>, vector<2x128xf32>
    tpu.vector_store %arg14[%40, %c0_16], %39 {strides = array<i32>} : memref<16x128xf32, #tpu.memory_space<vmem>>, vector<2x128xf32>,
    %c1_i32 = arith.constant 1 : i32
    %c2_i32_17 = arith.constant 2 : i32
    %42 = arith.muli %c1_i32, %c2_i32_17 : i32
    %43 = arith.index_cast %42 : i32 to index
    %c0_18 = arith.constant 0 : index
    %44 = vector.load %arg13[%43, %c0_18] : memref<16x384xf32, #tpu.memory_space<vmem>>, vector<2x384xf32>
    %c0_19 = arith.constant 0 : index
    %c0_20 = arith.constant 0 : index
    %45 = vector.load %arg3[%c0_19, %c0_20] : memref<128x384xf32, #tpu.memory_space<vmem>>, vector<128x384xf32>
    %cst_21 = arith.constant dense<0.000000e+00> : vector<2x384xf32>
    %46 = tpu.matmul %39, %45, %cst_21 {dimension_numbers = #tpu.dot_dimension_numbers<[1], [0], [0], [1], [0, 0, 1, 1], [], []>} : vector<2x128xf32>, vector<128x384xf32>, vector<2x384xf32> -> vector<2x384xf32>
    %47 = vector.extract_strided_slice %44 {offsets = [0, 0], sizes = [2, 128], strides = [1, 1]} : vector<2x384xf32> to vector<2x128xf32>
    %48 = vector.extract_strided_slice %46 {offsets = [0, 0], sizes = [2, 128], strides = [1, 1]} : vector<2x384xf32> to vector<2x128xf32>
    %49 = arith.addf %47, %48 : vector<2x128xf32>
    %50 = arith.negf %49 : vector<2x128xf32>
    %51 = math.exp %50 : vector<2x128xf32>
    %cst_22 = arith.constant 1.000000e+00 : f32
    %52 = vector.broadcast %cst_22 : f32 to vector<2x128xf32>
    %53 = arith.addf %52, %51 : vector<2x128xf32>
    %54 = arith.divf %52, %53 : vector<2x128xf32>
    %55 = vector.extract_strided_slice %44 {offsets = [0, 128], sizes = [2, 128], strides = [1, 1]} : vector<2x384xf32> to vector<2x128xf32>
    %56 = vector.extract_strided_slice %46 {offsets = [0, 128], sizes = [2, 128], strides = [1, 1]} : vector<2x384xf32> to vector<2x128xf32>
    %57 = arith.addf %55, %56 : vector<2x128xf32>
    %58 = arith.negf %57 : vector<2x128xf32>
    %59 = math.exp %58 : vector<2x128xf32>
    %cst_23 = arith.constant 1.000000e+00 : f32
    %60 = vector.broadcast %cst_23 : f32 to vector<2x128xf32>
    %61 = arith.addf %60, %59 : vector<2x128xf32>
    %62 = arith.divf %60, %61 : vector<2x128xf32>
    %63 = vector.extract_strided_slice %44 {offsets = [0, 256], sizes = [2, 128], strides = [1, 1]} : vector<2x384xf32> to vector<2x128xf32>
    %64 = vector.extract_strided_slice %46 {offsets = [0, 256], sizes = [2, 128], strides = [1, 1]} : vector<2x384xf32> to vector<2x128xf32>
    %c0_24 = arith.constant 0 : index
    %c0_25 = arith.constant 0 : index
    %65 = vector.load %arg5[%c0_24, %c0_25] : memref<1x128xf32, #tpu.memory_space<vmem>>, vector<1x128xf32>
    %66 = vector.broadcast %65 : vector<1x128xf32> to vector<2x128xf32>
    %67 = arith.addf %64, %66 : vector<2x128xf32>
    %68 = arith.mulf %54, %67 : vector<2x128xf32>
    %69 = arith.addf %63, %68 : vector<2x128xf32>
    %70 = math.tanh %69 : vector<2x128xf32>
    %71 = arith.subf %39, %70 : vector<2x128xf32>
    %72 = arith.mulf %62, %71 : vector<2x128xf32>
    %73 = arith.addf %70, %72 : vector<2x128xf32>
    %74 = arith.index_cast %42 : i32 to index
    %c0_26 = arith.constant 0 : index
    %75 = vector.load %arg14[%74, %c0_26] : memref<16x128xf32, #tpu.memory_space<vmem>>, vector<2x128xf32>
    tpu.vector_store %arg14[%74, %c0_26], %73 {strides = array<i32>} : memref<16x128xf32, #tpu.memory_space<vmem>>, vector<2x128xf32>,
    %c2_i32_27 = arith.constant 2 : i32
    %c2_i32_28 = arith.constant 2 : i32
    %76 = arith.muli %c2_i32_27, %c2_i32_28 : i32
    %77 = arith.index_cast %76 : i32 to index
    %c0_29 = arith.constant 0 : index
    %78 = vector.load %arg13[%77, %c0_29] : memref<16x384xf32, #tpu.memory_space<vmem>>, vector<2x384xf32>
    %c0_30 = arith.constant 0 : index
    %c0_31 = arith.constant 0 : index
    %79 = vector.load %arg3[%c0_30, %c0_31] : memref<128x384xf32, #tpu.memory_space<vmem>>, vector<128x384xf32>
    %cst_32 = arith.constant dense<0.000000e+00> : vector<2x384xf32>
    %80 = tpu.matmul %73, %79, %cst_32 {dimension_numbers = #tpu.dot_dimension_numbers<[1], [0], [0], [1], [0, 0, 1, 1], [], []>} : vector<2x128xf32>, vector<128x384xf32>, vector<2x384xf32> -> vector<2x384xf32>
    %81 = vector.extract_strided_slice %78 {offsets = [0, 0], sizes = [2, 128], strides = [1, 1]} : vector<2x384xf32> to vector<2x128xf32>
    %82 = vector.extract_strided_slice %80 {offsets = [0, 0], sizes = [2, 128], strides = [1, 1]} : vector<2x384xf32> to vector<2x128xf32>
    %83 = arith.addf %81, %82 : vector<2x128xf32>
    %84 = arith.negf %83 : vector<2x128xf32>
    %85 = math.exp %84 : vector<2x128xf32>
    %cst_33 = arith.constant 1.000000e+00 : f32
    %86 = vector.broadcast %cst_33 : f32 to vector<2x128xf32>
    %87 = arith.addf %86, %85 : vector<2x128xf32>
    %88 = arith.divf %86, %87 : vector<2x128xf32>
    %89 = vector.extract_strided_slice %78 {offsets = [0, 128], sizes = [2, 128], strides = [1, 1]} : vector<2x384xf32> to vector<2x128xf32>
    %90 = vector.extract_strided_slice %80 {offsets = [0, 128], sizes = [2, 128], strides = [1, 1]} : vector<2x384xf32> to vector<2x128xf32>
    %91 = arith.addf %89, %90 : vector<2x128xf32>
    %92 = arith.negf %91 : vector<2x128xf32>
    %93 = math.exp %92 : vector<2x128xf32>
    %cst_34 = arith.constant 1.000000e+00 : f32
    %94 = vector.broadcast %cst_34 : f32 to vector<2x128xf32>
    %95 = arith.addf %94, %93 : vector<2x128xf32>
    %96 = arith.divf %94, %95 : vector<2x128xf32>
    %97 = vector.extract_strided_slice %78 {offsets = [0, 256], sizes = [2, 128], strides = [1, 1]} : vector<2x384xf32> to vector<2x128xf32>
    %98 = vector.extract_strided_slice %80 {offsets = [0, 256], sizes = [2, 128], strides = [1, 1]} : vector<2x384xf32> to vector<2x128xf32>
    %c0_35 = arith.constant 0 : index
    %c0_36 = arith.constant 0 : index
    %99 = vector.load %arg5[%c0_35, %c0_36] : memref<1x128xf32, #tpu.memory_space<vmem>>, vector<1x128xf32>
    %100 = vector.broadcast %99 : vector<1x128xf32> to vector<2x128xf32>
    %101 = arith.addf %98, %100 : vector<2x128xf32>
    %102 = arith.mulf %88, %101 : vector<2x128xf32>
    %103 = arith.addf %97, %102 : vector<2x128xf32>
    %104 = math.tanh %103 : vector<2x128xf32>
    %105 = arith.subf %73, %104 : vector<2x128xf32>
    %106 = arith.mulf %96, %105 : vector<2x128xf32>
    %107 = arith.addf %104, %106 : vector<2x128xf32>
    %108 = arith.index_cast %76 : i32 to index
    %c0_37 = arith.constant 0 : index
    %109 = vector.load %arg14[%108, %c0_37] : memref<16x128xf32, #tpu.memory_space<vmem>>, vector<2x128xf32>
    tpu.vector_store %arg14[%108, %c0_37], %107 {strides = array<i32>} : memref<16x128xf32, #tpu.memory_space<vmem>>, vector<2x128xf32>,
    %c3_i32 = arith.constant 3 : i32
    %c2_i32_38 = arith.constant 2 : i32
    %110 = arith.muli %c3_i32, %c2_i32_38 : i32
    %111 = arith.index_cast %110 : i32 to index
    %c0_39 = arith.constant 0 : index
    %112 = vector.load %arg13[%111, %c0_39] : memref<16x384xf32, #tpu.memory_space<vmem>>, vector<2x384xf32>
    %c0_40 = arith.constant 0 : index
    %c0_41 = arith.constant 0 : index
    %113 = vector.load %arg3[%c0_40, %c0_41] : memref<128x384xf32, #tpu.memory_space<vmem>>, vector<128x384xf32>
    %cst_42 = arith.constant dense<0.000000e+00> : vector<2x384xf32>
    %114 = tpu.matmul %107, %113, %cst_42 {dimension_numbers = #tpu.dot_dimension_numbers<[1], [0], [0], [1], [0, 0, 1, 1], [], []>} : vector<2x128xf32>, vector<128x384xf32>, vector<2x384xf32> -> vector<2x384xf32>
    %115 = vector.extract_strided_slice %112 {offsets = [0, 0], sizes = [2, 128], strides = [1, 1]} : vector<2x384xf32> to vector<2x128xf32>
    %116 = vector.extract_strided_slice %114 {offsets = [0, 0], sizes = [2, 128], strides = [1, 1]} : vector<2x384xf32> to vector<2x128xf32>
    %117 = arith.addf %115, %116 : vector<2x128xf32>
    %118 = arith.negf %117 : vector<2x128xf32>
    %119 = math.exp %118 : vector<2x128xf32>
    %cst_43 = arith.constant 1.000000e+00 : f32
    %120 = vector.broadcast %cst_43 : f32 to vector<2x128xf32>
    %121 = arith.addf %120, %119 : vector<2x128xf32>
    %122 = arith.divf %120, %121 : vector<2x128xf32>
    %123 = vector.extract_strided_slice %112 {offsets = [0, 128], sizes = [2, 128], strides = [1, 1]} : vector<2x384xf32> to vector<2x128xf32>
    %124 = vector.extract_strided_slice %114 {offsets = [0, 128], sizes = [2, 128], strides = [1, 1]} : vector<2x384xf32> to vector<2x128xf32>
    %125 = arith.addf %123, %124 : vector<2x128xf32>
    %126 = arith.negf %125 : vector<2x128xf32>
    %127 = math.exp %126 : vector<2x128xf32>
    %cst_44 = arith.constant 1.000000e+00 : f32
    %128 = vector.broadcast %cst_44 : f32 to vector<2x128xf32>
    %129 = arith.addf %128, %127 : vector<2x128xf32>
    %130 = arith.divf %128, %129 : vector<2x128xf32>
    %131 = vector.extract_strided_slice %112 {offsets = [0, 256], sizes = [2, 128], strides = [1, 1]} : vector<2x384xf32> to vector<2x128xf32>
    %132 = vector.extract_strided_slice %114 {offsets = [0, 256], sizes = [2, 128], strides = [1, 1]} : vector<2x384xf32> to vector<2x128xf32>
    %c0_45 = arith.constant 0 : index
    %c0_46 = arith.constant 0 : index
    %133 = vector.load %arg5[%c0_45, %c0_46] : memref<1x128xf32, #tpu.memory_space<vmem>>, vector<1x128xf32>
    %134 = vector.broadcast %133 : vector<1x128xf32> to vector<2x128xf32>
    %135 = arith.addf %132, %134 : vector<2x128xf32>
    %136 = arith.mulf %122, %135 : vector<2x128xf32>
    %137 = arith.addf %131, %136 : vector<2x128xf32>
    %138 = math.tanh %137 : vector<2x128xf32>
    %139 = arith.subf %107, %138 : vector<2x128xf32>
    %140 = arith.mulf %130, %139 : vector<2x128xf32>
    %141 = arith.addf %138, %140 : vector<2x128xf32>
    %142 = arith.index_cast %110 : i32 to index
    %c0_47 = arith.constant 0 : index
    %143 = vector.load %arg14[%142, %c0_47] : memref<16x128xf32, #tpu.memory_space<vmem>>, vector<2x128xf32>
    tpu.vector_store %arg14[%142, %c0_47], %141 {strides = array<i32>} : memref<16x128xf32, #tpu.memory_space<vmem>>, vector<2x128xf32>,
    %c4_i32 = arith.constant 4 : i32
    %c2_i32_48 = arith.constant 2 : i32
    %144 = arith.muli %c4_i32, %c2_i32_48 : i32
    %145 = arith.index_cast %144 : i32 to index
    %c0_49 = arith.constant 0 : index
    %146 = vector.load %arg13[%145, %c0_49] : memref<16x384xf32, #tpu.memory_space<vmem>>, vector<2x384xf32>
    %c0_50 = arith.constant 0 : index
    %c0_51 = arith.constant 0 : index
    %147 = vector.load %arg3[%c0_50, %c0_51] : memref<128x384xf32, #tpu.memory_space<vmem>>, vector<128x384xf32>
    %cst_52 = arith.constant dense<0.000000e+00> : vector<2x384xf32>
    %148 = tpu.matmul %141, %147, %cst_52 {dimension_numbers = #tpu.dot_dimension_numbers<[1], [0], [0], [1], [0, 0, 1, 1], [], []>} : vector<2x128xf32>, vector<128x384xf32>, vector<2x384xf32> -> vector<2x384xf32>
    %149 = vector.extract_strided_slice %146 {offsets = [0, 0], sizes = [2, 128], strides = [1, 1]} : vector<2x384xf32> to vector<2x128xf32>
    %150 = vector.extract_strided_slice %148 {offsets = [0, 0], sizes = [2, 128], strides = [1, 1]} : vector<2x384xf32> to vector<2x128xf32>
    %151 = arith.addf %149, %150 : vector<2x128xf32>
    %152 = arith.negf %151 : vector<2x128xf32>
    %153 = math.exp %152 : vector<2x128xf32>
    %cst_53 = arith.constant 1.000000e+00 : f32
    %154 = vector.broadcast %cst_53 : f32 to vector<2x128xf32>
    %155 = arith.addf %154, %153 : vector<2x128xf32>
    %156 = arith.divf %154, %155 : vector<2x128xf32>
    %157 = vector.extract_strided_slice %146 {offsets = [0, 128], sizes = [2, 128], strides = [1, 1]} : vector<2x384xf32> to vector<2x128xf32>
    %158 = vector.extract_strided_slice %148 {offsets = [0, 128], sizes = [2, 128], strides = [1, 1]} : vector<2x384xf32> to vector<2x128xf32>
    %159 = arith.addf %157, %158 : vector<2x128xf32>
    %160 = arith.negf %159 : vector<2x128xf32>
    %161 = math.exp %160 : vector<2x128xf32>
    %cst_54 = arith.constant 1.000000e+00 : f32
    %162 = vector.broadcast %cst_54 : f32 to vector<2x128xf32>
    %163 = arith.addf %162, %161 : vector<2x128xf32>
    %164 = arith.divf %162, %163 : vector<2x128xf32>
    %165 = vector.extract_strided_slice %146 {offsets = [0, 256], sizes = [2, 128], strides = [1, 1]} : vector<2x384xf32> to vector<2x128xf32>
    %166 = vector.extract_strided_slice %148 {offsets = [0, 256], sizes = [2, 128], strides = [1, 1]} : vector<2x384xf32> to vector<2x128xf32>
    %c0_55 = arith.constant 0 : index
    %c0_56 = arith.constant 0 : index
    %167 = vector.load %arg5[%c0_55, %c0_56] : memref<1x128xf32, #tpu.memory_space<vmem>>, vector<1x128xf32>
    %168 = vector.broadcast %167 : vector<1x128xf32> to vector<2x128xf32>
    %169 = arith.addf %166, %168 : vector<2x128xf32>
    %170 = arith.mulf %156, %169 : vector<2x128xf32>
    %171 = arith.addf %165, %170 : vector<2x128xf32>
    %172 = math.tanh %171 : vector<2x128xf32>
    %173 = arith.subf %141, %172 : vector<2x128xf32>
    %174 = arith.mulf %164, %173 : vector<2x128xf32>
    %175 = arith.addf %172, %174 : vector<2x128xf32>
    %176 = arith.index_cast %144 : i32 to index
    %c0_57 = arith.constant 0 : index
    %177 = vector.load %arg14[%176, %c0_57] : memref<16x128xf32, #tpu.memory_space<vmem>>, vector<2x128xf32>
    tpu.vector_store %arg14[%176, %c0_57], %175 {strides = array<i32>} : memref<16x128xf32, #tpu.memory_space<vmem>>, vector<2x128xf32>,
    %c5_i32 = arith.constant 5 : i32
    %c2_i32_58 = arith.constant 2 : i32
    %178 = arith.muli %c5_i32, %c2_i32_58 : i32
    %179 = arith.index_cast %178 : i32 to index
    %c0_59 = arith.constant 0 : index
    %180 = vector.load %arg13[%179, %c0_59] : memref<16x384xf32, #tpu.memory_space<vmem>>, vector<2x384xf32>
    %c0_60 = arith.constant 0 : index
    %c0_61 = arith.constant 0 : index
    %181 = vector.load %arg3[%c0_60, %c0_61] : memref<128x384xf32, #tpu.memory_space<vmem>>, vector<128x384xf32>
    %cst_62 = arith.constant dense<0.000000e+00> : vector<2x384xf32>
    %182 = tpu.matmul %175, %181, %cst_62 {dimension_numbers = #tpu.dot_dimension_numbers<[1], [0], [0], [1], [0, 0, 1, 1], [], []>} : vector<2x128xf32>, vector<128x384xf32>, vector<2x384xf32> -> vector<2x384xf32>
    %183 = vector.extract_strided_slice %180 {offsets = [0, 0], sizes = [2, 128], strides = [1, 1]} : vector<2x384xf32> to vector<2x128xf32>
    %184 = vector.extract_strided_slice %182 {offsets = [0, 0], sizes = [2, 128], strides = [1, 1]} : vector<2x384xf32> to vector<2x128xf32>
    %185 = arith.addf %183, %184 : vector<2x128xf32>
    %186 = arith.negf %185 : vector<2x128xf32>
    %187 = math.exp %186 : vector<2x128xf32>
    %cst_63 = arith.constant 1.000000e+00 : f32
    %188 = vector.broadcast %cst_63 : f32 to vector<2x128xf32>
    %189 = arith.addf %188, %187 : vector<2x128xf32>
    %190 = arith.divf %188, %189 : vector<2x128xf32>
    %191 = vector.extract_strided_slice %180 {offsets = [0, 128], sizes = [2, 128], strides = [1, 1]} : vector<2x384xf32> to vector<2x128xf32>
    %192 = vector.extract_strided_slice %182 {offsets = [0, 128], sizes = [2, 128], strides = [1, 1]} : vector<2x384xf32> to vector<2x128xf32>
    %193 = arith.addf %191, %192 : vector<2x128xf32>
    %194 = arith.negf %193 : vector<2x128xf32>
    %195 = math.exp %194 : vector<2x128xf32>
    %cst_64 = arith.constant 1.000000e+00 : f32
    %196 = vector.broadcast %cst_64 : f32 to vector<2x128xf32>
    %197 = arith.addf %196, %195 : vector<2x128xf32>
    %198 = arith.divf %196, %197 : vector<2x128xf32>
    %199 = vector.extract_strided_slice %180 {offsets = [0, 256], sizes = [2, 128], strides = [1, 1]} : vector<2x384xf32> to vector<2x128xf32>
    %200 = vector.extract_strided_slice %182 {offsets = [0, 256], sizes = [2, 128], strides = [1, 1]} : vector<2x384xf32> to vector<2x128xf32>
    %c0_65 = arith.constant 0 : index
    %c0_66 = arith.constant 0 : index
    %201 = vector.load %arg5[%c0_65, %c0_66] : memref<1x128xf32, #tpu.memory_space<vmem>>, vector<1x128xf32>
    %202 = vector.broadcast %201 : vector<1x128xf32> to vector<2x128xf32>
    %203 = arith.addf %200, %202 : vector<2x128xf32>
    %204 = arith.mulf %190, %203 : vector<2x128xf32>
    %205 = arith.addf %199, %204 : vector<2x128xf32>
    %206 = math.tanh %205 : vector<2x128xf32>
    %207 = arith.subf %175, %206 : vector<2x128xf32>
    %208 = arith.mulf %198, %207 : vector<2x128xf32>
    %209 = arith.addf %206, %208 : vector<2x128xf32>
    %210 = arith.index_cast %178 : i32 to index
    %c0_67 = arith.constant 0 : index
    %211 = vector.load %arg14[%210, %c0_67] : memref<16x128xf32, #tpu.memory_space<vmem>>, vector<2x128xf32>
    tpu.vector_store %arg14[%210, %c0_67], %209 {strides = array<i32>} : memref<16x128xf32, #tpu.memory_space<vmem>>, vector<2x128xf32>,
    %c6_i32 = arith.constant 6 : i32
    %c2_i32_68 = arith.constant 2 : i32
    %212 = arith.muli %c6_i32, %c2_i32_68 : i32
    %213 = arith.index_cast %212 : i32 to index
    %c0_69 = arith.constant 0 : index
    %214 = vector.load %arg13[%213, %c0_69] : memref<16x384xf32, #tpu.memory_space<vmem>>, vector<2x384xf32>
    %c0_70 = arith.constant 0 : index
    %c0_71 = arith.constant 0 : index
    %215 = vector.load %arg3[%c0_70, %c0_71] : memref<128x384xf32, #tpu.memory_space<vmem>>, vector<128x384xf32>
    %cst_72 = arith.constant dense<0.000000e+00> : vector<2x384xf32>
    %216 = tpu.matmul %209, %215, %cst_72 {dimension_numbers = #tpu.dot_dimension_numbers<[1], [0], [0], [1], [0, 0, 1, 1], [], []>} : vector<2x128xf32>, vector<128x384xf32>, vector<2x384xf32> -> vector<2x384xf32>
    %217 = vector.extract_strided_slice %214 {offsets = [0, 0], sizes = [2, 128], strides = [1, 1]} : vector<2x384xf32> to vector<2x128xf32>
    %218 = vector.extract_strided_slice %216 {offsets = [0, 0], sizes = [2, 128], strides = [1, 1]} : vector<2x384xf32> to vector<2x128xf32>
    %219 = arith.addf %217, %218 : vector<2x128xf32>
    %220 = arith.negf %219 : vector<2x128xf32>
    %221 = math.exp %220 : vector<2x128xf32>
    %cst_73 = arith.constant 1.000000e+00 : f32
    %222 = vector.broadcast %cst_73 : f32 to vector<2x128xf32>
    %223 = arith.addf %222, %221 : vector<2x128xf32>
    %224 = arith.divf %222, %223 : vector<2x128xf32>
    %225 = vector.extract_strided_slice %214 {offsets = [0, 128], sizes = [2, 128], strides = [1, 1]} : vector<2x384xf32> to vector<2x128xf32>
    %226 = vector.extract_strided_slice %216 {offsets = [0, 128], sizes = [2, 128], strides = [1, 1]} : vector<2x384xf32> to vector<2x128xf32>
    %227 = arith.addf %225, %226 : vector<2x128xf32>
    %228 = arith.negf %227 : vector<2x128xf32>
    %229 = math.exp %228 : vector<2x128xf32>
    %cst_74 = arith.constant 1.000000e+00 : f32
    %230 = vector.broadcast %cst_74 : f32 to vector<2x128xf32>
    %231 = arith.addf %230, %229 : vector<2x128xf32>
    %232 = arith.divf %230, %231 : vector<2x128xf32>
    %233 = vector.extract_strided_slice %214 {offsets = [0, 256], sizes = [2, 128], strides = [1, 1]} : vector<2x384xf32> to vector<2x128xf32>
    %234 = vector.extract_strided_slice %216 {offsets = [0, 256], sizes = [2, 128], strides = [1, 1]} : vector<2x384xf32> to vector<2x128xf32>
    %c0_75 = arith.constant 0 : index
    %c0_76 = arith.constant 0 : index
    %235 = vector.load %arg5[%c0_75, %c0_76] : memref<1x128xf32, #tpu.memory_space<vmem>>, vector<1x128xf32>
    %236 = vector.broadcast %235 : vector<1x128xf32> to vector<2x128xf32>
    %237 = arith.addf %234, %236 : vector<2x128xf32>
    %238 = arith.mulf %224, %237 : vector<2x128xf32>
    %239 = arith.addf %233, %238 : vector<2x128xf32>
    %240 = math.tanh %239 : vector<2x128xf32>
    %241 = arith.subf %209, %240 : vector<2x128xf32>
    %242 = arith.mulf %232, %241 : vector<2x128xf32>
    %243 = arith.addf %240, %242 : vector<2x128xf32>
    %244 = arith.index_cast %212 : i32 to index
    %c0_77 = arith.constant 0 : index
    %245 = vector.load %arg14[%244, %c0_77] : memref<16x128xf32, #tpu.memory_space<vmem>>, vector<2x128xf32>
    tpu.vector_store %arg14[%244, %c0_77], %243 {strides = array<i32>} : memref<16x128xf32, #tpu.memory_space<vmem>>, vector<2x128xf32>,
    %c7_i32 = arith.constant 7 : i32
    %c2_i32_78 = arith.constant 2 : i32
    %246 = arith.muli %c7_i32, %c2_i32_78 : i32
    %247 = arith.index_cast %246 : i32 to index
    %c0_79 = arith.constant 0 : index
    %248 = vector.load %arg13[%247, %c0_79] : memref<16x384xf32, #tpu.memory_space<vmem>>, vector<2x384xf32>
    %c0_80 = arith.constant 0 : index
    %c0_81 = arith.constant 0 : index
    %249 = vector.load %arg3[%c0_80, %c0_81] : memref<128x384xf32, #tpu.memory_space<vmem>>, vector<128x384xf32>
    %cst_82 = arith.constant dense<0.000000e+00> : vector<2x384xf32>
    %250 = tpu.matmul %243, %249, %cst_82 {dimension_numbers = #tpu.dot_dimension_numbers<[1], [0], [0], [1], [0, 0, 1, 1], [], []>} : vector<2x128xf32>, vector<128x384xf32>, vector<2x384xf32> -> vector<2x384xf32>
    %251 = vector.extract_strided_slice %248 {offsets = [0, 0], sizes = [2, 128], strides = [1, 1]} : vector<2x384xf32> to vector<2x128xf32>
    %252 = vector.extract_strided_slice %250 {offsets = [0, 0], sizes = [2, 128], strides = [1, 1]} : vector<2x384xf32> to vector<2x128xf32>
    %253 = arith.addf %251, %252 : vector<2x128xf32>
    %254 = arith.negf %253 : vector<2x128xf32>
    %255 = math.exp %254 : vector<2x128xf32>
    %cst_83 = arith.constant 1.000000e+00 : f32
    %256 = vector.broadcast %cst_83 : f32 to vector<2x128xf32>
    %257 = arith.addf %256, %255 : vector<2x128xf32>
    %258 = arith.divf %256, %257 : vector<2x128xf32>
    %259 = vector.extract_strided_slice %248 {offsets = [0, 128], sizes = [2, 128], strides = [1, 1]} : vector<2x384xf32> to vector<2x128xf32>
    %260 = vector.extract_strided_slice %250 {offsets = [0, 128], sizes = [2, 128], strides = [1, 1]} : vector<2x384xf32> to vector<2x128xf32>
    %261 = arith.addf %259, %260 : vector<2x128xf32>
    %262 = arith.negf %261 : vector<2x128xf32>
    %263 = math.exp %262 : vector<2x128xf32>
    %cst_84 = arith.constant 1.000000e+00 : f32
    %264 = vector.broadcast %cst_84 : f32 to vector<2x128xf32>
    %265 = arith.addf %264, %263 : vector<2x128xf32>
    %266 = arith.divf %264, %265 : vector<2x128xf32>
    %267 = vector.extract_strided_slice %248 {offsets = [0, 256], sizes = [2, 128], strides = [1, 1]} : vector<2x384xf32> to vector<2x128xf32>
    %268 = vector.extract_strided_slice %250 {offsets = [0, 256], sizes = [2, 128], strides = [1, 1]} : vector<2x384xf32> to vector<2x128xf32>
    %c0_85 = arith.constant 0 : index
    %c0_86 = arith.constant 0 : index
    %269 = vector.load %arg5[%c0_85, %c0_86] : memref<1x128xf32, #tpu.memory_space<vmem>>, vector<1x128xf32>
    %270 = vector.broadcast %269 : vector<1x128xf32> to vector<2x128xf32>
    %271 = arith.addf %268, %270 : vector<2x128xf32>
    %272 = arith.mulf %258, %271 : vector<2x128xf32>
    %273 = arith.addf %267, %272 : vector<2x128xf32>
    %274 = math.tanh %273 : vector<2x128xf32>
    %275 = arith.subf %243, %274 : vector<2x128xf32>
    %276 = arith.mulf %266, %275 : vector<2x128xf32>
    %277 = arith.addf %274, %276 : vector<2x128xf32>
    %278 = arith.index_cast %246 : i32 to index
    %c0_87 = arith.constant 0 : index
    %279 = vector.load %arg14[%278, %c0_87] : memref<16x128xf32, #tpu.memory_space<vmem>>, vector<2x128xf32>
    tpu.vector_store %arg14[%278, %c0_87], %277 {strides = array<i32>} : memref<16x128xf32, #tpu.memory_space<vmem>>, vector<2x128xf32>,
    %c8_i32 = arith.constant 8 : i32
    %c0_88 = arith.constant 0 : index
    %c0_89 = arith.constant 0 : index
    %280 = vector.load %arg14[%c0_88, %c0_89] : memref<16x128xf32, #tpu.memory_space<vmem>>, vector<16x128xf32>
    %c0_90 = arith.constant 0 : index
    %c0_91 = arith.constant 0 : index
    %281 = vector.load %arg6[%c0_90, %c0_91] : memref<128x384xf32, #tpu.memory_space<vmem>>, vector<128x384xf32>
    %cst_92 = arith.constant dense<0.000000e+00> : vector<16x384xf32>
    %282 = tpu.matmul %280, %281, %cst_92 {dimension_numbers = #tpu.dot_dimension_numbers<[1], [0], [0], [1], [0, 0, 1, 1], [], []>} : vector<16x128xf32>, vector<128x384xf32>, vector<16x384xf32> -> vector<16x384xf32>
    %c0_93 = arith.constant 0 : index
    %c0_94 = arith.constant 0 : index
    %283 = vector.load %arg8[%c0_93, %c0_94] : memref<1x384xf32, #tpu.memory_space<vmem>>, vector<1x384xf32>
    %284 = vector.broadcast %283 : vector<1x384xf32> to vector<16x384xf32>
    %285 = arith.addf %282, %284 : vector<16x384xf32>
    %c0_95 = arith.constant 0 : index
    %c0_96 = arith.constant 0 : index
    %286 = vector.load %arg13[%c0_95, %c0_96] : memref<16x384xf32, #tpu.memory_space<vmem>>, vector<16x384xf32>
    tpu.vector_store %arg13[%c0_95, %c0_96], %285 {strides = array<i32>} : memref<16x384xf32, #tpu.memory_space<vmem>>, vector<16x384xf32>,
    %cst_97 = arith.constant 0.000000e+00 : f32
    %287 = vector.broadcast %cst_97 : f32 to vector<2x128xf32>
    %c0_i32_98 = arith.constant 0 : i32
    %c2_i32_99 = arith.constant 2 : i32
    %288 = arith.muli %c0_i32_98, %c2_i32_99 : i32
    %289 = arith.index_cast %288 : i32 to index
    %c0_100 = arith.constant 0 : index
    %290 = vector.load %arg13[%289, %c0_100] : memref<16x384xf32, #tpu.memory_space<vmem>>, vector<2x384xf32>
    %c0_101 = arith.constant 0 : index
    %c0_102 = arith.constant 0 : index
    %291 = vector.load %arg7[%c0_101, %c0_102] : memref<128x384xf32, #tpu.memory_space<vmem>>, vector<128x384xf32>
    %cst_103 = arith.constant dense<0.000000e+00> : vector<2x384xf32>
    %292 = tpu.matmul %287, %291, %cst_103 {dimension_numbers = #tpu.dot_dimension_numbers<[1], [0], [0], [1], [0, 0, 1, 1], [], []>} : vector<2x128xf32>, vector<128x384xf32>, vector<2x384xf32> -> vector<2x384xf32>
    %293 = vector.extract_strided_slice %290 {offsets = [0, 0], sizes = [2, 128], strides = [1, 1]} : vector<2x384xf32> to vector<2x128xf32>
    %294 = vector.extract_strided_slice %292 {offsets = [0, 0], sizes = [2, 128], strides = [1, 1]} : vector<2x384xf32> to vector<2x128xf32>
    %295 = arith.addf %293, %294 : vector<2x128xf32>
    %296 = arith.negf %295 : vector<2x128xf32>
    %297 = math.exp %296 : vector<2x128xf32>
    %cst_104 = arith.constant 1.000000e+00 : f32
    %298 = vector.broadcast %cst_104 : f32 to vector<2x128xf32>
    %299 = arith.addf %298, %297 : vector<2x128xf32>
    %300 = arith.divf %298, %299 : vector<2x128xf32>
    %301 = vector.extract_strided_slice %290 {offsets = [0, 128], sizes = [2, 128], strides = [1, 1]} : vector<2x384xf32> to vector<2x128xf32>
    %302 = vector.extract_strided_slice %292 {offsets = [0, 128], sizes = [2, 128], strides = [1, 1]} : vector<2x384xf32> to vector<2x128xf32>
    %303 = arith.addf %301, %302 : vector<2x128xf32>
    %304 = arith.negf %303 : vector<2x128xf32>
    %305 = math.exp %304 : vector<2x128xf32>
    %cst_105 = arith.constant 1.000000e+00 : f32
    %306 = vector.broadcast %cst_105 : f32 to vector<2x128xf32>
    %307 = arith.addf %306, %305 : vector<2x128xf32>
    %308 = arith.divf %306, %307 : vector<2x128xf32>
    %309 = vector.extract_strided_slice %290 {offsets = [0, 256], sizes = [2, 128], strides = [1, 1]} : vector<2x384xf32> to vector<2x128xf32>
    %310 = vector.extract_strided_slice %292 {offsets = [0, 256], sizes = [2, 128], strides = [1, 1]} : vector<2x384xf32> to vector<2x128xf32>
    %c0_106 = arith.constant 0 : index
    %c0_107 = arith.constant 0 : index
    %311 = vector.load %arg9[%c0_106, %c0_107] : memref<1x128xf32, #tpu.memory_space<vmem>>, vector<1x128xf32>
    %312 = vector.broadcast %311 : vector<1x128xf32> to vector<2x128xf32>
    %313 = arith.addf %310, %312 : vector<2x128xf32>
    %314 = arith.mulf %300, %313 : vector<2x128xf32>
    %315 = arith.addf %309, %314 : vector<2x128xf32>
    %316 = math.tanh %315 : vector<2x128xf32>
    %317 = arith.subf %287, %316 : vector<2x128xf32>
    %318 = arith.mulf %308, %317 : vector<2x128xf32>
    %319 = arith.addf %316, %318 : vector<2x128xf32>
    %320 = arith.index_cast %288 : i32 to index
    %c0_108 = arith.constant 0 : index
    %321 = vector.load %arg14[%320, %c0_108] : memref<16x128xf32, #tpu.memory_space<vmem>>, vector<2x128xf32>
    tpu.vector_store %arg14[%320, %c0_108], %319 {strides = array<i32>} : memref<16x128xf32, #tpu.memory_space<vmem>>, vector<2x128xf32>,
    %c1_i32_109 = arith.constant 1 : i32
    %c2_i32_110 = arith.constant 2 : i32
    %322 = arith.muli %c1_i32_109, %c2_i32_110 : i32
    %323 = arith.index_cast %322 : i32 to index
    %c0_111 = arith.constant 0 : index
    %324 = vector.load %arg13[%323, %c0_111] : memref<16x384xf32, #tpu.memory_space<vmem>>, vector<2x384xf32>
    %c0_112 = arith.constant 0 : index
    %c0_113 = arith.constant 0 : index
    %325 = vector.load %arg7[%c0_112, %c0_113] : memref<128x384xf32, #tpu.memory_space<vmem>>, vector<128x384xf32>
    %cst_114 = arith.constant dense<0.000000e+00> : vector<2x384xf32>
    %326 = tpu.matmul %319, %325, %cst_114 {dimension_numbers = #tpu.dot_dimension_numbers<[1], [0], [0], [1], [0, 0, 1, 1], [], []>} : vector<2x128xf32>, vector<128x384xf32>, vector<2x384xf32> -> vector<2x384xf32>
    %327 = vector.extract_strided_slice %324 {offsets = [0, 0], sizes = [2, 128], strides = [1, 1]} : vector<2x384xf32> to vector<2x128xf32>
    %328 = vector.extract_strided_slice %326 {offsets = [0, 0], sizes = [2, 128], strides = [1, 1]} : vector<2x384xf32> to vector<2x128xf32>
    %329 = arith.addf %327, %328 : vector<2x128xf32>
    %330 = arith.negf %329 : vector<2x128xf32>
    %331 = math.exp %330 : vector<2x128xf32>
    %cst_115 = arith.constant 1.000000e+00 : f32
    %332 = vector.broadcast %cst_115 : f32 to vector<2x128xf32>
    %333 = arith.addf %332, %331 : vector<2x128xf32>
    %334 = arith.divf %332, %333 : vector<2x128xf32>
    %335 = vector.extract_strided_slice %324 {offsets = [0, 128], sizes = [2, 128], strides = [1, 1]} : vector<2x384xf32> to vector<2x128xf32>
    %336 = vector.extract_strided_slice %326 {offsets = [0, 128], sizes = [2, 128], strides = [1, 1]} : vector<2x384xf32> to vector<2x128xf32>
    %337 = arith.addf %335, %336 : vector<2x128xf32>
    %338 = arith.negf %337 : vector<2x128xf32>
    %339 = math.exp %338 : vector<2x128xf32>
    %cst_116 = arith.constant 1.000000e+00 : f32
    %340 = vector.broadcast %cst_116 : f32 to vector<2x128xf32>
    %341 = arith.addf %340, %339 : vector<2x128xf32>
    %342 = arith.divf %340, %341 : vector<2x128xf32>
    %343 = vector.extract_strided_slice %324 {offsets = [0, 256], sizes = [2, 128], strides = [1, 1]} : vector<2x384xf32> to vector<2x128xf32>
    %344 = vector.extract_strided_slice %326 {offsets = [0, 256], sizes = [2, 128], strides = [1, 1]} : vector<2x384xf32> to vector<2x128xf32>
    %c0_117 = arith.constant 0 : index
    %c0_118 = arith.constant 0 : index
    %345 = vector.load %arg9[%c0_117, %c0_118] : memref<1x128xf32, #tpu.memory_space<vmem>>, vector<1x128xf32>
    %346 = vector.broadcast %345 : vector<1x128xf32> to vector<2x128xf32>
    %347 = arith.addf %344, %346 : vector<2x128xf32>
    %348 = arith.mulf %334, %347 : vector<2x128xf32>
    %349 = arith.addf %343, %348 : vector<2x128xf32>
    %350 = math.tanh %349 : vector<2x128xf32>
    %351 = arith.subf %319, %350 : vector<2x128xf32>
    %352 = arith.mulf %342, %351 : vector<2x128xf32>
    %353 = arith.addf %350, %352 : vector<2x128xf32>
    %354 = arith.index_cast %322 : i32 to index
    %c0_119 = arith.constant 0 : index
    %355 = vector.load %arg14[%354, %c0_119] : memref<16x128xf32, #tpu.memory_space<vmem>>, vector<2x128xf32>
    tpu.vector_store %arg14[%354, %c0_119], %353 {strides = array<i32>} : memref<16x128xf32, #tpu.memory_space<vmem>>, vector<2x128xf32>,
    %c2_i32_120 = arith.constant 2 : i32
    %c2_i32_121 = arith.constant 2 : i32
    %356 = arith.muli %c2_i32_120, %c2_i32_121 : i32
    %357 = arith.index_cast %356 : i32 to index
    %c0_122 = arith.constant 0 : index
    %358 = vector.load %arg13[%357, %c0_122] : memref<16x384xf32, #tpu.memory_space<vmem>>, vector<2x384xf32>
    %c0_123 = arith.constant 0 : index
    %c0_124 = arith.constant 0 : index
    %359 = vector.load %arg7[%c0_123, %c0_124] : memref<128x384xf32, #tpu.memory_space<vmem>>, vector<128x384xf32>
    %cst_125 = arith.constant dense<0.000000e+00> : vector<2x384xf32>
    %360 = tpu.matmul %353, %359, %cst_125 {dimension_numbers = #tpu.dot_dimension_numbers<[1], [0], [0], [1], [0, 0, 1, 1], [], []>} : vector<2x128xf32>, vector<128x384xf32>, vector<2x384xf32> -> vector<2x384xf32>
    %361 = vector.extract_strided_slice %358 {offsets = [0, 0], sizes = [2, 128], strides = [1, 1]} : vector<2x384xf32> to vector<2x128xf32>
    %362 = vector.extract_strided_slice %360 {offsets = [0, 0], sizes = [2, 128], strides = [1, 1]} : vector<2x384xf32> to vector<2x128xf32>
    %363 = arith.addf %361, %362 : vector<2x128xf32>
    %364 = arith.negf %363 : vector<2x128xf32>
    %365 = math.exp %364 : vector<2x128xf32>
    %cst_126 = arith.constant 1.000000e+00 : f32
    %366 = vector.broadcast %cst_126 : f32 to vector<2x128xf32>
    %367 = arith.addf %366, %365 : vector<2x128xf32>
    %368 = arith.divf %366, %367 : vector<2x128xf32>
    %369 = vector.extract_strided_slice %358 {offsets = [0, 128], sizes = [2, 128], strides = [1, 1]} : vector<2x384xf32> to vector<2x128xf32>
    %370 = vector.extract_strided_slice %360 {offsets = [0, 128], sizes = [2, 128], strides = [1, 1]} : vector<2x384xf32> to vector<2x128xf32>
    %371 = arith.addf %369, %370 : vector<2x128xf32>
    %372 = arith.negf %371 : vector<2x128xf32>
    %373 = math.exp %372 : vector<2x128xf32>
    %cst_127 = arith.constant 1.000000e+00 : f32
    %374 = vector.broadcast %cst_127 : f32 to vector<2x128xf32>
    %375 = arith.addf %374, %373 : vector<2x128xf32>
    %376 = arith.divf %374, %375 : vector<2x128xf32>
    %377 = vector.extract_strided_slice %358 {offsets = [0, 256], sizes = [2, 128], strides = [1, 1]} : vector<2x384xf32> to vector<2x128xf32>
    %378 = vector.extract_strided_slice %360 {offsets = [0, 256], sizes = [2, 128], strides = [1, 1]} : vector<2x384xf32> to vector<2x128xf32>
    %c0_128 = arith.constant 0 : index
    %c0_129 = arith.constant 0 : index
    %379 = vector.load %arg9[%c0_128, %c0_129] : memref<1x128xf32, #tpu.memory_space<vmem>>, vector<1x128xf32>
    %380 = vector.broadcast %379 : vector<1x128xf32> to vector<2x128xf32>
    %381 = arith.addf %378, %380 : vector<2x128xf32>
    %382 = arith.mulf %368, %381 : vector<2x128xf32>
    %383 = arith.addf %377, %382 : vector<2x128xf32>
    %384 = math.tanh %383 : vector<2x128xf32>
    %385 = arith.subf %353, %384 : vector<2x128xf32>
    %386 = arith.mulf %376, %385 : vector<2x128xf32>
    %387 = arith.addf %384, %386 : vector<2x128xf32>
    %388 = arith.index_cast %356 : i32 to index
    %c0_130 = arith.constant 0 : index
    %389 = vector.load %arg14[%388, %c0_130] : memref<16x128xf32, #tpu.memory_space<vmem>>, vector<2x128xf32>
    tpu.vector_store %arg14[%388, %c0_130], %387 {strides = array<i32>} : memref<16x128xf32, #tpu.memory_space<vmem>>, vector<2x128xf32>,
    %c3_i32_131 = arith.constant 3 : i32
    %c2_i32_132 = arith.constant 2 : i32
    %390 = arith.muli %c3_i32_131, %c2_i32_132 : i32
    %391 = arith.index_cast %390 : i32 to index
    %c0_133 = arith.constant 0 : index
    %392 = vector.load %arg13[%391, %c0_133] : memref<16x384xf32, #tpu.memory_space<vmem>>, vector<2x384xf32>
    %c0_134 = arith.constant 0 : index
    %c0_135 = arith.constant 0 : index
    %393 = vector.load %arg7[%c0_134, %c0_135] : memref<128x384xf32, #tpu.memory_space<vmem>>, vector<128x384xf32>
    %cst_136 = arith.constant dense<0.000000e+00> : vector<2x384xf32>
    %394 = tpu.matmul %387, %393, %cst_136 {dimension_numbers = #tpu.dot_dimension_numbers<[1], [0], [0], [1], [0, 0, 1, 1], [], []>} : vector<2x128xf32>, vector<128x384xf32>, vector<2x384xf32> -> vector<2x384xf32>
    %395 = vector.extract_strided_slice %392 {offsets = [0, 0], sizes = [2, 128], strides = [1, 1]} : vector<2x384xf32> to vector<2x128xf32>
    %396 = vector.extract_strided_slice %394 {offsets = [0, 0], sizes = [2, 128], strides = [1, 1]} : vector<2x384xf32> to vector<2x128xf32>
    %397 = arith.addf %395, %396 : vector<2x128xf32>
    %398 = arith.negf %397 : vector<2x128xf32>
    %399 = math.exp %398 : vector<2x128xf32>
    %cst_137 = arith.constant 1.000000e+00 : f32
    %400 = vector.broadcast %cst_137 : f32 to vector<2x128xf32>
    %401 = arith.addf %400, %399 : vector<2x128xf32>
    %402 = arith.divf %400, %401 : vector<2x128xf32>
    %403 = vector.extract_strided_slice %392 {offsets = [0, 128], sizes = [2, 128], strides = [1, 1]} : vector<2x384xf32> to vector<2x128xf32>
    %404 = vector.extract_strided_slice %394 {offsets = [0, 128], sizes = [2, 128], strides = [1, 1]} : vector<2x384xf32> to vector<2x128xf32>
    %405 = arith.addf %403, %404 : vector<2x128xf32>
    %406 = arith.negf %405 : vector<2x128xf32>
    %407 = math.exp %406 : vector<2x128xf32>
    %cst_138 = arith.constant 1.000000e+00 : f32
    %408 = vector.broadcast %cst_138 : f32 to vector<2x128xf32>
    %409 = arith.addf %408, %407 : vector<2x128xf32>
    %410 = arith.divf %408, %409 : vector<2x128xf32>
    %411 = vector.extract_strided_slice %392 {offsets = [0, 256], sizes = [2, 128], strides = [1, 1]} : vector<2x384xf32> to vector<2x128xf32>
    %412 = vector.extract_strided_slice %394 {offsets = [0, 256], sizes = [2, 128], strides = [1, 1]} : vector<2x384xf32> to vector<2x128xf32>
    %c0_139 = arith.constant 0 : index
    %c0_140 = arith.constant 0 : index
    %413 = vector.load %arg9[%c0_139, %c0_140] : memref<1x128xf32, #tpu.memory_space<vmem>>, vector<1x128xf32>
    %414 = vector.broadcast %413 : vector<1x128xf32> to vector<2x128xf32>
    %415 = arith.addf %412, %414 : vector<2x128xf32>
    %416 = arith.mulf %402, %415 : vector<2x128xf32>
    %417 = arith.addf %411, %416 : vector<2x128xf32>
    %418 = math.tanh %417 : vector<2x128xf32>
    %419 = arith.subf %387, %418 : vector<2x128xf32>
    %420 = arith.mulf %410, %419 : vector<2x128xf32>
    %421 = arith.addf %418, %420 : vector<2x128xf32>
    %422 = arith.index_cast %390 : i32 to index
    %c0_141 = arith.constant 0 : index
    %423 = vector.load %arg14[%422, %c0_141] : memref<16x128xf32, #tpu.memory_space<vmem>>, vector<2x128xf32>
    tpu.vector_store %arg14[%422, %c0_141], %421 {strides = array<i32>} : memref<16x128xf32, #tpu.memory_space<vmem>>, vector<2x128xf32>,
    %c4_i32_142 = arith.constant 4 : i32
    %c2_i32_143 = arith.constant 2 : i32
    %424 = arith.muli %c4_i32_142, %c2_i32_143 : i32
    %425 = arith.index_cast %424 : i32 to index
    %c0_144 = arith.constant 0 : index
    %426 = vector.load %arg13[%425, %c0_144] : memref<16x384xf32, #tpu.memory_space<vmem>>, vector<2x384xf32>
    %c0_145 = arith.constant 0 : index
    %c0_146 = arith.constant 0 : index
    %427 = vector.load %arg7[%c0_145, %c0_146] : memref<128x384xf32, #tpu.memory_space<vmem>>, vector<128x384xf32>
    %cst_147 = arith.constant dense<0.000000e+00> : vector<2x384xf32>
    %428 = tpu.matmul %421, %427, %cst_147 {dimension_numbers = #tpu.dot_dimension_numbers<[1], [0], [0], [1], [0, 0, 1, 1], [], []>} : vector<2x128xf32>, vector<128x384xf32>, vector<2x384xf32> -> vector<2x384xf32>
    %429 = vector.extract_strided_slice %426 {offsets = [0, 0], sizes = [2, 128], strides = [1, 1]} : vector<2x384xf32> to vector<2x128xf32>
    %430 = vector.extract_strided_slice %428 {offsets = [0, 0], sizes = [2, 128], strides = [1, 1]} : vector<2x384xf32> to vector<2x128xf32>
    %431 = arith.addf %429, %430 : vector<2x128xf32>
    %432 = arith.negf %431 : vector<2x128xf32>
    %433 = math.exp %432 : vector<2x128xf32>
    %cst_148 = arith.constant 1.000000e+00 : f32
    %434 = vector.broadcast %cst_148 : f32 to vector<2x128xf32>
    %435 = arith.addf %434, %433 : vector<2x128xf32>
    %436 = arith.divf %434, %435 : vector<2x128xf32>
    %437 = vector.extract_strided_slice %426 {offsets = [0, 128], sizes = [2, 128], strides = [1, 1]} : vector<2x384xf32> to vector<2x128xf32>
    %438 = vector.extract_strided_slice %428 {offsets = [0, 128], sizes = [2, 128], strides = [1, 1]} : vector<2x384xf32> to vector<2x128xf32>
    %439 = arith.addf %437, %438 : vector<2x128xf32>
    %440 = arith.negf %439 : vector<2x128xf32>
    %441 = math.exp %440 : vector<2x128xf32>
    %cst_149 = arith.constant 1.000000e+00 : f32
    %442 = vector.broadcast %cst_149 : f32 to vector<2x128xf32>
    %443 = arith.addf %442, %441 : vector<2x128xf32>
    %444 = arith.divf %442, %443 : vector<2x128xf32>
    %445 = vector.extract_strided_slice %426 {offsets = [0, 256], sizes = [2, 128], strides = [1, 1]} : vector<2x384xf32> to vector<2x128xf32>
    %446 = vector.extract_strided_slice %428 {offsets = [0, 256], sizes = [2, 128], strides = [1, 1]} : vector<2x384xf32> to vector<2x128xf32>
    %c0_150 = arith.constant 0 : index
    %c0_151 = arith.constant 0 : index
    %447 = vector.load %arg9[%c0_150, %c0_151] : memref<1x128xf32, #tpu.memory_space<vmem>>, vector<1x128xf32>
    %448 = vector.broadcast %447 : vector<1x128xf32> to vector<2x128xf32>
    %449 = arith.addf %446, %448 : vector<2x128xf32>
    %450 = arith.mulf %436, %449 : vector<2x128xf32>
    %451 = arith.addf %445, %450 : vector<2x128xf32>
    %452 = math.tanh %451 : vector<2x128xf32>
    %453 = arith.subf %421, %452 : vector<2x128xf32>
    %454 = arith.mulf %444, %453 : vector<2x128xf32>
    %455 = arith.addf %452, %454 : vector<2x128xf32>
    %456 = arith.index_cast %424 : i32 to index
    %c0_152 = arith.constant 0 : index
    %457 = vector.load %arg14[%456, %c0_152] : memref<16x128xf32, #tpu.memory_space<vmem>>, vector<2x128xf32>
    tpu.vector_store %arg14[%456, %c0_152], %455 {strides = array<i32>} : memref<16x128xf32, #tpu.memory_space<vmem>>, vector<2x128xf32>,
    %c5_i32_153 = arith.constant 5 : i32
    %c2_i32_154 = arith.constant 2 : i32
    %458 = arith.muli %c5_i32_153, %c2_i32_154 : i32
    %459 = arith.index_cast %458 : i32 to index
    %c0_155 = arith.constant 0 : index
    %460 = vector.load %arg13[%459, %c0_155] : memref<16x384xf32, #tpu.memory_space<vmem>>, vector<2x384xf32>
    %c0_156 = arith.constant 0 : index
    %c0_157 = arith.constant 0 : index
    %461 = vector.load %arg7[%c0_156, %c0_157] : memref<128x384xf32, #tpu.memory_space<vmem>>, vector<128x384xf32>
    %cst_158 = arith.constant dense<0.000000e+00> : vector<2x384xf32>
    %462 = tpu.matmul %455, %461, %cst_158 {dimension_numbers = #tpu.dot_dimension_numbers<[1], [0], [0], [1], [0, 0, 1, 1], [], []>} : vector<2x128xf32>, vector<128x384xf32>, vector<2x384xf32> -> vector<2x384xf32>
    %463 = vector.extract_strided_slice %460 {offsets = [0, 0], sizes = [2, 128], strides = [1, 1]} : vector<2x384xf32> to vector<2x128xf32>
    %464 = vector.extract_strided_slice %462 {offsets = [0, 0], sizes = [2, 128], strides = [1, 1]} : vector<2x384xf32> to vector<2x128xf32>
    %465 = arith.addf %463, %464 : vector<2x128xf32>
    %466 = arith.negf %465 : vector<2x128xf32>
    %467 = math.exp %466 : vector<2x128xf32>
    %cst_159 = arith.constant 1.000000e+00 : f32
    %468 = vector.broadcast %cst_159 : f32 to vector<2x128xf32>
    %469 = arith.addf %468, %467 : vector<2x128xf32>
    %470 = arith.divf %468, %469 : vector<2x128xf32>
    %471 = vector.extract_strided_slice %460 {offsets = [0, 128], sizes = [2, 128], strides = [1, 1]} : vector<2x384xf32> to vector<2x128xf32>
    %472 = vector.extract_strided_slice %462 {offsets = [0, 128], sizes = [2, 128], strides = [1, 1]} : vector<2x384xf32> to vector<2x128xf32>
    %473 = arith.addf %471, %472 : vector<2x128xf32>
    %474 = arith.negf %473 : vector<2x128xf32>
    %475 = math.exp %474 : vector<2x128xf32>
    %cst_160 = arith.constant 1.000000e+00 : f32
    %476 = vector.broadcast %cst_160 : f32 to vector<2x128xf32>
    %477 = arith.addf %476, %475 : vector<2x128xf32>
    %478 = arith.divf %476, %477 : vector<2x128xf32>
    %479 = vector.extract_strided_slice %460 {offsets = [0, 256], sizes = [2, 128], strides = [1, 1]} : vector<2x384xf32> to vector<2x128xf32>
    %480 = vector.extract_strided_slice %462 {offsets = [0, 256], sizes = [2, 128], strides = [1, 1]} : vector<2x384xf32> to vector<2x128xf32>
    %c0_161 = arith.constant 0 : index
    %c0_162 = arith.constant 0 : index
    %481 = vector.load %arg9[%c0_161, %c0_162] : memref<1x128xf32, #tpu.memory_space<vmem>>, vector<1x128xf32>
    %482 = vector.broadcast %481 : vector<1x128xf32> to vector<2x128xf32>
    %483 = arith.addf %480, %482 : vector<2x128xf32>
    %484 = arith.mulf %470, %483 : vector<2x128xf32>
    %485 = arith.addf %479, %484 : vector<2x128xf32>
    %486 = math.tanh %485 : vector<2x128xf32>
    %487 = arith.subf %455, %486 : vector<2x128xf32>
    %488 = arith.mulf %478, %487 : vector<2x128xf32>
    %489 = arith.addf %486, %488 : vector<2x128xf32>
    %490 = arith.index_cast %458 : i32 to index
    %c0_163 = arith.constant 0 : index
    %491 = vector.load %arg14[%490, %c0_163] : memref<16x128xf32, #tpu.memory_space<vmem>>, vector<2x128xf32>
    tpu.vector_store %arg14[%490, %c0_163], %489 {strides = array<i32>} : memref<16x128xf32, #tpu.memory_space<vmem>>, vector<2x128xf32>,
    %c6_i32_164 = arith.constant 6 : i32
    %c2_i32_165 = arith.constant 2 : i32
    %492 = arith.muli %c6_i32_164, %c2_i32_165 : i32
    %493 = arith.index_cast %492 : i32 to index
    %c0_166 = arith.constant 0 : index
    %494 = vector.load %arg13[%493, %c0_166] : memref<16x384xf32, #tpu.memory_space<vmem>>, vector<2x384xf32>
    %c0_167 = arith.constant 0 : index
    %c0_168 = arith.constant 0 : index
    %495 = vector.load %arg7[%c0_167, %c0_168] : memref<128x384xf32, #tpu.memory_space<vmem>>, vector<128x384xf32>
    %cst_169 = arith.constant dense<0.000000e+00> : vector<2x384xf32>
    %496 = tpu.matmul %489, %495, %cst_169 {dimension_numbers = #tpu.dot_dimension_numbers<[1], [0], [0], [1], [0, 0, 1, 1], [], []>} : vector<2x128xf32>, vector<128x384xf32>, vector<2x384xf32> -> vector<2x384xf32>
    %497 = vector.extract_strided_slice %494 {offsets = [0, 0], sizes = [2, 128], strides = [1, 1]} : vector<2x384xf32> to vector<2x128xf32>
    %498 = vector.extract_strided_slice %496 {offsets = [0, 0], sizes = [2, 128], strides = [1, 1]} : vector<2x384xf32> to vector<2x128xf32>
    %499 = arith.addf %497, %498 : vector<2x128xf32>
    %500 = arith.negf %499 : vector<2x128xf32>
    %501 = math.exp %500 : vector<2x128xf32>
    %cst_170 = arith.constant 1.000000e+00 : f32
    %502 = vector.broadcast %cst_170 : f32 to vector<2x128xf32>
    %503 = arith.addf %502, %501 : vector<2x128xf32>
    %504 = arith.divf %502, %503 : vector<2x128xf32>
    %505 = vector.extract_strided_slice %494 {offsets = [0, 128], sizes = [2, 128], strides = [1, 1]} : vector<2x384xf32> to vector<2x128xf32>
    %506 = vector.extract_strided_slice %496 {offsets = [0, 128], sizes = [2, 128], strides = [1, 1]} : vector<2x384xf32> to vector<2x128xf32>
    %507 = arith.addf %505, %506 : vector<2x128xf32>
    %508 = arith.negf %507 : vector<2x128xf32>
    %509 = math.exp %508 : vector<2x128xf32>
    %cst_171 = arith.constant 1.000000e+00 : f32
    %510 = vector.broadcast %cst_171 : f32 to vector<2x128xf32>
    %511 = arith.addf %510, %509 : vector<2x128xf32>
    %512 = arith.divf %510, %511 : vector<2x128xf32>
    %513 = vector.extract_strided_slice %494 {offsets = [0, 256], sizes = [2, 128], strides = [1, 1]} : vector<2x384xf32> to vector<2x128xf32>
    %514 = vector.extract_strided_slice %496 {offsets = [0, 256], sizes = [2, 128], strides = [1, 1]} : vector<2x384xf32> to vector<2x128xf32>
    %c0_172 = arith.constant 0 : index
    %c0_173 = arith.constant 0 : index
    %515 = vector.load %arg9[%c0_172, %c0_173] : memref<1x128xf32, #tpu.memory_space<vmem>>, vector<1x128xf32>
    %516 = vector.broadcast %515 : vector<1x128xf32> to vector<2x128xf32>
    %517 = arith.addf %514, %516 : vector<2x128xf32>
    %518 = arith.mulf %504, %517 : vector<2x128xf32>
    %519 = arith.addf %513, %518 : vector<2x128xf32>
    %520 = math.tanh %519 : vector<2x128xf32>
    %521 = arith.subf %489, %520 : vector<2x128xf32>
    %522 = arith.mulf %512, %521 : vector<2x128xf32>
    %523 = arith.addf %520, %522 : vector<2x128xf32>
    %524 = arith.index_cast %492 : i32 to index
    %c0_174 = arith.constant 0 : index
    %525 = vector.load %arg14[%524, %c0_174] : memref<16x128xf32, #tpu.memory_space<vmem>>, vector<2x128xf32>
    tpu.vector_store %arg14[%524, %c0_174], %523 {strides = array<i32>} : memref<16x128xf32, #tpu.memory_space<vmem>>, vector<2x128xf32>,
    %c7_i32_175 = arith.constant 7 : i32
    %c2_i32_176 = arith.constant 2 : i32
    %526 = arith.muli %c7_i32_175, %c2_i32_176 : i32
    %527 = arith.index_cast %526 : i32 to index
    %c0_177 = arith.constant 0 : index
    %528 = vector.load %arg13[%527, %c0_177] : memref<16x384xf32, #tpu.memory_space<vmem>>, vector<2x384xf32>
    %c0_178 = arith.constant 0 : index
    %c0_179 = arith.constant 0 : index
    %529 = vector.load %arg7[%c0_178, %c0_179] : memref<128x384xf32, #tpu.memory_space<vmem>>, vector<128x384xf32>
    %cst_180 = arith.constant dense<0.000000e+00> : vector<2x384xf32>
    %530 = tpu.matmul %523, %529, %cst_180 {dimension_numbers = #tpu.dot_dimension_numbers<[1], [0], [0], [1], [0, 0, 1, 1], [], []>} : vector<2x128xf32>, vector<128x384xf32>, vector<2x384xf32> -> vector<2x384xf32>
    %531 = vector.extract_strided_slice %528 {offsets = [0, 0], sizes = [2, 128], strides = [1, 1]} : vector<2x384xf32> to vector<2x128xf32>
    %532 = vector.extract_strided_slice %530 {offsets = [0, 0], sizes = [2, 128], strides = [1, 1]} : vector<2x384xf32> to vector<2x128xf32>
    %533 = arith.addf %531, %532 : vector<2x128xf32>
    %534 = arith.negf %533 : vector<2x128xf32>
    %535 = math.exp %534 : vector<2x128xf32>
    %cst_181 = arith.constant 1.000000e+00 : f32
    %536 = vector.broadcast %cst_181 : f32 to vector<2x128xf32>
    %537 = arith.addf %536, %535 : vector<2x128xf32>
    %538 = arith.divf %536, %537 : vector<2x128xf32>
    %539 = vector.extract_strided_slice %528 {offsets = [0, 128], sizes = [2, 128], strides = [1, 1]} : vector<2x384xf32> to vector<2x128xf32>
    %540 = vector.extract_strided_slice %530 {offsets = [0, 128], sizes = [2, 128], strides = [1, 1]} : vector<2x384xf32> to vector<2x128xf32>
    %541 = arith.addf %539, %540 : vector<2x128xf32>
    %542 = arith.negf %541 : vector<2x128xf32>
    %543 = math.exp %542 : vector<2x128xf32>
    %cst_182 = arith.constant 1.000000e+00 : f32
    %544 = vector.broadcast %cst_182 : f32 to vector<2x128xf32>
    %545 = arith.addf %544, %543 : vector<2x128xf32>
    %546 = arith.divf %544, %545 : vector<2x128xf32>
    %547 = vector.extract_strided_slice %528 {offsets = [0, 256], sizes = [2, 128], strides = [1, 1]} : vector<2x384xf32> to vector<2x128xf32>
    %548 = vector.extract_strided_slice %530 {offsets = [0, 256], sizes = [2, 128], strides = [1, 1]} : vector<2x384xf32> to vector<2x128xf32>
    %c0_183 = arith.constant 0 : index
    %c0_184 = arith.constant 0 : index
    %549 = vector.load %arg9[%c0_183, %c0_184] : memref<1x128xf32, #tpu.memory_space<vmem>>, vector<1x128xf32>
    %550 = vector.broadcast %549 : vector<1x128xf32> to vector<2x128xf32>
    %551 = arith.addf %548, %550 : vector<2x128xf32>
    %552 = arith.mulf %538, %551 : vector<2x128xf32>
    %553 = arith.addf %547, %552 : vector<2x128xf32>
    %554 = math.tanh %553 : vector<2x128xf32>
    %555 = arith.subf %523, %554 : vector<2x128xf32>
    %556 = arith.mulf %546, %555 : vector<2x128xf32>
    %557 = arith.addf %554, %556 : vector<2x128xf32>
    %558 = arith.index_cast %526 : i32 to index
    %c0_185 = arith.constant 0 : index
    %559 = vector.load %arg14[%558, %c0_185] : memref<16x128xf32, #tpu.memory_space<vmem>>, vector<2x128xf32>
    tpu.vector_store %arg14[%558, %c0_185], %557 {strides = array<i32>} : memref<16x128xf32, #tpu.memory_space<vmem>>, vector<2x128xf32>,
    %c8_i32_186 = arith.constant 8 : i32
    %c0_187 = arith.constant 0 : index
    %c0_188 = arith.constant 0 : index
    %560 = vector.load %arg14[%c0_187, %c0_188] : memref<16x128xf32, #tpu.memory_space<vmem>>, vector<16x128xf32>
    %c0_189 = arith.constant 0 : index
    %c0_190 = arith.constant 0 : index
    %561 = vector.load %arg10[%c0_189, %c0_190] : memref<128x128xf32, #tpu.memory_space<vmem>>, vector<128x128xf32>
    %cst_191 = arith.constant dense<0.000000e+00> : vector<16x128xf32>
    %562 = tpu.matmul %560, %561, %cst_191 {dimension_numbers = #tpu.dot_dimension_numbers<[1], [0], [0], [1], [0, 0, 1, 1], [], []>} : vector<16x128xf32>, vector<128x128xf32>, vector<16x128xf32> -> vector<16x128xf32>
    %c0_192 = arith.constant 0 : index
    %c0_193 = arith.constant 0 : index
    %563 = vector.load %arg11[%c0_192, %c0_193] : memref<1x128xf32, #tpu.memory_space<vmem>>, vector<1x128xf32>
    %564 = vector.broadcast %563 : vector<1x128xf32> to vector<16x128xf32>
    %565 = arith.addf %562, %564 : vector<16x128xf32>
    %c0_194 = arith.constant 0 : index
    %c0_195 = arith.constant 0 : index
    %566 = vector.load %arg12[%c0_194, %c0_195] : memref<16x128xf32, #tpu.memory_space<vmem>>, vector<16x128xf32>
    tpu.vector_store %arg12[%c0_194, %c0_195], %565 {strides = array<i32>} : memref<16x128xf32, #tpu.memory_space<vmem>>, vector<16x128xf32>,
    return
  }
  func.func @transform_0(%arg0: i32) -> (i32, i32) {
    %c0_i32 = arith.constant 0 : i32
    %c0_i32_0 = arith.constant 0 : i32
    %c0_i32_1 = arith.constant 0 : i32
    return %c0_i32, %c0_i32_0 : i32, i32
  }
  func.func @transform_1(%arg0: i32) -> (i32, i32) {
    %c0_i32 = arith.constant 0 : i32
    %c0_i32_0 = arith.constant 0 : i32
    %c0_i32_1 = arith.constant 0 : i32
    return %c0_i32, %c0_i32_0 : i32, i32
  }
  func.func @transform_2(%arg0: i32) -> (i32, i32) {
    %c0_i32 = arith.constant 0 : i32
    %c0_i32_0 = arith.constant 0 : i32
    %c0_i32_1 = arith.constant 0 : i32
    return %c0_i32, %c0_i32_0 : i32, i32
  }
  func.func @transform_3(%arg0: i32) -> (i32, i32) {
    %c0_i32 = arith.constant 0 : i32
    %c0_i32_0 = arith.constant 0 : i32
    %c0_i32_1 = arith.constant 0 : i32
    return %c0_i32, %c0_i32_0 : i32, i32
  }
  func.func @transform_4(%arg0: i32) -> (i32, i32) {
    %c0_i32 = arith.constant 0 : i32
    %c0_i32_0 = arith.constant 0 : i32
    %c0_i32_1 = arith.constant 0 : i32
    return %c0_i32, %c0_i32_0 : i32, i32
  }
  func.func @transform_5(%arg0: i32) -> (i32, i32) {
    %c0_i32 = arith.constant 0 : i32
    %c0_i32_0 = arith.constant 0 : i32
    %c0_i32_1 = arith.constant 0 : i32
    return %c0_i32, %c0_i32_0 : i32, i32
  }
  func.func @transform_6(%arg0: i32) -> (i32, i32) {
    %c0_i32 = arith.constant 0 : i32
    %c0_i32_0 = arith.constant 0 : i32
    %c0_i32_1 = arith.constant 0 : i32
    return %c0_i32, %c0_i32_0 : i32, i32
  }
  func.func @transform_7(%arg0: i32) -> (i32, i32) {
    %c0_i32 = arith.constant 0 : i32
    %c0_i32_0 = arith.constant 0 : i32
    %c0_i32_1 = arith.constant 0 : i32
    return %c0_i32, %c0_i32_0 : i32, i32
  }
  func.func @transform_8(%arg0: i32) -> (i32, i32) {
    %c0_i32 = arith.constant 0 : i32
    %c0_i32_0 = arith.constant 0 : i32
    %c0_i32_1 = arith.constant 0 : i32
    return %c0_i32, %c0_i32_0 : i32, i32
  }
  func.func @transform_9(%arg0: i32) -> (i32, i32) {
    %c0_i32 = arith.constant 0 : i32
    %c0_i32_0 = arith.constant 0 : i32
    %c0_i32_1 = arith.constant 0 : i32
    return %c0_i32, %c0_i32_0 : i32, i32
  }
  func.func @transform_10(%arg0: i32) -> (i32, i32) {
    %c0_i32 = arith.constant 0 : i32
    %c0_i32_0 = arith.constant 0 : i32
    %c0_i32_1 = arith.constant 0 : i32
    return %c0_i32, %c0_i32_0 : i32, i32
  }
  func.func @transform_11(%arg0: i32) -> (i32, i32) {
    %c0_i32 = arith.constant 0 : i32
    %c0_i32_0 = arith.constant 0 : i32
    %c0_i32_1 = arith.constant 0 : i32
    return %c0_i32, %c0_i32_0 : i32, i32
  }
}

</mosaic_0001>

<bundles_post_ra>
// kernel: forward.1
= control target key start
LH: loop header
LB: loop body
LE: loop exit
PB: predicated region body
PF: predicated region fallthrough
CT: control target
= control target key end

     0   :  { %16 = vsyncpa [#allocation5], 0  ;;  %s7394_s0 = inlined_call_operand.vmem [shape: f32[16,16], index: 0, kind: input, shape index: {}]   ;;  %s7395_s1 = inlined_call_operand.hbm [shape: f32[16,384], index: 1, kind: input, shape index: {}]   ;;  %s7396_s2 = inlined_call_operand.hbm [shape: f32[128,384], index: 2, kind: input, shape index: {}]   ;;  %s7397_s3 = inlined_call_operand.vmem [shape: f32[1,384], index: 3, kind: input, shape index: {}]   ;;  %s7398_s4 = inlined_call_operand.vmem [shape: f32[1,128], index: 4, kind: input, shape index: {}]   ;;  %s7399_s5 = inlined_call_operand.hbm [shape: f32[128,384], index: 5, kind: input, shape index: {}]   ;;  %s7400_s6 = inlined_call_operand.hbm [shape: f32[128,384], index: 6, kind: input, shape index: {}]   ;;  %s7401_s7 = inlined_call_operand.vmem [shape: f32[1,384], index: 7, kind: input, shape index: {}]   ;;  %s7402_s8 = inlined_call_operand.vmem [shape: f32[1,128], index: 8, kind: input, shape index: {}]   ;;  %s7403_s9 = inlined_call_operand.hbm [shape: f32[128,128], index: 9, kind: input, shape index: {}]   ;;  %s7404_s10 = inlined_call_operand.vmem [shape: f32[1,128], index: 10, kind: input, shape index: {}]   ;;  %s7405_s11 = inlined_call_operand.vmem [shape: f32[16,128], index: 11, kind: output, shape index: {}]  }
   0x1   :  { %17 = vsyncpa [#allocation7], 0 }
   0x2   :  { %18 = vsyncpa [#allocation10], 0  ;;  %s5667_s17 = smov [#allocation6]   ;;  %s5668_s19 = smov [#allocation9]  }
   0x3   :  { %s38_s18 = sshll.u32 %s5667_s17, 4  ;;  %s66_s20 = sshll.u32 %s5668_s19, 4  ;;  %s39_s18 = int_to_ptr.vmem [resolvable:$true] %s38_s18  ;;  %s67_s20 = int_to_ptr.vmem [resolvable:$true] %s66_s20 }
   0x4   :  { %s5569_s21 = scalar_lea.vmem %s39_s18, 6144  ;;  %p5574_p1 = scmp.lt.s32.totalorder %s39_s18, %s39_s18 }
   0x5   :  { %p5570_p0 = scmp.ne.s32.totalorder %s39_s18, %s5569_s21  ;;  %p5575_p2 = scmp.lt.s32.totalorder %s5569_s21, %s5569_s21 }
   0x7   :  { %p5576_p3 = por %p5575_p2, %p5574_p1 }
   0x9   :  { %p5577_p4 = pnand %p5576_p3, %p5570_p0 }
   0xb   :  { %5580 = shalt.err (!%p5577_p4)
}
   0xc   :  { %s5669_s22 = smov 384   ;;  %s5670_s23 = smov 24  }
   0xd   :  { %44 = dma.hbm_to_vmem [thread:$0]  %s7396_s2, 6144, %s39_s18, [#allocation7], %s5669_s22, %s5669_s22, %s5670_s23  }
   0xe   :  { %s5589_s26 = scalar_lea.vmem %s67_s20, 6144  ;;  %p5594_p6 = scmp.lt.s32.totalorder %s67_s20, %s67_s20 }
   0xf   :  { %p5590_p5 = scmp.ne.s32.totalorder %s67_s20, %s5589_s26  ;;  %p5595_p7 = scmp.lt.s32.totalorder %s5589_s26, %s5589_s26 }
  0x11   :  { %p5596_p8 = por %p5595_p7, %p5594_p6 }
  0x13   :  { %p5597_p9 = pnand %p5596_p8, %p5590_p5 }
  0x15   :  { %5600 = shalt.err (!%p5597_p9)
}
  0x16   :  { %72 = dma.hbm_to_vmem [thread:$0]  %s7400_s6, 6144, %s67_s20, [#allocation10], %s5669_s22, %s5669_s22, %s5670_s23  }
  0x17   :  { %s5671_s29 = smov [#allocation4]   ;;  %s5672_s12 = smov [#allocation8]  }
  0x18   :  { %s26_s30 = sshll.u32 %s5671_s29, 4  ;;  %s54_s13 = sshll.u32 %s5672_s12, 4  ;;  %s27_s30 = int_to_ptr.vmem [resolvable:$true] %s26_s30  ;;  %s55_s13 = int_to_ptr.vmem [resolvable:$true] %s54_s13 }
  0x19   :  { %s5609_s2 = scalar_lea.vmem %s27_s30, 768  ;;  %p5614_p11 = scmp.lt.s32.totalorder %s27_s30, %s27_s30 }
  0x1a   :  { %p5610_p10 = scmp.ne.s32.totalorder %s27_s30, %s5609_s2  ;;  %p5615_p12 = scmp.lt.s32.totalorder %s5609_s2, %s5609_s2 }
  0x1c   :  { %p5616_p13 = por %p5615_p12, %p5614_p11 }
  0x1e   :  { %p5617_p0 = pnand %p5616_p13, %p5610_p10 }
  0x20   :  { %5620 = shalt.err (!%p5617_p0)
}
  0x21   :  { %32 = dma.hbm_to_vmem [thread:$0]  %s7395_s1, 768, %s27_s30, [#allocation5], %s5669_s22, %s5669_s22, %s5670_s23  }
  0x22   :  { %s5629_s6 = scalar_lea.vmem %s55_s13, 6144  ;;  %p5634_p2 = scmp.lt.s32.totalorder %s55_s13, %s55_s13 }
  0x23   :  { %p5630_p1 = scmp.ne.s32.totalorder %s55_s13, %s5629_s6  ;;  %p5635_p3 = scmp.lt.s32.totalorder %s5629_s6, %s5629_s6 }
  0x25   :  { %p5636_p4 = por %p5635_p3, %p5634_p2 }
  0x27   :  { %p5637_p5 = pnand %p5636_p4, %p5630_p1 }
  0x29   :  { %5640 = shalt.err (!%p5637_p5)
}
  0x2a   :  { %60 = dma.hbm_to_vmem [thread:$0]  %s7399_s5, 6144, %s55_s13, [#allocation7], %s5669_s22, %s5669_s22, %s5670_s23  }
  0x2b   :  { %s5673_s18 = smov [#allocation11]  }
  0x2c   :  { %s82_s19 = sshll.u32 %s5673_s18, 4  ;;  %s83_s19 = int_to_ptr.vmem [resolvable:$true] %s82_s19 }
  0x2d   :  { %s5649_s20 = scalar_lea.vmem %s83_s19, 2048  ;;  %p5654_p7 = scmp.lt.s32.totalorder %s83_s19, %s83_s19 }
  0x2e   :  { %p5650_p6 = scmp.ne.s32.totalorder %s83_s19, %s5649_s20  ;;  %p5655_p8 = scmp.lt.s32.totalorder %s5649_s20, %s5649_s20 }
  0x30   :  { %p5656_p9 = por %p5655_p8, %p5654_p7 }
  0x32   :  { %p5657_p10 = pnand %p5656_p9, %p5650_p6 }
  0x34   :  { %5660 = shalt.err (!%p5657_p10)
}
  0x35   :  { %s5674_s1 = smov 128   ;;  %s5675_s21 = smov 8  }
  0x36   :  { %88 = dma.hbm_to_vmem [thread:$0]  %s7403_s9, 2048, %s83_s19, [#allocation10], %s5674_s1, %s5674_s1, %s5675_s21  }
  0x37   :  { %5661 = dma.done.wait [#allocation5], 768  }
  0x38   :  { %5662 = vsyncadd [#allocation5], 4294966528 }
  0x39   :  { %5663 = dma.done.wait [#allocation7], 12288  }
  0x3a   :  { %5664 = vsyncadd [#allocation7], 4294955008 }
  0x3b   :  { %5665 = dma.done.wait [#allocation10], 8192  }
  0x3c   :  { %5666 = vsyncadd [#allocation10], 4294959104  ;;  %v7406_v0 = vmov 0.0   ;;  %v5767_v1 = vld [vmem:[#allocation6 + $0x170] sm:$0xff]  ;;  %v5769_v2 = vld [vmem:[#allocation6 + $0x168] sm:$0xff]  ;;  %vm131_vm0 = vcmask 130048   ;;  %v116_v57 = vlaneseq }
  0x3d   :  { %202 = vmatprep.mubr.f32.mxu1 %v7406_v0  ;;  %411 = vmatprep.mubr.f32.mxu0 %v7406_v0  ;;  %7463 = vst [vmem:[#allocation15_spill] sm:$0xff] %v5767_v1  ;;  %v5771_v3 = vld [vmem:[#allocation6 + $0x158] sm:$0xff]  ;;  %v5774_v4 = vld [vmem:[#allocation6 + $0x150] sm:$0xff]  ;;  %v5777_v5 = vld [vmem:[#allocation6 + $0x140] sm:$0xff]  ;;  %vm5677_vm1 = vmmov 0  }
  0x3e   :  { %347 = vmatprep.subr.mxu0 %v5767_v1  ;;  %v5780_v6 = vld [vmem:[#allocation6 + $0x138] sm:$0xff]  ;;  %v5783_v7 = vld [vmem:[#allocation6 + $0x128] sm:$0xff]  ;;  %v5786_v8 = vld [vmem:[#allocation6 + $0x120] sm:$0xff]  ;;  %v6011_v58 = vshrl.u32 %v116_v57, 7 }
  0x3f   :  { %348 = vmatpush1.msra.mxu0 %v5769_v2  ;;  %v112_v9 = vld [vmem:[#allocation4 + $0x20] sm:$0xff]  ;;  %v111_v11 = vld [vmem:[#allocation4 + $0x18] sm:$0xff]  ;;  %v109_v12 = vld [vmem:[#allocation4 + $0x8] sm:$0xff] }
  0x40   :  { %349 = vmatprep.subr.mxu0 %v5771_v3  ;;  %v5789_v10 = vld [vmem:[#allocation6 + $0x110] sm:$0xff]  ;;  %166 = vmatprep.subr.mxu1 %v112_v9  ;;  %v5792_v13 = vld [vmem:[#allocation6 + $0x108] sm:$0xff]  ;;  %v5795_v15 = vld [vmem:[#allocation6 + $0xf8] sm:$0xff]  ;;  %7469 = vst [vmem:[#allocation21_spill] sm:$0xff] %v6011_v58  ;;  %v7408_v59 = vsub.s32 0, %v6011_v58  ;;  %v7410_v61 = vsub.s32 1, %v6011_v58 }
  0x41   :  { %350 = vmatpush1.msra.mxu0 %v5774_v4  ;;  %167 = vmatpush1.msra.mxu1 %v111_v11  ;;  %v108_v14 = vld [vmem:[#allocation4] sm:$0xff]  ;;  %v113_v18 = vld [vmem:[#allocation4 + $0x28] sm:$0xff]  ;;  %v5804_v19 = vld [vmem:[#allocation6 + $0xe0] sm:$0xff] }
  0x42   :  { %351 = vmatprep.subr.mxu0 %v5777_v5  ;;  %168 = vmatprep.subr.mxu1 %v109_v12  ;;  %v106_v16 = vld [vmem:[%s7394_s0] sm:$0xff]  ;;  %v5808_v20 = vld [vmem:[#allocation6 + $0xd8] sm:$0xff]  ;;  %v5814_v22 = vld [vmem:[#allocation6 + $0xc8] sm:$0xff] }
  0x43   :  { %352 = vmatpush1.msra.mxu0 %v5780_v6  ;;  %v5801_v17 = vld [vmem:[#allocation6 + $0xf0] sm:$0xff]  ;;  %169 = vmatpush1.msra.mxu1 %v108_v14  ;;  %v107_v21 = vld [vmem:[%s7394_s0 + $0x8] sm:$0xff]  ;;  %v110_v23 = vld [vmem:[#allocation4 + $0x10] sm:$0xff]  ;;  %v7419_v14 = vsub.s32 2, %v6011_v58 }
  0x44   :  { %353 = vmatprep.subr.mxu0 %v5783_v7  ;;  %4388 = vmatmul.mubr.msk.f32.vlgmr.msra.gmra.mxu1 %vm131_vm0, %v106_v16  ;;  %v5817_v24 = vld [vmem:[#allocation6 + $0xc0] sm:$0xff]  ;;  %v5821_v25 = vld [vmem:[#allocation6 + $0xb0] sm:$0xff]  ;;  %v5825_v26 = vld [vmem:[#allocation6 + $0xa8] sm:$0xff] }
  0x45   :  { %354 = vmatpush1.msra.mxu0 %v5786_v8  ;;  %4753 = vmatprep.subr.mxu1 %v113_v18  ;;  %v5828_v27 = vld [vmem:[#allocation6 + $0x98] sm:$0xff]  ;;  %v5831_v28 = vld [vmem:[#allocation6 + $0x90] sm:$0xff]  ;;  %v5837_v30 = vld [vmem:[#allocation6 + $0x80] sm:$0xff] }
  0x46   :  { %355 = vmatprep.subr.mxu0 %v5789_v10  ;;  %4754 = vmatpush3.msra.mxu1 %v113_v18  ;;  %v5834_v29 = vld [vmem:[#allocation6 + $0x178] sm:$0xff]  ;;  %v5844_v32 = vld [vmem:[#allocation6 + $0x160] sm:$0xff]  ;;  %v5847_v33 = vld [vmem:[#allocation6 + $0x68] sm:$0xff] }
  0x47   :  { %356 = vmatpush1.msra.mxu0 %v5792_v13  ;;  %208 = vmatprep.mubr.f32.mxu1 %v7406_v0  ;;  %v5841_v31 = vld [vmem:[#allocation6 + $0x78] sm:$0xff]  ;;  %v5851_v34 = vld [vmem:[#allocation6 + $0x60] sm:$0xff]  ;;  %v5854_v35 = vld [vmem:[#allocation6 + $0x148] sm:$0xff] }
  0x48   :  { %357 = vmatprep.subr.mxu0 %v5795_v15  ;;  %4389 = vmatmul.mubr.msk.f32.gmra.mxu1 %vm131_vm0, %v107_v21  ;;  %v5857_v36 = vld [vmem:[#allocation6 + $0x50] sm:$0xff]  ;;  %v5861_v37 = vld [vmem:[#allocation6 + $0x48] sm:$0xff]  ;;  %v5867_v39 = vld [vmem:[#allocation6 + $0x38] sm:$0xff] }
  0x49   :  { %358 = vmatpush1.msra.mxu0 %v5801_v17  ;;  %4755 = vmatprep.subr.mxu1 %v110_v23  ;;  %v5864_v38 = vld [vmem:[#allocation6 + $0x130] sm:$0xff]  ;;  %v5874_v41 = vld [vmem:[#allocation6 + $0x118] sm:$0xff]  ;;  %v5877_v42 = vld [vmem:[#allocation6 + $0x20] sm:$0xff] }
  0x4a   :  { %359 = vmatprep.subr.mxu0 %v5804_v19  ;;  %4756 = vmatpush3.msra.mxu1 %v110_v23  ;;  %v5871_v40 = vld [vmem:[#allocation6 + $0x30] sm:$0xff]  ;;  %v5881_v43 = vld [vmem:[#allocation6 + $0x18] sm:$0xff]  ;;  %v5884_v44 = vld [vmem:[#allocation6 + $0x100] sm:$0xff] }
  0x4b   :  { %360 = vmatpush1.msra.mxu0 %v5808_v20  ;;  %4757 = vmatprep.mubr.msk.f32.mxu1 %vm131_vm0, %v106_v16  ;;  %7464 = vst [vmem:[#allocation16_spill] sm:$0xff] %v5881_v43  ;;  %v5887_v45 = vld [vmem:[#allocation6 + $0x8] sm:$0xff]  ;;  %v5891_v46 = vld [vmem:[#allocation6] sm:$0xff]  ;;  %v5900_v48 = vld [vmem:[#allocation6 + $0xd0] sm:$0xff] }
  0x4c   :  { %361 = vmatprep.subr.mxu0 %v5814_v22  ;;  %4760 = vmatprep.subr.mxu1 %v7406_v0  ;;  %7465 = vst [vmem:[#allocation17_spill] sm:$0xff] %v5887_v45  ;;  %7466 = vst [vmem:[#allocation18_spill] sm:$0xff] %v5891_v46  ;;  %v5894_v47 = vld [vmem:[#allocation6 + $0xe8] sm:$0xff]  ;;  %v5906_v49 = vld [vmem:[#allocation6 + $0xb8] sm:$0xff] }
  0x4d   :  { %362 = vmatpush1.msra.mxu0 %v5817_v24  ;;  %4758 = vmatmul.mubr.msk.f32.vlgmr.msra.gmra.mxu1 %vm131_vm0, %v107_v21  ;;  %v5912_v50 = vld [vmem:[#allocation6 + $0xa0] sm:$0xff]  ;;  %v5918_v51 = vld [vmem:[#allocation6 + $0x88] sm:$0xff]  ;;  %v5924_v52 = vld [vmem:[#allocation6 + $0x70] sm:$0xff] }
  0x4e   :  { %363 = vmatprep.subr.mxu0 %v5821_v25  ;;  %4761 = vmatpush3.msra.mxu1 %v5834_v29  ;;  %v5930_v53 = vld [vmem:[#allocation6 + $0x58] sm:$0xff]  ;;  %v5936_v54 = vld [vmem:[#allocation6 + $0x40] sm:$0xff]  ;;  %v5942_v55 = vld [vmem:[#allocation6 + $0x28] sm:$0xff] }
  0x4f   :  { %364 = vmatpush1.msra.mxu0 %v5825_v26  ;;  %4762 = vmatprep.subr.mxu1 %v7406_v0  ;;  %7467 = vst [vmem:[#allocation19_spill] sm:$0xff] %v5942_v55  ;;  %v5948_v56 = vld [vmem:[#allocation6 + $0x10] sm:$0xff] }
  0x50   :  { %365 = vmatprep.subr.mxu0 %v5828_v27  ;;  %4763 = vmatpush3.msra.mxu1 %v5844_v32  ;;  %7468 = vst [vmem:[#allocation20_spill] sm:$0xff] %v5948_v56  ;;  %v114_v60 = vld [vmem:[%s7397_s3] sm:$0x7] }
  0x51   :  { %366 = vmatpush1.msra.mxu0 %v5831_v28  ;;  %4764 = vmatprep.subr.mxu1 %v7406_v0  ;;  %v119_v62 = vrot.slane %v114_v60, %v7408_v59  ;;  %v123_v63 = vrot.slane %v114_v60, %v7410_v61  ;;  %v127_v57 = vrot.slane %v114_v60, %v7419_v14 }
  0x52   :  { %367 = vmatprep.subr.mxu0 %v5837_v30  ;;  %4765 = vmatpush3.msra.mxu1 %v5854_v35 }
  0x53   :  { %368 = vmatpush1.msra.mxu0 %v5841_v31  ;;  %4766 = vmatprep.subr.mxu1 %v7406_v0 }
  0x54   :  { %369 = vmatprep.subr.mxu0 %v5847_v33  ;;  %4767 = vmatpush3.msra.mxu1 %v5864_v38 }
  0x55   :  { %370 = vmatpush1.msra.mxu0 %v5851_v34  ;;  %4768 = vmatprep.subr.mxu1 %v7406_v0 }
  0x56   :  { %371 = vmatprep.subr.mxu0 %v5857_v36  ;;  %4769 = vmatpush3.msra.mxu1 %v5874_v41 }
  0x57   :  { %372 = vmatpush1.msra.mxu0 %v5861_v37  ;;  %4770 = vmatprep.subr.mxu1 %v7406_v0 }
  0x58   :  { %373 = vmatprep.subr.mxu0 %v5867_v39  ;;  %4771 = vmatpush3.msra.mxu1 %v5884_v44 }
  0x59   :  { %374 = vmatpush1.msra.mxu0 %v5871_v40  ;;  %4772 = vmatprep.subr.mxu1 %v7406_v0 }
  0x5a   :  { %375 = vmatprep.subr.mxu0 %v5877_v42  ;;  %4773 = vmatpush3.msra.mxu1 %v5894_v47 }
  0x5b   :  { %376 = vmatpush1.msra.mxu0 %v5881_v43  ;;  %4774 = vmatprep.subr.mxu1 %v7406_v0 }
  0x5c   :  { %377 = vmatprep.subr.mxu0 %v5887_v45  ;;  %4775 = vmatpush3.msra.mxu1 %v5900_v48 }
  0x5d   :  { %378 = vmatpush1.msra.mxu0 %v5891_v46  ;;  %4792 = vmatprep.mubr.msk.f32.mxu1 %vm5677_vm1, %v7406_v0 }
  0x5e   :  { %412 = vmatmul.mubr.f32.vlgmr.msra.gmra.mxu0 %v7406_v0  ;;  %4776 = vmatprep.subr.mxu1 %v7406_v0 }
  0x5f   :  { %568 = vmatprep.subr.mxu0 %v5767_v1  ;;  %4777 = vmatpush3.msra.mxu1 %v5906_v49 }
  0x60   :  { %569 = vmatpush1.msra.mxu0 %v5769_v2  ;;  %4778 = vmatprep.subr.mxu1 %v7406_v0 }
  0x61   :  { %570 = vmatprep.subr.mxu0 %v5771_v3  ;;  %4779 = vmatpush3.msra.mxu1 %v5912_v50 }
  0x62   :  { %571 = vmatpush1.msra.mxu0 %v5774_v4  ;;  %4780 = vmatprep.subr.mxu1 %v7406_v0 }
  0x63   :  { %572 = vmatprep.subr.mxu0 %v5777_v5  ;;  %4781 = vmatpush3.msra.mxu1 %v5918_v51 }
  0x64   :  { %573 = vmatpush1.msra.mxu0 %v5780_v6  ;;  %4782 = vmatprep.subr.mxu1 %v7406_v0 }
  0x65   :  { %574 = vmatprep.subr.mxu0 %v5783_v7  ;;  %4783 = vmatpush3.msra.mxu1 %v5924_v52 }
  0x66   :  { %575 = vmatpush1.msra.mxu0 %v5786_v8  ;;  %4784 = vmatprep.subr.mxu1 %v7406_v0 }
  0x67   :  { %576 = vmatprep.subr.mxu0 %v5789_v10  ;;  %4785 = vmatpush3.msra.mxu1 %v5930_v53 }
  0x68   :  { %577 = vmatpush1.msra.mxu0 %v5792_v13  ;;  %4786 = vmatprep.subr.mxu1 %v7406_v0 }
  0x69   :  { %578 = vmatprep.subr.mxu0 %v5795_v15  ;;  %4787 = vmatpush3.msra.mxu1 %v5936_v54 }
  0x6a   :  { %579 = vmatpush1.msra.mxu0 %v5801_v17  ;;  %4788 = vmatprep.subr.mxu1 %v7406_v0 }
  0x6b   :  { %580 = vmatprep.subr.mxu0 %v5804_v19  ;;  %4789 = vmatpush3.msra.mxu1 %v5942_v55 }
  0x6c   :  { %581 = vmatpush1.msra.mxu0 %v5808_v20  ;;  %4790 = vmatprep.subr.mxu1 %v7406_v0 }
  0x6d   :  { %582 = vmatprep.subr.mxu0 %v5814_v22  ;;  %4791 = vmatpush3.msra.mxu1 %v5948_v56 }
  0x6e   :  { %583 = vmatpush1.msra.mxu0 %v5817_v24  ;;  %4793 = vmatmul.mubr.f32.vlgmr.msra.gmra.mxu1 %v7406_v0 }
  0x6f   :  { %4795 = vmatprep.subr.mxu1 %v7406_v0  ;;  %584 = vmatprep.subr.mxu0 %v5821_v25 }
  0x70   :  { %4796 = vmatpush3.msra.mxu1 %v5834_v29  ;;  %585 = vmatpush1.msra.mxu0 %v5825_v26 }
  0x71   :  { %4797 = vmatprep.subr.mxu1 %v7406_v0  ;;  %586 = vmatprep.subr.mxu0 %v5828_v27 }
  0x72   :  { %4798 = vmatpush3.msra.mxu1 %v5844_v32  ;;  %587 = vmatpush1.msra.mxu0 %v5831_v28 }
  0x73   :  { %4799 = vmatprep.subr.mxu1 %v7406_v0  ;;  %588 = vmatprep.subr.mxu0 %v5837_v30 }
  0x74   :  { %4800 = vmatpush3.msra.mxu1 %v5854_v35  ;;  %589 = vmatpush1.msra.mxu0 %v5841_v31 }
  0x75   :  { %4801 = vmatprep.subr.mxu1 %v7406_v0  ;;  %590 = vmatprep.subr.mxu0 %v5847_v33 }
  0x76   :  { %4802 = vmatpush3.msra.mxu1 %v5864_v38  ;;  %591 = vmatpush1.msra.mxu0 %v5851_v34 }
  0x77   :  { %4803 = vmatprep.subr.mxu1 %v7406_v0  ;;  %592 = vmatprep.subr.mxu0 %v5857_v36 }
  0x78   :  { %4804 = vmatpush3.msra.mxu1 %v5874_v41  ;;  %593 = vmatpush1.msra.mxu0 %v5861_v37 }
  0x79   :  { %4805 = vmatprep.subr.mxu1 %v7406_v0  ;;  %594 = vmatprep.subr.mxu0 %v5867_v39 }
  0x7a   :  { %4806 = vmatpush3.msra.mxu1 %v5884_v44  ;;  %595 = vmatpush1.msra.mxu0 %v5871_v40 }
  0x7b   :  { %4807 = vmatprep.subr.mxu1 %v7406_v0  ;;  %596 = vmatprep.subr.mxu0 %v5877_v42 }
  0x7c   :  { %4808 = vmatpush3.msra.mxu1 %v5894_v47  ;;  %597 = vmatpush1.msra.mxu0 %v5881_v43 }
  0x7d   :  { %4809 = vmatprep.subr.mxu1 %v7406_v0  ;;  %598 = vmatprep.subr.mxu0 %v5887_v45 }
  0x7e   :  { %4810 = vmatpush3.msra.mxu1 %v5900_v48  ;;  %599 = vmatpush1.msra.mxu0 %v5891_v46 }
  0x7f   :  { %4811 = vmatprep.subr.mxu1 %v7406_v0  ;;  %632 = vmatprep.mubr.f32.mxu0 %v7406_v0 }
  0x80   :  { %4812 = vmatpush3.msra.mxu1 %v5906_v49  ;;  %4827 = vmatprep.mubr.msk.f32.mxu1 %vm5677_vm1, %v7406_v0 }
  0x81   :  { %4813 = vmatprep.subr.mxu1 %v7406_v0  ;;  %807 = vmatprep.subr.mxu0 %v5767_v1 }
  0x82   :  { %4814 = vmatpush3.msra.mxu1 %v5912_v50 }
  0x83   :  { %4815 = vmatprep.subr.mxu1 %v7406_v0 }
  0x84   :  { %4816 = vmatpush3.msra.mxu1 %v5918_v51 }
  0x85   :  { %4817 = vmatprep.subr.mxu1 %v7406_v0 }
  0x86   :  { %4818 = vmatpush3.msra.mxu1 %v5924_v52 }
  0x87   :  { %4819 = vmatprep.subr.mxu1 %v7406_v0 }
  0x88   :  { %4820 = vmatpush3.msra.mxu1 %v5930_v53 }
  0x89   :  { %4821 = vmatprep.subr.mxu1 %v7406_v0 }
  0x8a   :  { %4822 = vmatpush3.msra.mxu1 %v5936_v54 }
  0x8b   :  { %4823 = vmatprep.subr.mxu1 %v7406_v0 }
  0x8c   :  { %4824 = vmatpush3.msra.mxu1 %v5942_v55 }
  0x8d   :  { %4825 = vmatprep.subr.mxu1 %v7406_v0 }
  0x8e   :  { %4826 = vmatpush3.msra.mxu1 %v5948_v56 }
  0x8f   :  { %4830 = vmatprep.subr.mxu1 %v7406_v0 }
 0x104   :  { %v204_v9 = vpop.f32.mrf.mxu1 }
 0x105   :  { %v205_v11 = vadd.f32 %v204_v9, %v119_v62 }
 0x106   :  { %v206_v12 = vpop.f32.mrf.mxu1 }
 0x107   :  { %290 = vst [vmem:[#allocation2 + $0x28] sm:$0xff] %v205_v11  ;;  %v207_v16 = vadd.f32 %v206_v12, %v123_v63 }
 0x108   :  { %v210_v18 = vpop.f32.mrf.mxu1 }
 0x109   :  { %291 = vst [vmem:[#allocation2 + $0x10] sm:$0xff] %v207_v16  ;;  %v211_v21 = vadd.f32 %v210_v18, %v119_v62 }
 0x10a   :  { %v212_v23 = vpop.f32.mrf.mxu1 }
 0x10b   :  { %293 = vst [vmem:[#allocation2] sm:$0xff] %v211_v21  ;;  %v213_v0 = vadd.f32 %v212_v23, %v123_v63 }
 0x10d   :  { %294 = vst [vmem:[#allocation2 + $0x18] sm:$0xff] %v213_v0  ;;  %v4759_v59 = vpop.f32.mrf.mxu1 }
 0x10e   :  { %v287_v1 = vadd.f32 %v4759_v59, %v127_v57  ;;  %v296_v56 = vld [vmem:[#allocation2 + $0x28] sm:$0x3] }
 0x10f   :  { %v281_v61 = vpop.f32.mrf.mxu1 }
 0x110   :  { %295 = vst [vmem:[#allocation2 + $0x20] sm:$0xff] %v287_v1  ;;  %v282_v9 = vadd.f32 %v281_v61, %v127_v57  ;;  %v297_v62 = vld [vmem:[#allocation2 + $0x10] sm:$0x3]  ;;  %v6028_v1 = vld [vmem:[%s7398_s4] ss:$0 sm:$0xff] }
 0x112   :  { %292 = vst [vmem:[#allocation2 + $0x8] sm:$0xff] %v282_v9 }
 0x119   :  { %v298_v63 = vld [vmem:[#allocation2 + $0x8] sm:$0x3] }
 0x11e   :  { %v413_v46 = vpop.f32.mrf.mxu0 }
 0x11f   :  { %v488_v11 = vadd.f32 %v413_v46, %v296_v56 }
 0x120   :  { %v415_v16 = vpop.f32.mrf.mxu0 }
 0x121   :  { %v4392_v12 = vmul.f32 -1.442695, %v488_v11  ;;  %v495_v18 = vadd.f32 %v415_v16, %v297_v62  ;;  %v7470_v16 = vmov 0.0   ;;  %v7471_v62 = vld [vmem:[#allocation17_spill] sm:$0xff] }
 0x123   :  { %5401 = vpow2.f32 %v4392_v12  ;;  %v4393_v45 = vmul.f32 -1.442695, %v495_v18  ;;  %v7472_v18 = vld [vmem:[#allocation18_spill] sm:$0xff] }
 0x125   :  { %5403 = vpow2.f32 %v4393_v45 }
 0x12e   :  { %v484_v60 = vpop.f32.mrf.mxu1 }
 0x12f   :  { %v509_v59 = vadd.f32 %v6028_v1, %v484_v60  ;;  %v7473_v60 = vld [vmem:[#allocation20_spill] sm:$0xff] }
 0x130   :  { %v5402_v58 = vpop.eup %5401  ;;  %v4794_v0 = vpop.f32.mrf.mxu1 }
 0x131   :  { %v492_v21 = vadd.f32 1.0, %v5402_v58 }
 0x132   :  { %v5404_v46 = vpop.eup %5403 }
 0x133   :  { %5405 = vrcp.f32 %v492_v21  ;;  %v499_v23 = vadd.f32 1.0, %v5404_v46  ;;  %v7474_v21 = vld [vmem:[#allocation15_spill] sm:$0xff] }
 0x140   :  { %v5406_v56 = vpop.eup %5405 }
 0x141   :  { %v510_v61 = vmul.f32 %v5406_v56, %v509_v59  ;;  %v517_v56 = vld [vmem:[#allocation2 + $0x28] sm:$0xc] }
 0x143   :  { %v511_v57 = vadd.f32 %v510_v61, %v298_v63 }
 0x145   :  { %5407 = vtanh.f32 %v511_v57 }
 0x146   :  { %5409 = vrcp.f32 %v499_v23 }
 0x152   :  { %v5408_v9 = vpop.eup %5407 }
 0x153   :  { %v513_v58 = vsub.f32 0.0, %v5408_v9  ;;  %v5410_v45 = vpop.eup %5409 }
 0x155   :  { %v514_v11 = vmul.f32 %v5410_v45, %v513_v58  ;;  %v518_v58 = vld [vmem:[#allocation2 + $0x10] sm:$0xc] }
 0x157   :  { %v6031_v12 = vadd.f32 %v5408_v9, %v514_v11 }
 0x159   :  { %516 = vst [vmem:[#allocation3] sm:$0x3] %v6031_v12  ;;  %633 = vmatmul.mubr.f32.vlgmr.msra.gmra.mxu0 %v6031_v12  ;;  %4828 = vmatmul.mubr.f32.vlgmr.msra.gmra.mxu1 %v6031_v12 }
 0x15a   :  { %808 = vmatpush1.msra.mxu0 %v5769_v2  ;;  %4831 = vmatpush3.msra.mxu1 %v5834_v29 }
 0x15b   :  { %809 = vmatprep.subr.mxu0 %v5771_v3  ;;  %4832 = vmatprep.subr.mxu1 %v7470_v16 }
 0x15c   :  { %810 = vmatpush1.msra.mxu0 %v5774_v4  ;;  %4833 = vmatpush3.msra.mxu1 %v5844_v32 }
 0x15d   :  { %811 = vmatprep.subr.mxu0 %v5777_v5  ;;  %4834 = vmatprep.subr.mxu1 %v7470_v16 }
 0x15e   :  { %812 = vmatpush1.msra.mxu0 %v5780_v6  ;;  %4835 = vmatpush3.msra.mxu1 %v5854_v35 }
 0x15f   :  { %813 = vmatprep.subr.mxu0 %v5783_v7  ;;  %4836 = vmatprep.subr.mxu1 %v7470_v16 }
 0x160   :  { %814 = vmatpush1.msra.mxu0 %v5786_v8  ;;  %4837 = vmatpush3.msra.mxu1 %v5864_v38 }
 0x161   :  { %815 = vmatprep.subr.mxu0 %v5789_v10  ;;  %4838 = vmatprep.subr.mxu1 %v7470_v16 }
 0x162   :  { %816 = vmatpush1.msra.mxu0 %v5792_v13  ;;  %4839 = vmatpush3.msra.mxu1 %v5874_v41 }
 0x163   :  { %817 = vmatprep.subr.mxu0 %v5795_v15  ;;  %4840 = vmatprep.subr.mxu1 %v7470_v16 }
 0x164   :  { %818 = vmatpush1.msra.mxu0 %v5801_v17  ;;  %4841 = vmatpush3.msra.mxu1 %v5884_v44 }
 0x165   :  { %819 = vmatprep.subr.mxu0 %v5804_v19  ;;  %4842 = vmatprep.subr.mxu1 %v7470_v16 }
 0x166   :  { %820 = vmatpush1.msra.mxu0 %v5808_v20  ;;  %4843 = vmatpush3.msra.mxu1 %v5894_v47 }
 0x167   :  { %821 = vmatprep.subr.mxu0 %v5814_v22  ;;  %4844 = vmatprep.subr.mxu1 %v7470_v16 }
 0x168   :  { %822 = vmatpush1.msra.mxu0 %v5817_v24  ;;  %4845 = vmatpush3.msra.mxu1 %v5900_v48 }
 0x169   :  { %823 = vmatprep.subr.mxu0 %v5821_v25  ;;  %4846 = vmatprep.subr.mxu1 %v7470_v16 }
 0x16a   :  { %824 = vmatpush1.msra.mxu0 %v5825_v26  ;;  %4847 = vmatpush3.msra.mxu1 %v5906_v49 }
 0x16b   :  { %825 = vmatprep.subr.mxu0 %v5828_v27  ;;  %4848 = vmatprep.subr.mxu1 %v7470_v16 }
 0x16c   :  { %826 = vmatpush1.msra.mxu0 %v5831_v28  ;;  %4849 = vmatpush3.msra.mxu1 %v5912_v50 }
 0x16d   :  { %827 = vmatprep.subr.mxu0 %v5837_v30  ;;  %4850 = vmatprep.subr.mxu1 %v7470_v16 }
 0x16e   :  { %828 = vmatpush1.msra.mxu0 %v5841_v31  ;;  %4851 = vmatpush3.msra.mxu1 %v5918_v51 }
 0x16f   :  { %829 = vmatprep.subr.mxu0 %v5847_v33  ;;  %4852 = vmatprep.subr.mxu1 %v7470_v16 }
 0x170   :  { %830 = vmatpush1.msra.mxu0 %v5851_v34  ;;  %4853 = vmatpush3.msra.mxu1 %v5924_v52 }
 0x171   :  { %831 = vmatprep.subr.mxu0 %v5857_v36  ;;  %4854 = vmatprep.subr.mxu1 %v7470_v16 }
 0x172   :  { %832 = vmatpush1.msra.mxu0 %v5861_v37  ;;  %4855 = vmatpush3.msra.mxu1 %v5930_v53 }
 0x173   :  { %833 = vmatprep.subr.mxu0 %v5867_v39  ;;  %4856 = vmatprep.subr.mxu1 %v7470_v16 }
 0x174   :  { %834 = vmatpush1.msra.mxu0 %v5871_v40  ;;  %4857 = vmatpush3.msra.mxu1 %v5936_v54 }
 0x175   :  { %835 = vmatprep.subr.mxu0 %v5877_v42  ;;  %4858 = vmatprep.subr.mxu1 %v7470_v16 }
 0x176   :  { %836 = vmatpush1.msra.mxu0 %v5881_v43  ;;  %4859 = vmatpush3.msra.mxu1 %v5942_v55 }
 0x177   :  { %837 = vmatprep.subr.mxu0 %v7471_v62  ;;  %4860 = vmatprep.subr.mxu1 %v7470_v16 }
 0x178   :  { %838 = vmatpush1.msra.mxu0 %v7472_v18  ;;  %871 = vmatprep.mubr.f32.mxu0 %v7470_v16 }
 0x179   :  { %4861 = vmatpush3.msra.mxu1 %v7473_v60  ;;  %4862 = vmatprep.mubr.msk.f32.mxu1 %vm5677_vm1, %v7470_v16 }
 0x17a   :  { %1046 = vmatprep.subr.mxu0 %v7474_v21  ;;  %4865 = vmatprep.subr.mxu1 %v7470_v16 }
 0x219   :  { %v634_v0 = vpop.f32.mrf.mxu0  ;;  %v705_v59 = vpop.f32.mrf.mxu1 }
 0x21a   :  { %v710_v46 = vrot.slane %v634_v0, 6  ;;  %v736_v21 = vadd.f32 %v6028_v1, %v705_v59  ;;  %v519_v0 = vld [vmem:[#allocation2 + $0x8] sm:$0xc]  ;;  %v6221_v59 = vld [vmem:[#allocation6 + $0x110] sm:$0xff] }
 0x21b   :  { %v4829_v61 = vpop.f32.mrf.mxu1  ;;  %v636_v57 = vpop.f32.mrf.mxu0 }
 0x21c   :  { %v712_v63 = vadd.f32 %v710_v46, %v517_v56  ;;  %v720_v9 = vrot.slane %v636_v57, 6  ;;  %v738_v18 = vrot.slane %v736_v21, 6  ;;  %v6229_v21 = vld [vmem:[#allocation6 + $0xf8] sm:$0xff] }
 0x21e   :  { %v4395_v23 = vmul.f32 -1.442695, %v712_v63  ;;  %v722_v45 = vadd.f32 %v720_v9, %v518_v58 }
 0x220   :  { %5411 = vpow2.f32 %v4395_v23  ;;  %v4396_v60 = vmul.f32 -1.442695, %v722_v45  ;;  %v6225_v45 = vld [vmem:[#allocation6 + $0x108] sm:$0xff] }
 0x22d   :  { %v5412_v11 = vpop.eup %5411 }
 0x22e   :  { %v716_v14 = vadd.f32 1.0, %v5412_v11  ;;  %v6227_v11 = vld [vmem:[#allocation6 + $0x118] sm:$0xff] }
 0x230   :  { %5413 = vrcp.f32 %v716_v14 }
 0x231   :  { %5415 = vpow2.f32 %v4396_v60 }
 0x23d   :  { %v5414_v62 = vpop.eup %5413 }
 0x23e   :  { %v740_v55 = vmul.f32 %v5414_v62, %v738_v18  ;;  %v5416_v61 = vpop.eup %5415  ;;  %v6217_v62 = vld [vmem:[#allocation6 + $0x120] sm:$0xff]  ;;  %v6219_v18 = vld [vmem:[#allocation6 + $0x130] sm:$0xff] }
 0x23f   :  { %v726_v46 = vadd.f32 1.0, %v5416_v61  ;;  %v6235_v61 = vld [vmem:[#allocation6 + $0x100] sm:$0xff] }
 0x240   :  { %v741_v43 = vadd.f32 %v740_v55, %v519_v0  ;;  %v6209_v55 = vld [vmem:[#allocation6 + $0x148] sm:$0xff]  ;;  %v6233_v0 = vld [vmem:[#allocation6 + $0xf0] sm:$0xff] }
 0x242   :  { %5417 = vtanh.f32 %v741_v43 }
 0x243   :  { %5419 = vrcp.f32 %v726_v46  ;;  %v6239_v46 = vld [vmem:[#allocation6 + $0xe0] sm:$0xff] }
 0x24f   :  { %v5418_v56 = vpop.eup %5417 }
 0x250   :  { %v744_v63 = vrot.slane %v5418_v56, 2  ;;  %v5420_v9 = vpop.eup %5419 }
 0x252   :  { %v746_v23 = vsub.f32 %v6031_v12, %v744_v63  ;;  %v6213_v12 = vld [vmem:[#allocation6 + $0x128] sm:$0xff] }
 0x253   :  { %v6245_v63 = vld [vmem:[#allocation6 + $0xe8] sm:$0xff] }
 0x254   :  { %v748_v57 = vrot.slane %v746_v23, 6  ;;  %v6249_v23 = vld [vmem:[#allocation6 + $0xc8] sm:$0xff] }
 0x256   :  { %v750_v14 = vmul.f32 %v5420_v9, %v748_v57  ;;  %v6253_v57 = vld [vmem:[#allocation6 + $0xc0] sm:$0xff]  ;;  %v6255_v9 = vld [vmem:[#allocation6 + $0xd0] sm:$0xff] }
 0x258   :  { %v6105_v58 = vadd.f32 %v5418_v56, %v750_v14  ;;  %v6243_v56 = vld [vmem:[#allocation6 + $0xd8] sm:$0xff]  ;;  %v6259_v14 = vld [vmem:[#allocation6 + $0xb0] sm:$0xff] }
 0x25a   :  { %752 = vst [vmem:[#allocation3] sm:$0xc] %v6105_v58  ;;  %v805_v60 = vrot.slane %v6105_v58, 2 }
 0x25c   :  { %872 = vmatmul.mubr.f32.vlgmr.msra.gmra.mxu0 %v805_v60  ;;  %4863 = vmatmul.mubr.f32.vlgmr.msra.gmra.mxu1 %v805_v60  ;;  %v6265_v60 = vld [vmem:[#allocation6 + $0xb8] sm:$0xff] }
 0x25d   :  { %1047 = vmatpush1.msra.mxu0 %v5769_v2  ;;  %4866 = vmatpush3.msra.mxu1 %v5834_v29  ;;  %v7475_v2 = vld [vmem:[#allocation16_spill] sm:$0xff] }
 0x25e   :  { %1048 = vmatprep.subr.mxu0 %v5771_v3  ;;  %4867 = vmatprep.subr.mxu1 %v7470_v16  ;;  %v7476_v3 = vld [vmem:[#allocation19_spill] sm:$0xff] }
 0x25f   :  { %1049 = vmatpush1.msra.mxu0 %v5774_v4  ;;  %4868 = vmatpush3.msra.mxu1 %v5844_v32  ;;  %v7477_v4 = vld [vmem:[#allocation17_spill] sm:$0xff] }
 0x260   :  { %1050 = vmatprep.subr.mxu0 %v5777_v5  ;;  %4869 = vmatprep.subr.mxu1 %v7470_v16  ;;  %v7478_v5 = vld [vmem:[#allocation18_spill] sm:$0xff] }
 0x261   :  { %1051 = vmatpush1.msra.mxu0 %v5780_v6  ;;  %4870 = vmatpush3.msra.mxu1 %v5854_v35  ;;  %v7479_v6 = vld [vmem:[#allocation20_spill] sm:$0xff] }
 0x262   :  { %1052 = vmatprep.subr.mxu0 %v5783_v7  ;;  %4871 = vmatprep.subr.mxu1 %v7470_v16 }
 0x263   :  { %1053 = vmatpush1.msra.mxu0 %v5786_v8  ;;  %4872 = vmatpush3.msra.mxu1 %v5864_v38 }
 0x264   :  { %1054 = vmatprep.subr.mxu0 %v5789_v10  ;;  %4873 = vmatprep.subr.mxu1 %v7470_v16 }
 0x265   :  { %1055 = vmatpush1.msra.mxu0 %v5792_v13  ;;  %4874 = vmatpush3.msra.mxu1 %v5874_v41  ;;  %v753_v13 = vld [vmem:[#allocation2 + $0x28] sm:$0x30] }
 0x266   :  { %1056 = vmatprep.subr.mxu0 %v5795_v15  ;;  %4875 = vmatprep.subr.mxu1 %v7470_v16 }
 0x267   :  { %1057 = vmatpush1.msra.mxu0 %v5801_v17  ;;  %4876 = vmatpush3.msra.mxu1 %v5884_v44 }
 0x268   :  { %1058 = vmatprep.subr.mxu0 %v5804_v19  ;;  %4877 = vmatprep.subr.mxu1 %v7470_v16 }
 0x269   :  { %1059 = vmatpush1.msra.mxu0 %v5808_v20  ;;  %4878 = vmatpush3.msra.mxu1 %v5894_v47  ;;  %v6184_v47 = vld [vmem:[#allocation6 + $0x170] sm:$0xff] }
 0x26a   :  { %1060 = vmatprep.subr.mxu0 %v5814_v22  ;;  %4879 = vmatprep.subr.mxu1 %v7470_v16  ;;  %7480 = vst [vmem:[#allocation15_spill] sm:$0xff] %v6184_v47 }
 0x26b   :  { %1061 = vmatpush1.msra.mxu0 %v5817_v24  ;;  %4880 = vmatpush3.msra.mxu1 %v5900_v48  ;;  %v754_v24 = vld [vmem:[#allocation2 + $0x10] sm:$0x30]  ;;  %v6187_v48 = vld [vmem:[#allocation6 + $0x168] sm:$0xff] }
 0x26c   :  { %1062 = vmatprep.subr.mxu0 %v5821_v25  ;;  %4881 = vmatprep.subr.mxu1 %v7470_v16 }
 0x26d   :  { %1063 = vmatpush1.msra.mxu0 %v5825_v26  ;;  %4882 = vmatpush3.msra.mxu1 %v5906_v49  ;;  %v6189_v49 = vld [vmem:[#allocation6 + $0x178] sm:$0xff] }
 0x26e   :  { %1064 = vmatprep.subr.mxu0 %v5828_v27  ;;  %4883 = vmatprep.subr.mxu1 %v7470_v16 }
 0x26f   :  { %1065 = vmatpush1.msra.mxu0 %v5831_v28  ;;  %4884 = vmatpush3.msra.mxu1 %v5912_v50  ;;  %v6193_v50 = vld [vmem:[#allocation6 + $0x158] sm:$0xff] }
 0x270   :  { %1066 = vmatprep.subr.mxu0 %v5837_v30  ;;  %4885 = vmatprep.subr.mxu1 %v7470_v16 }
 0x271   :  { %1067 = vmatpush1.msra.mxu0 %v5841_v31  ;;  %4886 = vmatpush3.msra.mxu1 %v5918_v51  ;;  %v6197_v51 = vld [vmem:[#allocation6 + $0x150] sm:$0xff] }
 0x272   :  { %1068 = vmatprep.subr.mxu0 %v5847_v33  ;;  %4887 = vmatprep.subr.mxu1 %v7470_v16  ;;  %v755_v33 = vld [vmem:[#allocation2 + $0x8] sm:$0x30] }
 0x273   :  { %1069 = vmatpush1.msra.mxu0 %v5851_v34  ;;  %4888 = vmatpush3.msra.mxu1 %v5924_v52  ;;  %v6199_v52 = vld [vmem:[#allocation6 + $0x160] sm:$0xff] }
 0x274   :  { %1070 = vmatprep.subr.mxu0 %v5857_v36  ;;  %4889 = vmatprep.subr.mxu1 %v7470_v16 }
 0x275   :  { %1071 = vmatpush1.msra.mxu0 %v5861_v37  ;;  %4890 = vmatpush3.msra.mxu1 %v5930_v53  ;;  %v6203_v53 = vld [vmem:[#allocation6 + $0x140] sm:$0xff] }
 0x276   :  { %1072 = vmatprep.subr.mxu0 %v5867_v39  ;;  %4891 = vmatprep.subr.mxu1 %v7470_v16 }
 0x277   :  { %1073 = vmatpush1.msra.mxu0 %v5871_v40  ;;  %4892 = vmatpush3.msra.mxu1 %v5936_v54  ;;  %v6207_v54 = vld [vmem:[#allocation6 + $0x138] sm:$0xff] }
 0x278   :  { %1074 = vmatprep.subr.mxu0 %v5877_v42  ;;  %4893 = vmatprep.subr.mxu1 %v7470_v16 }
 0x279   :  { %1075 = vmatpush1.msra.mxu0 %v7475_v2  ;;  %4894 = vmatpush3.msra.mxu1 %v7476_v3  ;;  %v6269_v2 = vld [vmem:[#allocation6 + $0x98] sm:$0xff]  ;;  %v6273_v3 = vld [vmem:[#allocation6 + $0x90] sm:$0xff] }
 0x27a   :  { %1076 = vmatprep.subr.mxu0 %v7477_v4  ;;  %4895 = vmatprep.subr.mxu1 %v7470_v16  ;;  %v6275_v4 = vld [vmem:[#allocation6 + $0xa0] sm:$0xff] }
 0x27b   :  { %1077 = vmatpush1.msra.mxu0 %v7478_v5  ;;  %1110 = vmatprep.mubr.f32.mxu0 %v7470_v16  ;;  %v6279_v5 = vld [vmem:[#allocation6 + $0x80] sm:$0xff] }
 0x27c   :  { %4896 = vmatpush3.msra.mxu1 %v7479_v6  ;;  %4897 = vmatprep.mubr.msk.f32.mxu1 %vm5677_vm1, %v7470_v16  ;;  %v6283_v6 = vld [vmem:[#allocation6 + $0x78] sm:$0xff] }
 0x27d   :  { %4900 = vmatprep.subr.mxu1 %v7470_v16  ;;  %1285 = vmatprep.subr.mxu0 %v6184_v47 }
 0x31c   :  { %v873_v7 = vpop.f32.mrf.mxu0  ;;  %v944_v8 = vpop.f32.mrf.mxu1 }
 0x31d   :  { %v949_v10 = vrot.slane %v873_v7, 4  ;;  %v975_v29 = vadd.f32 %v6028_v1, %v944_v8  ;;  %v6285_v7 = vld [vmem:[#allocation6 + $0x88] sm:$0xff] }
 0x31e   :  { %v4864_v15 = vpop.f32.mrf.mxu1  ;;  %v875_v20 = vpop.f32.mrf.mxu0  ;;  %v6289_v8 = vld [vmem:[#allocation6 + $0x68] sm:$0xff] }
 0x31f   :  { %v951_v17 = vadd.f32 %v949_v10, %v753_v13  ;;  %v959_v22 = vrot.slane %v875_v20, 4  ;;  %v977_v30 = vrot.slane %v975_v29, 4  ;;  %v6293_v10 = vld [vmem:[#allocation6 + $0x60] sm:$0xff]  ;;  %v6295_v13 = vld [vmem:[#allocation6 + $0x70] sm:$0xff]  ;;  %v6309_v20 = vld [vmem:[#allocation6 + $0x38] sm:$0xff] }
 0x320   :  { %v6299_v15 = vld [vmem:[#allocation6 + $0x50] sm:$0xff]  ;;  %v6333_v29 = vld [vmem:[#allocation6] sm:$0xff] }
 0x321   :  { %v4398_v19 = vmul.f32 -1.442695, %v951_v17  ;;  %v961_v25 = vadd.f32 %v959_v22, %v754_v24  ;;  %v6303_v17 = vld [vmem:[#allocation6 + $0x48] sm:$0xff]  ;;  %v6313_v22 = vld [vmem:[#allocation6 + $0x30] sm:$0xff]  ;;  %v6315_v24 = vld [vmem:[#allocation6 + $0x40] sm:$0xff]  ;;  %7484 = vst [vmem:[#allocation18_spill] sm:$0xff] %v6333_v29 }
 0x323   :  { %5421 = vpow2.f32 %v4398_v19  ;;  %v4399_v28 = vmul.f32 -1.442695, %v961_v25  ;;  %v6305_v19 = vld [vmem:[#allocation6 + $0x58] sm:$0xff]  ;;  %v6319_v25 = vld [vmem:[#allocation6 + $0x20] sm:$0xff] }
 0x330   :  { %v5422_v26 = vpop.eup %5421 }
 0x331   :  { %v955_v27 = vadd.f32 1.0, %v5422_v26  ;;  %v6323_v26 = vld [vmem:[#allocation6 + $0x18] sm:$0xff] }
 0x332   :  { %7481 = vst [vmem:[#allocation16_spill] sm:$0xff] %v6323_v26 }
 0x333   :  { %5423 = vrcp.f32 %v955_v27  ;;  %v6325_v27 = vld [vmem:[#allocation6 + $0x28] sm:$0xff] }
 0x334   :  { %5425 = vpow2.f32 %v4399_v28  ;;  %7482 = vst [vmem:[#allocation19_spill] sm:$0xff] %v6325_v27  ;;  %v6329_v28 = vld [vmem:[#allocation6 + $0x8] sm:$0xff] }
 0x335   :  { %7483 = vst [vmem:[#allocation17_spill] sm:$0xff] %v6329_v28 }
 0x340   :  { %v5424_v31 = vpop.eup %5423 }
 0x341   :  { %v979_v32 = vmul.f32 %v5424_v31, %v977_v30  ;;  %v5426_v35 = vpop.eup %5425  ;;  %v6335_v30 = vld [vmem:[#allocation6 + $0x10] sm:$0xff] }
 0x342   :  { %v965_v36 = vadd.f32 1.0, %v5426_v35  ;;  %7485 = vst [vmem:[#allocation20_spill] sm:$0xff] %v6335_v30 }
 0x343   :  { %v980_v34 = vadd.f32 %v979_v32, %v755_v33 }
 0x345   :  { %5427 = vtanh.f32 %v980_v34  ;;  %v992_v34 = vld [vmem:[#allocation2 + $0x28] sm:$0xc0] }
 0x346   :  { %5429 = vrcp.f32 %v965_v36 }
 0x352   :  { %v5428_v37 = vpop.eup %5427 }
 0x353   :  { %v983_v38 = vrot.slane %v5428_v37, 2  ;;  %v5430_v41 = vpop.eup %5429 }
 0x355   :  { %v985_v39 = vsub.f32 %v6105_v58, %v983_v38  ;;  %v6263_v58 = vld [vmem:[#allocation6 + $0xa8] sm:$0xff] }
 0x357   :  { %v987_v40 = vrot.slane %v985_v39, 6 }
 0x359   :  { %v989_v42 = vmul.f32 %v5430_v41, %v987_v40  ;;  %v993_v40 = vld [vmem:[#allocation2 + $0x10] sm:$0xc0] }
 0x35b   :  { %v6177_v43 = vadd.f32 %v5428_v37, %v989_v42 }
 0x35d   :  { %991 = vst [vmem:[#allocation3] sm:$0x30] %v6177_v43  ;;  %v1044_v44 = vrot.slane %v6177_v43, 4 }
 0x35f   :  { %1111 = vmatmul.mubr.f32.vlgmr.msra.gmra.mxu0 %v1044_v44  ;;  %4898 = vmatmul.mubr.f32.vlgmr.msra.gmra.mxu1 %v1044_v44 }
 0x360   :  { %1349 = vmatprep.mubr.f32.mxu0 %v7470_v16  ;;  %4932 = vmatprep.mubr.msk.f32.mxu1 %vm5677_vm1, %v7470_v16 }
 0x361   :  { %1286 = vmatpush1.msra.mxu0 %v6187_v48  ;;  %4901 = vmatpush3.msra.mxu1 %v6189_v49 }
 0x362   :  { %1287 = vmatprep.subr.mxu0 %v6193_v50  ;;  %4902 = vmatprep.subr.mxu1 %v7470_v16 }
 0x363   :  { %1288 = vmatpush1.msra.mxu0 %v6197_v51  ;;  %4903 = vmatpush3.msra.mxu1 %v6199_v52 }
 0x364   :  { %1289 = vmatprep.subr.mxu0 %v6203_v53  ;;  %4904 = vmatprep.subr.mxu1 %v7470_v16 }
 0x365   :  { %1290 = vmatpush1.msra.mxu0 %v6207_v54  ;;  %4905 = vmatpush3.msra.mxu1 %v6209_v55 }
 0x366   :  { %1291 = vmatprep.subr.mxu0 %v6213_v12  ;;  %4906 = vmatprep.subr.mxu1 %v7470_v16 }
 0x367   :  { %1292 = vmatpush1.msra.mxu0 %v6217_v62  ;;  %4907 = vmatpush3.msra.mxu1 %v6219_v18 }
 0x368   :  { %1293 = vmatprep.subr.mxu0 %v6221_v59  ;;  %4908 = vmatprep.subr.mxu1 %v7470_v16 }
 0x369   :  { %1294 = vmatpush1.msra.mxu0 %v6225_v45  ;;  %4909 = vmatpush3.msra.mxu1 %v6227_v11 }
 0x36a   :  { %1295 = vmatprep.subr.mxu0 %v6229_v21  ;;  %4910 = vmatprep.subr.mxu1 %v7470_v16 }
 0x36b   :  { %1296 = vmatpush1.msra.mxu0 %v6233_v0  ;;  %4911 = vmatpush3.msra.mxu1 %v6235_v61 }
 0x36c   :  { %1297 = vmatprep.subr.mxu0 %v6239_v46  ;;  %4912 = vmatprep.subr.mxu1 %v7470_v16 }
 0x36d   :  { %1298 = vmatpush1.msra.mxu0 %v6243_v56  ;;  %4913 = vmatpush3.msra.mxu1 %v6245_v63 }
 0x36e   :  { %1299 = vmatprep.subr.mxu0 %v6249_v23  ;;  %4914 = vmatprep.subr.mxu1 %v7470_v16 }
 0x36f   :  { %1300 = vmatpush1.msra.mxu0 %v6253_v57  ;;  %4915 = vmatpush3.msra.mxu1 %v6255_v9 }
 0x370   :  { %1301 = vmatprep.subr.mxu0 %v6259_v14  ;;  %4916 = vmatprep.subr.mxu1 %v7470_v16 }
 0x371   :  { %1302 = vmatpush1.msra.mxu0 %v6263_v58  ;;  %4917 = vmatpush3.msra.mxu1 %v6265_v60 }
 0x372   :  { %1303 = vmatprep.subr.mxu0 %v6269_v2  ;;  %4918 = vmatprep.subr.mxu1 %v7470_v16 }
 0x373   :  { %1304 = vmatpush1.msra.mxu0 %v6273_v3  ;;  %4919 = vmatpush3.msra.mxu1 %v6275_v4 }
 0x374   :  { %1305 = vmatprep.subr.mxu0 %v6279_v5  ;;  %4920 = vmatprep.subr.mxu1 %v7470_v16 }
 0x375   :  { %1306 = vmatpush1.msra.mxu0 %v6283_v6  ;;  %4921 = vmatpush3.msra.mxu1 %v6285_v7 }
 0x376   :  { %1307 = vmatprep.subr.mxu0 %v6289_v8  ;;  %4922 = vmatprep.subr.mxu1 %v7470_v16 }
 0x377   :  { %1308 = vmatpush1.msra.mxu0 %v6293_v10  ;;  %4923 = vmatpush3.msra.mxu1 %v6295_v13 }
 0x378   :  { %1309 = vmatprep.subr.mxu0 %v6299_v15  ;;  %4924 = vmatprep.subr.mxu1 %v7470_v16 }
 0x379   :  { %1310 = vmatpush1.msra.mxu0 %v6303_v17  ;;  %4925 = vmatpush3.msra.mxu1 %v6305_v19 }
 0x37a   :  { %1311 = vmatprep.subr.mxu0 %v6309_v20  ;;  %4926 = vmatprep.subr.mxu1 %v7470_v16 }
 0x37b   :  { %1312 = vmatpush1.msra.mxu0 %v6313_v22  ;;  %4927 = vmatpush3.msra.mxu1 %v6315_v24 }
 0x37c   :  { %1313 = vmatprep.subr.mxu0 %v6319_v25  ;;  %4928 = vmatprep.subr.mxu1 %v7470_v16 }
 0x37d   :  { %1314 = vmatpush1.msra.mxu0 %v6323_v26  ;;  %4929 = vmatpush3.msra.mxu1 %v6325_v27 }
 0x37e   :  { %1315 = vmatprep.subr.mxu0 %v6329_v28  ;;  %4930 = vmatprep.subr.mxu1 %v7470_v16 }
 0x37f   :  { %1316 = vmatpush1.msra.mxu0 %v6333_v29  ;;  %4931 = vmatpush3.msra.mxu1 %v6335_v30 }
 0x380   :  { %1512 = vmatprep.subr.mxu0 %v6184_v47  ;;  %4935 = vmatprep.subr.mxu1 %v7470_v16 }
 0x41f   :  { %v1112_v31 = vpop.f32.mrf.mxu0  ;;  %v1183_v32 = vpop.f32.mrf.mxu1 }
 0x420   :  { %v1188_v33 = vrot.slane %v1112_v31, 2  ;;  %v1214_v47 = vadd.f32 %v6028_v1, %v1183_v32  ;;  %v994_v31 = vld [vmem:[#allocation2 + $0x8] sm:$0xc0] }
 0x421   :  { %v4899_v35 = vpop.f32.mrf.mxu1  ;;  %v1114_v38 = vpop.f32.mrf.mxu0 }
 0x422   :  { %v1190_v36 = vadd.f32 %v1188_v33, %v992_v34  ;;  %v1198_v39 = vrot.slane %v1114_v38, 2  ;;  %v1216_v29 = vrot.slane %v1214_v47, 2  ;;  %v7487_v47 = vld [vmem:[#allocation19_spill] sm:$0xff] }
 0x424   :  { %v4401_v37 = vmul.f32 -1.442695, %v1190_v36  ;;  %v1200_v41 = vadd.f32 %v1198_v39, %v993_v40 }
 0x426   :  { %5431 = vpow2.f32 %v4401_v37  ;;  %v4402_v30 = vmul.f32 -1.442695, %v1200_v41 }
 0x433   :  { %v5432_v42 = vpop.eup %5431 }
 0x434   :  { %v1194_v44 = vadd.f32 1.0, %v5432_v42 }
 0x436   :  { %5433 = vrcp.f32 %v1194_v44 }
 0x437   :  { %5435 = vpow2.f32 %v4402_v30  ;;  %v1231_v30 = vld [vmem:[#allocation2] sm:$0x3] }
 0x443   :  { %v5434_v28 = vpop.eup %5433 }
 0x444   :  { %v1218_v27 = vmul.f32 %v5434_v28, %v1216_v29  ;;  %v5436_v35 = vpop.eup %5435  ;;  %v7490_v28 = vld [vmem:[#allocation20_spill] sm:$0xff]  ;;  %v7491_v29 = vld [vmem:[#allocation15_spill] sm:$0xff] }
 0x445   :  { %v1204_v33 = vadd.f32 1.0, %v5436_v35 }
 0x446   :  { %v1219_v26 = vadd.f32 %v1218_v27, %v994_v31  ;;  %v7489_v27 = vld [vmem:[#allocation18_spill] sm:$0xff] }
 0x448   :  { %5437 = vtanh.f32 %v1219_v26  ;;  %v7488_v26 = vld [vmem:[#allocation17_spill] sm:$0xff] }
 0x449   :  { %5439 = vrcp.f32 %v1204_v33 }
 0x455   :  { %v5438_v34 = vpop.eup %5437 }
 0x456   :  { %v1222_v36 = vrot.slane %v5438_v34, 2  ;;  %v5440_v39 = vpop.eup %5439 }
 0x458   :  { %v1224_v37 = vsub.f32 %v6177_v43, %v1222_v36  ;;  %v7486_v43 = vld [vmem:[#allocation16_spill] sm:$0xff] }
 0x45a   :  { %v1226_v38 = vrot.slane %v1224_v37, 6 }
 0x45c   :  { %v1228_v40 = vmul.f32 %v5440_v39, %v1226_v38 }
 0x45e   :  { %v6347_v41 = vadd.f32 %v5438_v34, %v1228_v40  ;;  %v1232_v34 = vld [vmem:[#allocation2 + $0x18] sm:$0x3]  ;;  %v6421_v40 = vld [vmem:[%s7398_s4] ss:$0 sm:$0xff] }
 0x460   :  { %1230 = vst [vmem:[#allocation3] sm:$0xc0] %v6347_v41  ;;  %v1283_v1 = vrot.slane %v6347_v41, 6 }
 0x462   :  { %1350 = vmatmul.mubr.f32.vlgmr.msra.gmra.mxu0 %v1283_v1  ;;  %4933 = vmatmul.mubr.f32.vlgmr.msra.gmra.mxu1 %v1283_v1 }
 0x463   :  { %1513 = vmatpush1.msra.mxu0 %v6187_v48  ;;  %4936 = vmatpush3.msra.mxu1 %v6189_v49 }
 0x464   :  { %1514 = vmatprep.subr.mxu0 %v6193_v50  ;;  %4937 = vmatprep.subr.mxu1 %v7470_v16 }
 0x465   :  { %1515 = vmatpush1.msra.mxu0 %v6197_v51  ;;  %4938 = vmatpush3.msra.mxu1 %v6199_v52 }
 0x466   :  { %1516 = vmatprep.subr.mxu0 %v6203_v53  ;;  %4939 = vmatprep.subr.mxu1 %v7470_v16 }
 0x467   :  { %1517 = vmatpush1.msra.mxu0 %v6207_v54  ;;  %4940 = vmatpush3.msra.mxu1 %v6209_v55 }
 0x468   :  { %1518 = vmatprep.subr.mxu0 %v6213_v12  ;;  %4941 = vmatprep.subr.mxu1 %v7470_v16 }
 0x469   :  { %1519 = vmatpush1.msra.mxu0 %v6217_v62  ;;  %4942 = vmatpush3.msra.mxu1 %v6219_v18 }
 0x46a   :  { %1520 = vmatprep.subr.mxu0 %v6221_v59  ;;  %4943 = vmatprep.subr.mxu1 %v7470_v16 }
 0x46b   :  { %1521 = vmatpush1.msra.mxu0 %v6225_v45  ;;  %4944 = vmatpush3.msra.mxu1 %v6227_v11 }
 0x46c   :  { %1522 = vmatprep.subr.mxu0 %v6229_v21  ;;  %4945 = vmatprep.subr.mxu1 %v7470_v16 }
 0x46d   :  { %1523 = vmatpush1.msra.mxu0 %v6233_v0  ;;  %4946 = vmatpush3.msra.mxu1 %v6235_v61 }
 0x46e   :  { %1524 = vmatprep.subr.mxu0 %v6239_v46  ;;  %4947 = vmatprep.subr.mxu1 %v7470_v16 }
 0x46f   :  { %1525 = vmatpush1.msra.mxu0 %v6243_v56  ;;  %4948 = vmatpush3.msra.mxu1 %v6245_v63 }
 0x470   :  { %1526 = vmatprep.subr.mxu0 %v6249_v23  ;;  %4949 = vmatprep.subr.mxu1 %v7470_v16 }
 0x471   :  { %1527 = vmatpush1.msra.mxu0 %v6253_v57  ;;  %4950 = vmatpush3.msra.mxu1 %v6255_v9 }
 0x472   :  { %1528 = vmatprep.subr.mxu0 %v6259_v14  ;;  %4951 = vmatprep.subr.mxu1 %v7470_v16 }
 0x473   :  { %1529 = vmatpush1.msra.mxu0 %v6263_v58  ;;  %4952 = vmatpush3.msra.mxu1 %v6265_v60 }
 0x474   :  { %1530 = vmatprep.subr.mxu0 %v6269_v2  ;;  %4953 = vmatprep.subr.mxu1 %v7470_v16 }
 0x475   :  { %1531 = vmatpush1.msra.mxu0 %v6273_v3  ;;  %4954 = vmatpush3.msra.mxu1 %v6275_v4 }
 0x476   :  { %1532 = vmatprep.subr.mxu0 %v6279_v5  ;;  %4955 = vmatprep.subr.mxu1 %v7470_v16 }
 0x477   :  { %1533 = vmatpush1.msra.mxu0 %v6283_v6  ;;  %4956 = vmatpush3.msra.mxu1 %v6285_v7 }
 0x478   :  { %1534 = vmatprep.subr.mxu0 %v6289_v8  ;;  %4957 = vmatprep.subr.mxu1 %v7470_v16 }
 0x479   :  { %1535 = vmatpush1.msra.mxu0 %v6293_v10  ;;  %4958 = vmatpush3.msra.mxu1 %v6295_v13 }
 0x47a   :  { %1536 = vmatprep.subr.mxu0 %v6299_v15  ;;  %4959 = vmatprep.subr.mxu1 %v7470_v16 }
 0x47b   :  { %1537 = vmatpush1.msra.mxu0 %v6303_v17  ;;  %4960 = vmatpush3.msra.mxu1 %v6305_v19 }
 0x47c   :  { %1538 = vmatprep.subr.mxu0 %v6309_v20  ;;  %4961 = vmatprep.subr.mxu1 %v7470_v16 }
 0x47d   :  { %1539 = vmatpush1.msra.mxu0 %v6313_v22  ;;  %4962 = vmatpush3.msra.mxu1 %v6315_v24 }
 0x47e   :  { %1540 = vmatprep.subr.mxu0 %v6319_v25  ;;  %4963 = vmatprep.subr.mxu1 %v7470_v16 }
 0x47f   :  { %1541 = vmatpush1.msra.mxu0 %v7486_v43  ;;  %4964 = vmatpush3.msra.mxu1 %v7487_v47 }
 0x480   :  { %1542 = vmatprep.subr.mxu0 %v7488_v26  ;;  %4965 = vmatprep.subr.mxu1 %v7470_v16 }
 0x481   :  { %1543 = vmatpush1.msra.mxu0 %v7489_v27  ;;  %1576 = vmatprep.mubr.f32.mxu0 %v7470_v16 }
 0x482   :  { %4966 = vmatpush3.msra.mxu1 %v7490_v28  ;;  %4967 = vmatprep.mubr.msk.f32.mxu1 %vm5677_vm1, %v7470_v16 }
 0x483   :  { %1751 = vmatprep.subr.mxu0 %v7491_v29  ;;  %4970 = vmatprep.subr.mxu1 %v7470_v16 }
 0x522   :  { %v1351_v32 = vpop.f32.mrf.mxu0  ;;  %v1422_v42 = vpop.f32.mrf.mxu1 }
 0x523   :  { %v1426_v44 = vadd.f32 %v1351_v32, %v1231_v30  ;;  %v1447_v1 = vadd.f32 %v6421_v40, %v1422_v42  ;;  %v1233_v32 = vld [vmem:[#allocation2 + $0x20] sm:$0x3] }
 0x524   :  { %v4934_v31 = vpop.f32.mrf.mxu1  ;;  %v1353_v33 = vpop.f32.mrf.mxu0 }
 0x525   :  { %v4404_v35 = vmul.f32 -1.442695, %v1426_v44  ;;  %v1433_v36 = vadd.f32 %v1353_v33, %v1232_v34 }
 0x527   :  { %5441 = vpow2.f32 %v4404_v35  ;;  %v4405_v39 = vmul.f32 -1.442695, %v1433_v36 }
 0x534   :  { %v5442_v37 = vpop.eup %5441 }
 0x535   :  { %v1430_v38 = vadd.f32 1.0, %v5442_v37 }
 0x537   :  { %5443 = vrcp.f32 %v1430_v38 }
 0x538   :  { %5445 = vpow2.f32 %v4405_v39 }
 0x544   :  { %v5444_v29 = vpop.eup %5443 }
 0x545   :  { %v1448_v30 = vmul.f32 %v5444_v29, %v1447_v1  ;;  %v5446_v31 = vpop.eup %5445  ;;  %v7493_v29 = vld [vmem:[#allocation15_spill] sm:$0xff] }
 0x546   :  { %v1437_v35 = vadd.f32 1.0, %v5446_v31 }
 0x547   :  { %v1449_v44 = vadd.f32 %v1448_v30, %v1233_v32  ;;  %v1461_v32 = vld [vmem:[#allocation2] sm:$0xc] }
 0x549   :  { %5447 = vtanh.f32 %v1449_v44 }
 0x54a   :  { %5449 = vrcp.f32 %v1437_v35 }
 0x556   :  { %v5448_v33 = vpop.eup %5447 }
 0x557   :  { %v1452_v34 = vrot.slane %v5448_v33, 2  ;;  %v5450_v38 = vpop.eup %5449 }
 0x559   :  { %v1454_v36 = vsub.f32 %v6347_v41, %v1452_v34  ;;  %v7492_v41 = vld [vmem:[#allocation20_spill] sm:$0xff] }
 0x55b   :  { %v1456_v37 = vrot.slane %v1454_v36, 6  ;;  %v1462_v36 = vld [vmem:[#allocation2 + $0x18] sm:$0xc] }
 0x55d   :  { %v1458_v39 = vmul.f32 %v5450_v38, %v1456_v37 }
 0x55f   :  { %v6425_v28 = vadd.f32 %v5448_v33, %v1458_v39 }
 0x561   :  { %1460 = vst [vmem:[#allocation3 + $0x8] sm:$0x3] %v6425_v28  ;;  %1577 = vmatmul.mubr.f32.vlgmr.msra.gmra.mxu0 %v6425_v28  ;;  %4968 = vmatmul.mubr.f32.vlgmr.msra.gmra.mxu1 %v6425_v28 }
 0x562   :  { %1752 = vmatpush1.msra.mxu0 %v6187_v48  ;;  %4971 = vmatpush3.msra.mxu1 %v6189_v49 }
 0x563   :  { %1753 = vmatprep.subr.mxu0 %v6193_v50  ;;  %4972 = vmatprep.subr.mxu1 %v7470_v16 }
 0x564   :  { %1754 = vmatpush1.msra.mxu0 %v6197_v51  ;;  %4973 = vmatpush3.msra.mxu1 %v6199_v52 }
 0x565   :  { %1755 = vmatprep.subr.mxu0 %v6203_v53  ;;  %4974 = vmatprep.subr.mxu1 %v7470_v16 }
 0x566   :  { %1756 = vmatpush1.msra.mxu0 %v6207_v54  ;;  %4975 = vmatpush3.msra.mxu1 %v6209_v55 }
 0x567   :  { %1757 = vmatprep.subr.mxu0 %v6213_v12  ;;  %4976 = vmatprep.subr.mxu1 %v7470_v16 }
 0x568   :  { %1758 = vmatpush1.msra.mxu0 %v6217_v62  ;;  %4977 = vmatpush3.msra.mxu1 %v6219_v18 }
 0x569   :  { %1759 = vmatprep.subr.mxu0 %v6221_v59  ;;  %4978 = vmatprep.subr.mxu1 %v7470_v16 }
 0x56a   :  { %1760 = vmatpush1.msra.mxu0 %v6225_v45  ;;  %4979 = vmatpush3.msra.mxu1 %v6227_v11 }
 0x56b   :  { %1761 = vmatprep.subr.mxu0 %v6229_v21  ;;  %4980 = vmatprep.subr.mxu1 %v7470_v16 }
 0x56c   :  { %1762 = vmatpush1.msra.mxu0 %v6233_v0  ;;  %4981 = vmatpush3.msra.mxu1 %v6235_v61 }
 0x56d   :  { %1763 = vmatprep.subr.mxu0 %v6239_v46  ;;  %4982 = vmatprep.subr.mxu1 %v7470_v16 }
 0x56e   :  { %1764 = vmatpush1.msra.mxu0 %v6243_v56  ;;  %4983 = vmatpush3.msra.mxu1 %v6245_v63 }
 0x56f   :  { %1765 = vmatprep.subr.mxu0 %v6249_v23  ;;  %4984 = vmatprep.subr.mxu1 %v7470_v16 }
 0x570   :  { %1766 = vmatpush1.msra.mxu0 %v6253_v57  ;;  %4985 = vmatpush3.msra.mxu1 %v6255_v9 }
 0x571   :  { %1767 = vmatprep.subr.mxu0 %v6259_v14  ;;  %4986 = vmatprep.subr.mxu1 %v7470_v16 }
 0x572   :  { %1768 = vmatpush1.msra.mxu0 %v6263_v58  ;;  %4987 = vmatpush3.msra.mxu1 %v6265_v60 }
 0x573   :  { %1769 = vmatprep.subr.mxu0 %v6269_v2  ;;  %4988 = vmatprep.subr.mxu1 %v7470_v16 }
 0x574   :  { %1770 = vmatpush1.msra.mxu0 %v6273_v3  ;;  %4989 = vmatpush3.msra.mxu1 %v6275_v4 }
 0x575   :  { %1771 = vmatprep.subr.mxu0 %v6279_v5  ;;  %4990 = vmatprep.subr.mxu1 %v7470_v16 }
 0x576   :  { %1772 = vmatpush1.msra.mxu0 %v6283_v6  ;;  %4991 = vmatpush3.msra.mxu1 %v6285_v7 }
 0x577   :  { %1773 = vmatprep.subr.mxu0 %v6289_v8  ;;  %4992 = vmatprep.subr.mxu1 %v7470_v16 }
 0x578   :  { %1774 = vmatpush1.msra.mxu0 %v6293_v10  ;;  %4993 = vmatpush3.msra.mxu1 %v6295_v13 }
 0x579   :  { %1775 = vmatprep.subr.mxu0 %v6299_v15  ;;  %4994 = vmatprep.subr.mxu1 %v7470_v16 }
 0x57a   :  { %1776 = vmatpush1.msra.mxu0 %v6303_v17  ;;  %4995 = vmatpush3.msra.mxu1 %v6305_v19 }
 0x57b   :  { %1777 = vmatprep.subr.mxu0 %v6309_v20  ;;  %4996 = vmatprep.subr.mxu1 %v7470_v16 }
 0x57c   :  { %1778 = vmatpush1.msra.mxu0 %v6313_v22  ;;  %4997 = vmatpush3.msra.mxu1 %v6315_v24 }
 0x57d   :  { %1779 = vmatprep.subr.mxu0 %v6319_v25  ;;  %4998 = vmatprep.subr.mxu1 %v7470_v16 }
 0x57e   :  { %1780 = vmatpush1.msra.mxu0 %v7486_v43  ;;  %4999 = vmatpush3.msra.mxu1 %v7487_v47 }
 0x57f   :  { %1781 = vmatprep.subr.mxu0 %v7488_v26  ;;  %5000 = vmatprep.subr.mxu1 %v7470_v16 }
 0x580   :  { %1782 = vmatpush1.msra.mxu0 %v7489_v27  ;;  %1815 = vmatprep.mubr.f32.mxu0 %v7470_v16 }
 0x581   :  { %5001 = vmatpush3.msra.mxu1 %v7492_v41  ;;  %5002 = vmatprep.mubr.msk.f32.mxu1 %vm5677_vm1, %v7470_v16 }
 0x582   :  { %1990 = vmatprep.subr.mxu0 %v7493_v29  ;;  %5005 = vmatprep.subr.mxu1 %v7470_v16 }
 0x621   :  { %v1578_v42 = vpop.f32.mrf.mxu0  ;;  %v1649_v1 = vpop.f32.mrf.mxu1 }
 0x622   :  { %v1654_v30 = vrot.slane %v1578_v42, 6  ;;  %v1680_v29 = vadd.f32 %v6421_v40, %v1649_v1  ;;  %v1463_v42 = vld [vmem:[#allocation2 + $0x20] sm:$0xc] }
 0x623   :  { %v4969_v44 = vpop.f32.mrf.mxu1  ;;  %v1580_v33 = vpop.f32.mrf.mxu0  ;;  %v2207_v1 = vld [vmem:[#allocation8 + $0xf0] sm:$0xff] }
 0x624   :  { %v1656_v31 = vadd.f32 %v1654_v30, %v1461_v32  ;;  %v1664_v34 = vrot.slane %v1580_v33, 6  ;;  %v1682_v27 = vrot.slane %v1680_v29, 6  ;;  %v2202_v29 = vld [vmem:[#allocation8 + $0xc8] sm:$0xff] }
 0x626   :  { %v4407_v35 = vmul.f32 -1.442695, %v1656_v31  ;;  %v1666_v37 = vadd.f32 %v1664_v34, %v1462_v36 }
 0x628   :  { %5451 = vpow2.f32 %v4407_v35  ;;  %v4408_v41 = vmul.f32 -1.442695, %v1666_v37 }
 0x635   :  { %v5452_v38 = vpop.eup %5451 }
 0x636   :  { %v1660_v39 = vadd.f32 1.0, %v5452_v38  ;;  %v2205_v38 = vld [vmem:[#allocation8 + $0xe0] sm:$0xff] }
 0x638   :  { %5453 = vrcp.f32 %v1660_v39  ;;  %v2204_v39 = vld [vmem:[#allocation8 + $0xd8] sm:$0xff] }
 0x639   :  { %5455 = vpow2.f32 %v4408_v41 }
 0x645   :  { %v5454_v26 = vpop.eup %5453 }
 0x646   :  { %v1684_v47 = vmul.f32 %v5454_v26, %v1682_v27  ;;  %v5456_v44 = vpop.eup %5455  ;;  %v2211_v26 = vld [vmem:[#allocation8 + $0x110] sm:$0xff]  ;;  %v2210_v27 = vld [vmem:[#allocation8 + $0x108] sm:$0xff] }
 0x647   :  { %v1670_v30 = vadd.f32 1.0, %v5456_v44  ;;  %v2199_v44 = vld [vmem:[#allocation8 + $0xb0] sm:$0xff] }
 0x648   :  { %v1685_v43 = vadd.f32 %v1684_v47, %v1463_v42  ;;  %v2213_v47 = vld [vmem:[#allocation8 + $0x120] sm:$0xff] }
 0x649   :  { %v2201_v42 = vld [vmem:[#allocation8 + $0xc0] sm:$0xff] }
 0x64a   :  { %5457 = vtanh.f32 %v1685_v43  ;;  %v2214_v43 = vld [vmem:[#allocation8 + $0x128] sm:$0xff] }
 0x64b   :  { %5459 = vrcp.f32 %v1670_v30  ;;  %v2198_v30 = vld [vmem:[#allocation8 + $0xa8] sm:$0xff] }
 0x657   :  { %v5458_v32 = vpop.eup %5457 }
 0x658   :  { %v1688_v31 = vrot.slane %v5458_v32, 2  ;;  %v5460_v34 = vpop.eup %5459 }
 0x65a   :  { %v1690_v35 = vsub.f32 %v6425_v28, %v1688_v31  ;;  %v2208_v28 = vld [vmem:[#allocation8 + $0xf8] sm:$0xff]  ;;  %v2195_v31 = vld [vmem:[#allocation8 + $0x90] sm:$0xff] }
 0x65c   :  { %v1692_v33 = vrot.slane %v1690_v35, 6  ;;  %v2193_v35 = vld [vmem:[#allocation8 + $0x80] sm:$0xff] }
 0x65e   :  { %v1694_v36 = vmul.f32 %v5460_v34, %v1692_v33  ;;  %v2192_v33 = vld [vmem:[#allocation8 + $0x78] sm:$0xff]  ;;  %v2190_v34 = vld [vmem:[#allocation8 + $0x68] sm:$0xff] }
 0x660   :  { %v6499_v37 = vadd.f32 %v5458_v32, %v1694_v36  ;;  %v2196_v32 = vld [vmem:[#allocation8 + $0x98] sm:$0xff]  ;;  %v2189_v36 = vld [vmem:[#allocation8 + $0x60] sm:$0xff] }
 0x662   :  { %1696 = vst [vmem:[#allocation3 + $0x8] sm:$0xc] %v6499_v37  ;;  %v1749_v41 = vrot.slane %v6499_v37, 2 }
 0x664   :  { %1816 = vmatmul.mubr.f32.vlgmr.msra.gmra.mxu0 %v1749_v41  ;;  %5003 = vmatmul.mubr.f32.vlgmr.msra.gmra.mxu1 %v1749_v41  ;;  %v2186_v41 = vld [vmem:[#allocation8 + $0x48] sm:$0xff] }
 0x665   :  { %1991 = vmatpush1.msra.mxu0 %v6187_v48  ;;  %5006 = vmatpush3.msra.mxu1 %v6189_v49  ;;  %v7494_v48 = vld [vmem:[#allocation16_spill] sm:$0xff]  ;;  %v7495_v49 = vld [vmem:[#allocation19_spill] sm:$0xff] }
 0x666   :  { %1992 = vmatprep.subr.mxu0 %v6193_v50  ;;  %5007 = vmatprep.subr.mxu1 %v7470_v16  ;;  %v7496_v50 = vld [vmem:[#allocation17_spill] sm:$0xff] }
 0x667   :  { %1993 = vmatpush1.msra.mxu0 %v6197_v51  ;;  %5008 = vmatpush3.msra.mxu1 %v6199_v52  ;;  %v7497_v51 = vld [vmem:[#allocation18_spill] sm:$0xff]  ;;  %v7498_v52 = vld [vmem:[#allocation20_spill] sm:$0xff] }
 0x668   :  { %1994 = vmatprep.subr.mxu0 %v6203_v53  ;;  %5009 = vmatprep.subr.mxu1 %v7470_v16  ;;  %v2223_v53 = vld [vmem:[#allocation8 + $0x170] sm:$0xff] }
 0x669   :  { %1995 = vmatpush1.msra.mxu0 %v6207_v54  ;;  %5010 = vmatpush3.msra.mxu1 %v6209_v55 }
 0x66a   :  { %1996 = vmatprep.subr.mxu0 %v6213_v12  ;;  %5011 = vmatprep.subr.mxu1 %v7470_v16 }
 0x66b   :  { %1997 = vmatpush1.msra.mxu0 %v6217_v62  ;;  %5012 = vmatpush3.msra.mxu1 %v6219_v18  ;;  %v1697_v62 = vld [vmem:[#allocation2] sm:$0x30] }
 0x66c   :  { %1998 = vmatprep.subr.mxu0 %v6221_v59  ;;  %5013 = vmatprep.subr.mxu1 %v7470_v16 }
 0x66d   :  { %1999 = vmatpush1.msra.mxu0 %v6225_v45  ;;  %5014 = vmatpush3.msra.mxu1 %v6227_v11 }
 0x66e   :  { %2000 = vmatprep.subr.mxu0 %v6229_v21  ;;  %5015 = vmatprep.subr.mxu1 %v7470_v16 }
 0x66f   :  { %2001 = vmatpush1.msra.mxu0 %v6233_v0  ;;  %5016 = vmatpush3.msra.mxu1 %v6235_v61  ;;  %v1698_v0 = vld [vmem:[#allocation2 + $0x18] sm:$0x30] }
 0x670   :  { %2002 = vmatprep.subr.mxu0 %v6239_v46  ;;  %5017 = vmatprep.subr.mxu1 %v7470_v16 }
 0x671   :  { %2003 = vmatpush1.msra.mxu0 %v6243_v56  ;;  %5018 = vmatpush3.msra.mxu1 %v6245_v63 }
 0x672   :  { %2004 = vmatprep.subr.mxu0 %v6249_v23  ;;  %5019 = vmatprep.subr.mxu1 %v7470_v16 }
 0x673   :  { %2005 = vmatpush1.msra.mxu0 %v6253_v57  ;;  %5020 = vmatpush3.msra.mxu1 %v6255_v9 }
 0x674   :  { %2006 = vmatprep.subr.mxu0 %v6259_v14  ;;  %5021 = vmatprep.subr.mxu1 %v7470_v16 }
 0x675   :  { %2007 = vmatpush1.msra.mxu0 %v6263_v58  ;;  %5022 = vmatpush3.msra.mxu1 %v6265_v60  ;;  %v1699_v58 = vld [vmem:[#allocation2 + $0x20] sm:$0x30] }
 0x676   :  { %2008 = vmatprep.subr.mxu0 %v6269_v2  ;;  %5023 = vmatprep.subr.mxu1 %v7470_v16 }
 0x677   :  { %2009 = vmatpush1.msra.mxu0 %v6273_v3  ;;  %5024 = vmatpush3.msra.mxu1 %v6275_v4 }
 0x678   :  { %2010 = vmatprep.subr.mxu0 %v6279_v5  ;;  %5025 = vmatprep.subr.mxu1 %v7470_v16 }
 0x679   :  { %2011 = vmatpush1.msra.mxu0 %v6283_v6  ;;  %5026 = vmatpush3.msra.mxu1 %v6285_v7 }
 0x67a   :  { %2012 = vmatprep.subr.mxu0 %v6289_v8  ;;  %5027 = vmatprep.subr.mxu1 %v7470_v16 }
 0x67b   :  { %2013 = vmatpush1.msra.mxu0 %v6293_v10  ;;  %5028 = vmatpush3.msra.mxu1 %v6295_v13 }
 0x67c   :  { %2014 = vmatprep.subr.mxu0 %v6299_v15  ;;  %5029 = vmatprep.subr.mxu1 %v7470_v16 }
 0x67d   :  { %2015 = vmatpush1.msra.mxu0 %v6303_v17  ;;  %5030 = vmatpush3.msra.mxu1 %v6305_v19  ;;  %v2222_v17 = vld [vmem:[#allocation8 + $0x168] sm:$0xff]  ;;  %v2220_v19 = vld [vmem:[#allocation8 + $0x158] sm:$0xff] }
 0x67e   :  { %2016 = vmatprep.subr.mxu0 %v6309_v20  ;;  %5031 = vmatprep.subr.mxu1 %v7470_v16  ;;  %v2175_v20 = vld [vmem:[#allocation3] sm:$0xff] }
 0x67f   :  { %2017 = vmatpush1.msra.mxu0 %v6313_v22  ;;  %5032 = vmatpush3.msra.mxu1 %v6315_v24  ;;  %v2219_v22 = vld [vmem:[#allocation8 + $0x150] sm:$0xff]  ;;  %v2217_v24 = vld [vmem:[#allocation8 + $0x140] sm:$0xff] }
 0x680   :  { %2018 = vmatprep.subr.mxu0 %v6319_v25  ;;  %5033 = vmatprep.subr.mxu1 %v7470_v16  ;;  %v2216_v25 = vld [vmem:[#allocation8 + $0x138] sm:$0xff] }
 0x681   :  { %2019 = vmatpush1.msra.mxu0 %v7494_v48  ;;  %5034 = vmatpush3.msra.mxu1 %v7495_v49  ;;  %v2184_v48 = vld [vmem:[#allocation8 + $0x38] sm:$0xff]  ;;  %v2183_v49 = vld [vmem:[#allocation8 + $0x30] sm:$0xff] }
 0x682   :  { %2020 = vmatprep.subr.mxu0 %v7496_v50  ;;  %5035 = vmatprep.subr.mxu1 %v7470_v16  ;;  %v2181_v50 = vld [vmem:[#allocation8 + $0x20] sm:$0xff] }
 0x683   :  { %2021 = vmatpush1.msra.mxu0 %v7497_v51  ;;  %2054 = vmatprep.mubr.f32.mxu0 %v7470_v16  ;;  %v2180_v51 = vld [vmem:[#allocation8 + $0x18] sm:$0xff] }
 0x684   :  { %5036 = vmatpush3.msra.mxu1 %v7498_v52  ;;  %5037 = vmatprep.mubr.msk.f32.mxu1 %vm5677_vm1, %v7470_v16  ;;  %v2178_v52 = vld [vmem:[#allocation8 + $0x8] sm:$0xff] }
 0x685   :  { %2242 = vmatprep.subr.mxu0 %v2223_v53  ;;  %v2177_v53 = vld [vmem:[#allocation8] sm:$0xff] }
 0x724   :  { %v1817_v54 = vpop.f32.mrf.mxu0  ;;  %v1888_v55 = vpop.f32.mrf.mxu1 }
 0x725   :  { %v1893_v12 = vrot.slane %v1817_v54, 4  ;;  %v1919_v23 = vadd.f32 %v6421_v40, %v1888_v55  ;;  %v2224_v54 = vld [vmem:[#allocation8 + $0x178] sm:$0xff]  ;;  %v2221_v55 = vld [vmem:[#allocation8 + $0x160] sm:$0xff] }
 0x726   :  { %v5004_v18 = vpop.f32.mrf.mxu1  ;;  %v1819_v11 = vpop.f32.mrf.mxu0  ;;  %5040 = vmatprep.subr.mxu1 %v2224_v54 }
 0x727   :  { %v1895_v59 = vadd.f32 %v1893_v12, %v1697_v62  ;;  %v1903_v21 = vrot.slane %v1819_v11, 4  ;;  %v1921_v57 = vrot.slane %v1919_v23, 4  ;;  %v2218_v12 = vld [vmem:[#allocation8 + $0x148] sm:$0xff]  ;;  %v6576_v62 = vld [vmem:[#allocation9 + $0x170] sm:$0xff] }
 0x728   :  { %7499 = vst [vmem:[#allocation15_spill] sm:$0xff] %v6576_v62  ;;  %v6579_v18 = vld [vmem:[#allocation9 + $0x168] sm:$0xff]  ;;  %v6585_v11 = vld [vmem:[#allocation9 + $0x150] sm:$0xff] }
 0x729   :  { %v4410_v45 = vmul.f32 -1.442695, %v1895_v59  ;;  %v1905_v61 = vadd.f32 %v1903_v21, %v1698_v0  ;;  %v2215_v59 = vld [vmem:[#allocation8 + $0x130] sm:$0xff]  ;;  %v2212_v21 = vld [vmem:[#allocation8 + $0x118] sm:$0xff]  ;;  %v6588_v0 = vld [vmem:[#allocation9 + $0x140] sm:$0xff] }
 0x72a   :  { %v2206_v23 = vld [vmem:[#allocation8 + $0xe8] sm:$0xff] }
 0x72b   :  { %5461 = vpow2.f32 %v4410_v45  ;;  %v4411_v63 = vmul.f32 -1.442695, %v1905_v61  ;;  %v6582_v45 = vld [vmem:[#allocation9 + $0x158] sm:$0xff] }
 0x72c   :  { %v6591_v61 = vld [vmem:[#allocation9 + $0x138] sm:$0xff] }
 0x738   :  { %v5462_v46 = vpop.eup %5461 }
 0x739   :  { %v1899_v56 = vadd.f32 1.0, %v5462_v46  ;;  %v2209_v46 = vld [vmem:[#allocation8 + $0x100] sm:$0xff] }
 0x73b   :  { %5463 = vrcp.f32 %v1899_v56  ;;  %v6594_v56 = vld [vmem:[#allocation9 + $0x128] sm:$0xff] }
 0x73c   :  { %5465 = vpow2.f32 %v4411_v63  ;;  %v6597_v63 = vld [vmem:[#allocation9 + $0x120] sm:$0xff] }
 0x748   :  { %v5464_v9 = vpop.eup %5463 }
 0x749   :  { %v1923_v14 = vmul.f32 %v5464_v9, %v1921_v57  ;;  %v5466_v2 = vpop.eup %5465  ;;  %v6600_v57 = vld [vmem:[#allocation9 + $0x110] sm:$0xff]  ;;  %v6603_v9 = vld [vmem:[#allocation9 + $0x108] sm:$0xff] }
 0x74a   :  { %v1909_v3 = vadd.f32 1.0, %v5466_v2  ;;  %v2200_v2 = vld [vmem:[#allocation8 + $0xb8] sm:$0xff] }
 0x74b   :  { %v1924_v60 = vadd.f32 %v1923_v14, %v1699_v58  ;;  %v2203_v14 = vld [vmem:[#allocation8 + $0xd0] sm:$0xff]  ;;  %v6606_v58 = vld [vmem:[#allocation9 + $0xf8] sm:$0xff] }
 0x74d   :  { %5467 = vtanh.f32 %v1924_v60  ;;  %v6609_v60 = vld [vmem:[#allocation9 + $0xf0] sm:$0xff] }
 0x74e   :  { %5469 = vrcp.f32 %v1909_v3  ;;  %v6612_v3 = vld [vmem:[#allocation9 + $0xe0] sm:$0xff] }
 0x75a   :  { %v5468_v4 = vpop.eup %5467 }
 0x75b   :  { %v1927_v5 = vrot.slane %v5468_v4, 2  ;;  %v5470_v8 = vpop.eup %5469 }
 0x75d   :  { %v1929_v6 = vsub.f32 %v6499_v37, %v1927_v5  ;;  %v2187_v37 = vld [vmem:[#allocation8 + $0x50] sm:$0xff]  ;;  %v2197_v5 = vld [vmem:[#allocation8 + $0xa0] sm:$0xff] }
 0x75f   :  { %v1931_v7 = vrot.slane %v1929_v6, 6  ;;  %v6618_v6 = vld [vmem:[#allocation9 + $0xc8] sm:$0xff] }
 0x761   :  { %v1933_v10 = vmul.f32 %v5470_v8, %v1931_v7  ;;  %v6621_v7 = vld [vmem:[#allocation9 + $0xc0] sm:$0xff]  ;;  %v2194_v8 = vld [vmem:[#allocation8 + $0x88] sm:$0xff] }
 0x763   :  { %v6570_v13 = vadd.f32 %v5468_v4, %v1933_v10  ;;  %v6615_v4 = vld [vmem:[#allocation9 + $0xd8] sm:$0xff]  ;;  %v6624_v10 = vld [vmem:[#allocation9 + $0xb0] sm:$0xff] }
 0x765   :  { %1935 = vst [vmem:[#allocation3 + $0x8] sm:$0x30] %v6570_v13  ;;  %v1988_v15 = vrot.slane %v6570_v13, 4 }
 0x767   :  { %2055 = vmatmul.mubr.f32.vlgmr.msra.gmra.mxu0 %v1988_v15  ;;  %5038 = vmatmul.mubr.f32.vlgmr.msra.gmra.mxu1 %v1988_v15  ;;  %v6627_v15 = vld [vmem:[#allocation9 + $0xa8] sm:$0xff] }
 0x768   :  { %2243 = vmatpush1.msra.mxu0 %v2222_v17  ;;  %5072 = vmatprep.mubr.f32.mxu1 %v2175_v20  ;;  %v2191_v17 = vld [vmem:[#allocation8 + $0x70] sm:$0xff] }
 0x769   :  { %2244 = vmatprep.subr.mxu0 %v2220_v19  ;;  %2306 = vmatprep.mubr.f32.mxu0 %v7470_v16  ;;  %v6630_v19 = vld [vmem:[#allocation9 + $0x98] sm:$0xff] }
 0x76a   :  { %2245 = vmatpush1.msra.mxu0 %v2219_v22  ;;  %5041 = vmatpush3.msra.mxu1 %v2224_v54  ;;  %v2188_v22 = vld [vmem:[#allocation8 + $0x58] sm:$0xff] }
 0x76b   :  { %2246 = vmatprep.subr.mxu0 %v2217_v24  ;;  %5042 = vmatprep.subr.mxu1 %v2221_v55  ;;  %v6636_v24 = vld [vmem:[#allocation9 + $0x80] sm:$0xff] }
 0x76c   :  { %2247 = vmatpush1.msra.mxu0 %v2216_v25  ;;  %5043 = vmatpush3.msra.mxu1 %v2221_v55  ;;  %v6638_v25 = vld [vmem:[#allocation9 + $0x78] sm:$0xff]  ;;  %v6677_v55 = vld [vmem:[%s7401_s7] sm:$0x7] }
 0x76d   :  { %2248 = vmatprep.subr.mxu0 %v2214_v43  ;;  %5044 = vmatprep.subr.mxu1 %v2218_v12  ;;  %v2185_v43 = vld [vmem:[#allocation8 + $0x40] sm:$0xff] }
 0x76e   :  { %2249 = vmatpush1.msra.mxu0 %v2213_v47  ;;  %5045 = vmatpush3.msra.mxu1 %v2218_v12  ;;  %v6641_v47 = vld [vmem:[#allocation9 + $0x68] sm:$0xff]  ;;  %v7503_v12 = vld [vmem:[#allocation21_spill] sm:$0xff] }
 0x76f   :  { %2250 = vmatprep.subr.mxu0 %v2211_v26  ;;  %5046 = vmatprep.subr.mxu1 %v2215_v59  ;;  %v6643_v26 = vld [vmem:[#allocation9 + $0x60] sm:$0xff] }
 0x770   :  { %2251 = vmatpush1.msra.mxu0 %v2210_v27  ;;  %5047 = vmatpush3.msra.mxu1 %v2215_v59  ;;  %v2182_v27 = vld [vmem:[#allocation8 + $0x28] sm:$0xff]  ;;  %v7504_v59 = vsub.s32 0, %v7503_v12 }
 0x771   :  { %2252 = vmatprep.subr.mxu0 %v2208_v28  ;;  %5048 = vmatprep.subr.mxu1 %v2212_v21  ;;  %v6646_v28 = vld [vmem:[#allocation9 + $0x50] sm:$0xff] }
 0x772   :  { %2253 = vmatpush1.msra.mxu0 %v2207_v1  ;;  %5049 = vmatpush3.msra.mxu1 %v2212_v21  ;;  %v6649_v1 = vld [vmem:[#allocation9 + $0x48] sm:$0xff]  ;;  %v6682_v21 = vrot.slane %v6677_v55, %v7504_v59  ;;  %v6718_v59 = vld [vmem:[#allocation9 + $0x100] sm:$0xff] }
 0x773   :  { %2254 = vmatprep.subr.mxu0 %v2205_v38  ;;  %5050 = vmatprep.subr.mxu1 %v2209_v46  ;;  %v2179_v38 = vld [vmem:[#allocation8 + $0x10] sm:$0xff] }
 0x774   :  { %2255 = vmatpush1.msra.mxu0 %v2204_v39  ;;  %5051 = vmatpush3.msra.mxu1 %v2209_v46  ;;  %v6652_v39 = vld [vmem:[#allocation9 + $0x38] sm:$0xff] }
 0x775   :  { %2256 = vmatprep.subr.mxu0 %v2202_v29  ;;  %5052 = vmatprep.subr.mxu1 %v2206_v23  ;;  %v6655_v29 = vld [vmem:[#allocation9 + $0x30] sm:$0xff] }
 0x776   :  { %2257 = vmatpush1.msra.mxu0 %v2201_v42  ;;  %5053 = vmatpush3.msra.mxu1 %v2206_v23  ;;  %v6660_v42 = vld [vmem:[#allocation9 + $0x20] sm:$0xff]  ;;  %v7505_v23 = vsub.s32 1, %v7503_v12 }
 0x777   :  { %2258 = vmatprep.subr.mxu0 %v2199_v44  ;;  %5054 = vmatprep.subr.mxu1 %v2203_v14  ;;  %v6662_v44 = vld [vmem:[#allocation9 + $0x18] sm:$0xff] }
 0x778   :  { %2259 = vmatpush1.msra.mxu0 %v2198_v30  ;;  %5055 = vmatpush3.msra.mxu1 %v2203_v14  ;;  %7500 = vst [vmem:[#allocation16_spill] sm:$0xff] %v6662_v44  ;;  %v6664_v30 = vld [vmem:[#allocation9 + $0x8] sm:$0xff]  ;;  %v6688_v14 = vrot.slane %v6677_v55, %v7505_v23  ;;  %v6730_v23 = vld [vmem:[#allocation9 + $0xd0] sm:$0xff] }
 0x779   :  { %2260 = vmatprep.subr.mxu0 %v2196_v32  ;;  %5056 = vmatprep.subr.mxu1 %v2200_v2  ;;  %7501 = vst [vmem:[#allocation19_spill] sm:$0xff] %v6664_v30  ;;  %v6668_v32 = vld [vmem:[#allocation9] sm:$0xff] }
 0x77a   :  { %2261 = vmatpush1.msra.mxu0 %v2195_v31  ;;  %5057 = vmatpush3.msra.mxu1 %v2200_v2  ;;  %7502 = vst [vmem:[#allocation17_spill] sm:$0xff] %v6668_v32 }
 0x77b   :  { %2262 = vmatprep.subr.mxu0 %v2193_v35  ;;  %5058 = vmatprep.subr.mxu1 %v2197_v5 }
 0x77c   :  { %2263 = vmatpush1.msra.mxu0 %v2192_v33  ;;  %5059 = vmatpush3.msra.mxu1 %v2197_v5 }
 0x77d   :  { %2264 = vmatprep.subr.mxu0 %v2190_v34  ;;  %5060 = vmatprep.subr.mxu1 %v2194_v8  ;;  %v1936_v34 = vld [vmem:[#allocation2] sm:$0xc0] }
 0x77e   :  { %2265 = vmatpush1.msra.mxu0 %v2189_v36  ;;  %5061 = vmatpush3.msra.mxu1 %v2194_v8 }
 0x77f   :  { %2266 = vmatprep.subr.mxu0 %v2187_v37  ;;  %5062 = vmatprep.subr.mxu1 %v2191_v17 }
 0x780   :  { %2267 = vmatpush1.msra.mxu0 %v2186_v41  ;;  %5063 = vmatpush3.msra.mxu1 %v2191_v17 }
 0x781   :  { %2268 = vmatprep.subr.mxu0 %v2184_v48  ;;  %5064 = vmatprep.subr.mxu1 %v2188_v22 }
 0x782   :  { %2269 = vmatpush1.msra.mxu0 %v2183_v49  ;;  %5065 = vmatpush3.msra.mxu1 %v2188_v22 }
 0x783   :  { %2270 = vmatprep.subr.mxu0 %v2181_v50  ;;  %5066 = vmatprep.subr.mxu1 %v2185_v43  ;;  %v1937_v50 = vld [vmem:[#allocation2 + $0x18] sm:$0xc0] }
 0x784   :  { %2271 = vmatpush1.msra.mxu0 %v2180_v51  ;;  %5067 = vmatpush3.msra.mxu1 %v2185_v43 }
 0x785   :  { %2272 = vmatprep.subr.mxu0 %v2178_v52  ;;  %5068 = vmatprep.subr.mxu1 %v2182_v27 }
 0x786   :  { %2273 = vmatpush1.msra.mxu0 %v2177_v53  ;;  %5069 = vmatpush3.msra.mxu1 %v2182_v27 }
 0x787   :  { %2307 = vmatmul.mubr.f32.vlgmr.msra.gmra.mxu0 %v2175_v20  ;;  %2451 = vmatprep.subr.mxu0 %v6576_v62  ;;  %v6633_v20 = vld [vmem:[#allocation9 + $0x90] sm:$0xff] }
 0x788   :  { %2312 = vmatprep.mubr.f32.mxu0 %v7470_v16  ;;  %2452 = vmatpush1.msra.mxu0 %v6579_v18 }
 0x789   :  { %2453 = vmatprep.subr.mxu0 %v6582_v45  ;;  %5070 = vmatprep.subr.mxu1 %v2179_v38 }
 0x78a   :  { %2454 = vmatpush1.msra.mxu0 %v6585_v11  ;;  %5071 = vmatpush3.msra.mxu1 %v2179_v38  ;;  %v1938_v38 = vld [vmem:[#allocation2 + $0x20] sm:$0xc0] }
 0x78b   :  { %2455 = vmatprep.subr.mxu0 %v6588_v0  ;;  %5075 = vmatprep.subr.mxu1 %v7470_v16 }
 0x78c   :  { %2456 = vmatpush1.msra.mxu0 %v6591_v61 }
 0x78d   :  { %2457 = vmatprep.subr.mxu0 %v6594_v56 }
 0x78e   :  { %2458 = vmatpush1.msra.mxu0 %v6597_v63 }
 0x78f   :  { %2459 = vmatprep.subr.mxu0 %v6600_v57 }
 0x790   :  { %2460 = vmatpush1.msra.mxu0 %v6603_v9 }
 0x791   :  { %2461 = vmatprep.subr.mxu0 %v6606_v58 }
 0x792   :  { %2462 = vmatpush1.msra.mxu0 %v6609_v60 }
 0x793   :  { %2463 = vmatprep.subr.mxu0 %v6612_v3 }
 0x794   :  { %2464 = vmatpush1.msra.mxu0 %v6615_v4 }
 0x795   :  { %2465 = vmatprep.subr.mxu0 %v6618_v6 }
 0x796   :  { %2466 = vmatpush1.msra.mxu0 %v6621_v7 }
 0x797   :  { %2467 = vmatprep.subr.mxu0 %v6624_v10 }
 0x798   :  { %2468 = vmatpush1.msra.mxu0 %v6627_v15 }
 0x799   :  { %2469 = vmatprep.subr.mxu0 %v6630_v19 }
 0x79a   :  { %2470 = vmatpush1.msra.mxu0 %v6633_v20 }
 0x79b   :  { %2471 = vmatprep.subr.mxu0 %v6636_v24 }
 0x79c   :  { %2472 = vmatpush1.msra.mxu0 %v6638_v25 }
 0x79d   :  { %2473 = vmatprep.subr.mxu0 %v6641_v47 }
 0x79e   :  { %2474 = vmatpush1.msra.mxu0 %v6643_v26 }
 0x79f   :  { %2475 = vmatprep.subr.mxu0 %v6646_v28 }
 0x7a0   :  { %2476 = vmatpush1.msra.mxu0 %v6649_v1 }
 0x7a1   :  { %2477 = vmatprep.subr.mxu0 %v6652_v39 }
 0x7a2   :  { %2478 = vmatpush1.msra.mxu0 %v6655_v29 }
 0x7a3   :  { %2479 = vmatprep.subr.mxu0 %v6660_v42 }
 0x7a4   :  { %2480 = vmatpush1.msra.mxu0 %v6662_v44 }
 0x7a5   :  { %2481 = vmatprep.subr.mxu0 %v6664_v30 }
 0x7a6   :  { %2482 = vmatpush1.msra.mxu0 %v6668_v32 }
 0x7a7   :  { %2672 = vmatprep.subr.mxu0 %v6576_v62 }
 0x827   :  { %v2056_v31 = vpop.f32.mrf.mxu0  ;;  %v2127_v35 = vpop.f32.mrf.mxu1 }
 0x828   :  { %v2132_v33 = vrot.slane %v2056_v31, 2  ;;  %v2158_v46 = vadd.f32 %v6421_v40, %v2127_v35 }
 0x829   :  { %v5039_v36 = vpop.f32.mrf.mxu1  ;;  %v2058_v48 = vpop.f32.mrf.mxu0 }
 0x82a   :  { %v2134_v37 = vadd.f32 %v2132_v33, %v1936_v34  ;;  %v2142_v49 = vrot.slane %v2058_v48, 2  ;;  %v2160_v17 = vrot.slane %v2158_v46, 2  ;;  %v6724_v46 = vld [vmem:[#allocation9 + $0xe8] sm:$0xff] }
 0x82c   :  { %v4413_v41 = vmul.f32 -1.442695, %v2134_v37  ;;  %v2144_v51 = vadd.f32 %v2142_v49, %v1937_v50  ;;  %v6693_v50 = vld [vmem:[#allocation9 + $0x178] sm:$0xff] }
 0x82e   :  { %5471 = vpow2.f32 %v4413_v41  ;;  %v4414_v54 = vmul.f32 -1.442695, %v2144_v51 }
 0x83b   :  { %v5472_v52 = vpop.eup %5471 }
 0x83c   :  { %v2138_v53 = vadd.f32 1.0, %v5472_v52  ;;  %v6695_v52 = vld [vmem:[#allocation9 + $0x160] sm:$0xff] }
 0x83e   :  { %5473 = vrcp.f32 %v2138_v53  ;;  %v6700_v53 = vld [vmem:[#allocation9 + $0x148] sm:$0xff] }
 0x83f   :  { %5475 = vpow2.f32 %v4414_v54  ;;  %v6712_v54 = vld [vmem:[#allocation9 + $0x118] sm:$0xff] }
 0x847   :  { %v2308_v2 = vpop.f32.mrf.mxu0 }
 0x848   :  { %v2309_v5 = vadd.f32 %v2308_v2, %v6682_v21  ;;  %v6736_v2 = vld [vmem:[#allocation9 + $0xb8] sm:$0xff] }
 0x849   :  { %v2310_v8 = vpop.f32.mrf.mxu0 }
 0x84a   :  { %2394 = vst [vmem:[#allocation2 + $0x28] sm:$0xff] %v2309_v5  ;;  %v2311_v22 = vadd.f32 %v2310_v8, %v6688_v14  ;;  %v6742_v5 = vld [vmem:[#allocation9 + $0xa0] sm:$0xff]  ;;  %v6748_v8 = vld [vmem:[#allocation9 + $0x88] sm:$0xff] }
 0x84b   :  { %v5474_v43 = vpop.eup %5473 }
 0x84c   :  { %v2162_v27 = vmul.f32 %v5474_v43, %v2160_v17  ;;  %2395 = vst [vmem:[#allocation2 + $0x10] sm:$0xff] %v2311_v22  ;;  %v5476_v33 = vpop.eup %5475  ;;  %v6754_v17 = vld [vmem:[#allocation9 + $0x70] sm:$0xff]  ;;  %v6760_v22 = vld [vmem:[#allocation9 + $0x58] sm:$0xff]  ;;  %v6766_v43 = vld [vmem:[#allocation9 + $0x40] sm:$0xff] }
 0x84d   :  { %v2148_v40 = vadd.f32 1.0, %v5476_v33 }
 0x84e   :  { %v2163_v31 = vadd.f32 %v2162_v27, %v1938_v38  ;;  %v6772_v27 = vld [vmem:[#allocation9 + $0x28] sm:$0xff]  ;;  %v6778_v38 = vld [vmem:[#allocation9 + $0x10] sm:$0xff] }
 0x84f   :  { %7506 = vst [vmem:[#allocation18_spill] sm:$0xff] %v6772_v27  ;;  %7507 = vst [vmem:[#allocation20_spill] sm:$0xff] %v6778_v38 }
 0x850   :  { %5477 = vtanh.f32 %v2163_v31  ;;  %v7508_v31 = vsub.s32 2, %v7503_v12 }
 0x851   :  { %5479 = vrcp.f32 %v2148_v40 }
 0x852   :  { %v2238_v33 = vrot.slane %v6677_v55, %v7508_v31 }
 0x853   :  { %v2401_v31 = vld [vmem:[#allocation2 + $0x10] sm:$0x3] }
 0x85d   :  { %v5478_v35 = vpop.eup %5477 }
 0x85e   :  { %v2166_v34 = vrot.slane %v5478_v35, 2  ;;  %v5480_v41 = vpop.eup %5479 }
 0x860   :  { %v2168_v36 = vsub.f32 %v6570_v13, %v2166_v34  ;;  %v6707_v13 = vld [vmem:[#allocation9 + $0x130] sm:$0xff] }
 0x862   :  { %v2170_v37 = vrot.slane %v2168_v36, 6 }
 0x864   :  { %v2172_v48 = vmul.f32 %v5480_v41, %v2170_v37 }
 0x866   :  { %v2173_v49 = vadd.f32 %v5478_v35, %v2172_v48 }
 0x868   :  { %2174 = vst [vmem:[#allocation3 + $0x8] sm:$0xc0] %v2173_v49 }
 0x86f   :  { %v2176_v51 = vld [vmem:[#allocation3 + $0x8] sm:$0xff] }
 0x870   :  { %2313 = vmatmul.mubr.f32.gmra.mxu0 %v2176_v51  ;;  %5073 = vmatmul.mubr.f32.vlgmr.msra.gmra.mxu1 %v2176_v51  ;;  %v2400_v51 = vld [vmem:[#allocation2 + $0x28] sm:$0x3] }
 0x871   :  { %2515 = vmatprep.mubr.f32.mxu0 %v7470_v16  ;;  %5076 = vmatpush3.msra.mxu1 %v6693_v50 }
 0x872   :  { %5077 = vmatprep.subr.mxu1 %v7470_v16  ;;  %5107 = vmatprep.mubr.msk.f32.mxu1 %vm5677_vm1, %v7470_v16 }
 0x873   :  { %5078 = vmatpush3.msra.mxu1 %v6695_v52 }
 0x874   :  { %2516 = vmatmul.mubr.f32.vlgmr.msra.gmra.mxu0 %v7470_v16  ;;  %5079 = vmatprep.subr.mxu1 %v7470_v16 }
 0x875   :  { %5080 = vmatpush3.msra.mxu1 %v6700_v53  ;;  %2673 = vmatpush1.msra.mxu0 %v6579_v18 }
 0x876   :  { %5081 = vmatprep.subr.mxu1 %v7470_v16  ;;  %2674 = vmatprep.subr.mxu0 %v6582_v45 }
 0x877   :  { %5082 = vmatpush3.msra.mxu1 %v6707_v13  ;;  %2675 = vmatpush1.msra.mxu0 %v6585_v11 }
 0x878   :  { %5083 = vmatprep.subr.mxu1 %v7470_v16  ;;  %2676 = vmatprep.subr.mxu0 %v6588_v0 }
 0x879   :  { %5084 = vmatpush3.msra.mxu1 %v6712_v54  ;;  %2677 = vmatpush1.msra.mxu0 %v6591_v61 }
 0x87a   :  { %5085 = vmatprep.subr.mxu1 %v7470_v16  ;;  %2678 = vmatprep.subr.mxu0 %v6594_v56 }
 0x87b   :  { %5086 = vmatpush3.msra.mxu1 %v6718_v59  ;;  %2679 = vmatpush1.msra.mxu0 %v6597_v63 }
 0x87c   :  { %5087 = vmatprep.subr.mxu1 %v7470_v16  ;;  %2680 = vmatprep.subr.mxu0 %v6600_v57 }
 0x87d   :  { %5088 = vmatpush3.msra.mxu1 %v6724_v46  ;;  %2681 = vmatpush1.msra.mxu0 %v6603_v9 }
 0x87e   :  { %5089 = vmatprep.subr.mxu1 %v7470_v16  ;;  %2682 = vmatprep.subr.mxu0 %v6606_v58 }
 0x87f   :  { %5090 = vmatpush3.msra.mxu1 %v6730_v23  ;;  %2683 = vmatpush1.msra.mxu0 %v6609_v60 }
 0x880   :  { %5091 = vmatprep.subr.mxu1 %v7470_v16  ;;  %2684 = vmatprep.subr.mxu0 %v6612_v3 }
 0x881   :  { %5092 = vmatpush3.msra.mxu1 %v6736_v2  ;;  %2685 = vmatpush1.msra.mxu0 %v6615_v4 }
 0x882   :  { %5093 = vmatprep.subr.mxu1 %v7470_v16  ;;  %2686 = vmatprep.subr.mxu0 %v6618_v6 }
 0x883   :  { %5094 = vmatpush3.msra.mxu1 %v6742_v5  ;;  %2687 = vmatpush1.msra.mxu0 %v6621_v7 }
 0x884   :  { %5095 = vmatprep.subr.mxu1 %v7470_v16  ;;  %2688 = vmatprep.subr.mxu0 %v6624_v10 }
 0x885   :  { %5096 = vmatpush3.msra.mxu1 %v6748_v8  ;;  %2689 = vmatpush1.msra.mxu0 %v6627_v15 }
 0x886   :  { %5097 = vmatprep.subr.mxu1 %v7470_v16  ;;  %2690 = vmatprep.subr.mxu0 %v6630_v19 }
 0x887   :  { %5098 = vmatpush3.msra.mxu1 %v6754_v17  ;;  %2691 = vmatpush1.msra.mxu0 %v6633_v20 }
 0x888   :  { %5099 = vmatprep.subr.mxu1 %v7470_v16  ;;  %2692 = vmatprep.subr.mxu0 %v6636_v24 }
 0x889   :  { %5100 = vmatpush3.msra.mxu1 %v6760_v22  ;;  %2693 = vmatpush1.msra.mxu0 %v6638_v25 }
 0x88a   :  { %5101 = vmatprep.subr.mxu1 %v7470_v16  ;;  %2694 = vmatprep.subr.mxu0 %v6641_v47 }
 0x88b   :  { %5102 = vmatpush3.msra.mxu1 %v6766_v43  ;;  %2695 = vmatpush1.msra.mxu0 %v6643_v26 }
 0x88c   :  { %5103 = vmatprep.subr.mxu1 %v7470_v16  ;;  %2696 = vmatprep.subr.mxu0 %v6646_v28 }
 0x88d   :  { %5104 = vmatpush3.msra.mxu1 %v6772_v27  ;;  %2697 = vmatpush1.msra.mxu0 %v6649_v1 }
 0x88e   :  { %5105 = vmatprep.subr.mxu1 %v7470_v16  ;;  %2698 = vmatprep.subr.mxu0 %v6652_v39 }
 0x88f   :  { %5106 = vmatpush3.msra.mxu1 %v6778_v38  ;;  %2699 = vmatpush1.msra.mxu0 %v6655_v29 }
 0x890   :  { %5108 = vmatmul.mubr.f32.vlgmr.msra.gmra.mxu1 %v7470_v16  ;;  %5110 = vmatprep.subr.mxu1 %v7470_v16 }
 0x891   :  { %5111 = vmatpush3.msra.mxu1 %v6693_v50  ;;  %2700 = vmatprep.subr.mxu0 %v6660_v42 }
 0x892   :  { %5112 = vmatprep.subr.mxu1 %v7470_v16  ;;  %2701 = vmatpush1.msra.mxu0 %v6662_v44 }
 0x893   :  { %5113 = vmatpush3.msra.mxu1 %v6695_v52  ;;  %2702 = vmatprep.subr.mxu0 %v6664_v30 }
 0x894   :  { %5114 = vmatprep.subr.mxu1 %v7470_v16  ;;  %2703 = vmatpush1.msra.mxu0 %v6668_v32 }
 0x895   :  { %5115 = vmatpush3.msra.mxu1 %v6700_v53  ;;  %2736 = vmatprep.mubr.f32.mxu0 %v7470_v16 }
 0x896   :  { %5116 = vmatprep.subr.mxu1 %v7470_v16  ;;  %5142 = vmatprep.mubr.msk.f32.mxu1 %vm5677_vm1, %v7470_v16 }
 0x897   :  { %5117 = vmatpush3.msra.mxu1 %v6707_v13  ;;  %2911 = vmatprep.subr.mxu0 %v6576_v62 }
 0x898   :  { %5118 = vmatprep.subr.mxu1 %v7470_v16 }
 0x899   :  { %5119 = vmatpush3.msra.mxu1 %v6712_v54 }
 0x89a   :  { %5120 = vmatprep.subr.mxu1 %v7470_v16 }
 0x89b   :  { %5121 = vmatpush3.msra.mxu1 %v6718_v59 }
 0x89c   :  { %5122 = vmatprep.subr.mxu1 %v7470_v16 }
 0x89d   :  { %5123 = vmatpush3.msra.mxu1 %v6724_v46 }
 0x89e   :  { %5124 = vmatprep.subr.mxu1 %v7470_v16 }
 0x89f   :  { %5125 = vmatpush3.msra.mxu1 %v6730_v23 }
 0x8a0   :  { %5126 = vmatprep.subr.mxu1 %v7470_v16 }
 0x8a1   :  { %5127 = vmatpush3.msra.mxu1 %v6736_v2 }
 0x8a2   :  { %5128 = vmatprep.subr.mxu1 %v7470_v16 }
 0x8a3   :  { %5129 = vmatpush3.msra.mxu1 %v6742_v5 }
 0x8a4   :  { %5130 = vmatprep.subr.mxu1 %v7470_v16 }
 0x8a5   :  { %5131 = vmatpush3.msra.mxu1 %v6748_v8 }
 0x8a6   :  { %5132 = vmatprep.subr.mxu1 %v7470_v16 }
 0x8a7   :  { %5133 = vmatpush3.msra.mxu1 %v6754_v17 }
 0x8a8   :  { %5134 = vmatprep.subr.mxu1 %v7470_v16 }
 0x8a9   :  { %5135 = vmatpush3.msra.mxu1 %v6760_v22 }
 0x8aa   :  { %5136 = vmatprep.subr.mxu1 %v7470_v16 }
 0x8ab   :  { %5137 = vmatpush3.msra.mxu1 %v6766_v43 }
 0x8ac   :  { %5138 = vmatprep.subr.mxu1 %v7470_v16 }
 0x8ad   :  { %5139 = vmatpush3.msra.mxu1 %v6772_v27 }
 0x8ae   :  { %5140 = vmatprep.subr.mxu1 %v7470_v16 }
 0x8af   :  { %5141 = vmatpush3.msra.mxu1 %v6778_v38 }
 0x8b0   :  { %5145 = vmatprep.subr.mxu1 %v7470_v16 }
 0x930   :  { %v2314_v40 = vpop.f32.mrf.mxu0  ;;  %v5074_v35 = vpop.f32.mrf.mxu1 }
 0x931   :  { %v2315_v34 = vadd.f32 %v2314_v40, %v6682_v21  ;;  %v2391_v36 = vadd.f32 %v5074_v35, %v2238_v33 }
 0x932   :  { %v2316_v37 = vpop.f32.mrf.mxu0  ;;  %v2385_v41 = vpop.f32.mrf.mxu1 }
 0x933   :  { %2397 = vst [vmem:[#allocation2] sm:$0xff] %v2315_v34  ;;  %2399 = vst [vmem:[#allocation2 + $0x20] sm:$0xff] %v2391_v36  ;;  %v2317_v48 = vadd.f32 %v2316_v37, %v6688_v14  ;;  %v2386_v49 = vadd.f32 %v2385_v41, %v2238_v33  ;;  %v6837_v14 = vld [vmem:[%s7402_s8] ss:$0 sm:$0xff] }
 0x934   :  { %v2517_v62 = vpop.f32.mrf.mxu0 }
 0x935   :  { %2398 = vst [vmem:[#allocation2 + $0x18] sm:$0xff] %v2317_v48  ;;  %2396 = vst [vmem:[#allocation2 + $0x8] sm:$0xff] %v2386_v49  ;;  %v2592_v38 = vadd.f32 %v2517_v62, %v2400_v51 }
 0x936   :  { %v2519_v55 = vpop.f32.mrf.mxu0 }
 0x937   :  { %v4416_v12 = vmul.f32 -1.442695, %v2592_v38  ;;  %v2599_v32 = vadd.f32 %v2519_v55, %v2401_v31  ;;  %v7509_v55 = vld [vmem:[#allocation19_spill] sm:$0xff]  ;;  %v7510_v31 = vld [vmem:[#allocation17_spill] sm:$0xff] }
 0x939   :  { %5481 = vpow2.f32 %v4416_v12  ;;  %v4417_v30 = vmul.f32 -1.442695, %v2599_v32 }
 0x93b   :  { %5483 = vpow2.f32 %v4417_v30 }
 0x93c   :  { %v2402_v37 = vld [vmem:[#allocation2 + $0x8] sm:$0x3] }
 0x946   :  { %v5482_v21 = vpop.eup %5481 }
 0x947   :  { %v2596_v40 = vadd.f32 1.0, %v5482_v21  ;;  %v7511_v21 = vld [vmem:[#allocation20_spill] sm:$0xff] }
 0x948   :  { %v5484_v62 = vpop.eup %5483 }
 0x949   :  { %5485 = vrcp.f32 %v2596_v40  ;;  %v2603_v41 = vadd.f32 1.0, %v5484_v62  ;;  %v7512_v40 = vld [vmem:[#allocation15_spill] sm:$0xff]  ;;  %v2621_v62 = vld [vmem:[#allocation2 + $0x28] sm:$0xc] }
 0x950   :  { %v2588_v35 = vpop.f32.mrf.mxu1 }
 0x951   :  { %v2613_v34 = vadd.f32 %v6837_v14, %v2588_v35 }
 0x952   :  { %v5109_v33 = vpop.f32.mrf.mxu1 }
 0x956   :  { %v5486_v38 = vpop.eup %5485 }
 0x957   :  { %v2614_v36 = vmul.f32 %v5486_v38, %v2613_v34 }
 0x959   :  { %v2615_v48 = vadd.f32 %v2614_v36, %v2402_v37 }
 0x95b   :  { %5487 = vtanh.f32 %v2615_v48 }
 0x95c   :  { %5489 = vrcp.f32 %v2603_v41 }
 0x968   :  { %v5488_v32 = vpop.eup %5487 }
 0x969   :  { %v2617_v30 = vsub.f32 0.0, %v5488_v32  ;;  %v5490_v49 = vpop.eup %5489 }
 0x96b   :  { %v2618_v51 = vmul.f32 %v5490_v49, %v2617_v30 }
 0x96d   :  { %v6840_v12 = vadd.f32 %v5488_v32, %v2618_v51  ;;  %v2622_v32 = vld [vmem:[#allocation2 + $0x10] sm:$0xc] }
 0x96f   :  { %2620 = vst [vmem:[#allocation3] sm:$0x3] %v6840_v12  ;;  %2737 = vmatmul.mubr.f32.vlgmr.msra.gmra.mxu0 %v6840_v12  ;;  %5143 = vmatmul.mubr.f32.vlgmr.msra.gmra.mxu1 %v6840_v12 }
 0x970   :  { %2912 = vmatpush1.msra.mxu0 %v6579_v18  ;;  %5146 = vmatpush3.msra.mxu1 %v6693_v50 }
 0x971   :  { %2913 = vmatprep.subr.mxu0 %v6582_v45  ;;  %5147 = vmatprep.subr.mxu1 %v7470_v16 }
 0x972   :  { %2914 = vmatpush1.msra.mxu0 %v6585_v11  ;;  %5148 = vmatpush3.msra.mxu1 %v6695_v52 }
 0x973   :  { %2915 = vmatprep.subr.mxu0 %v6588_v0  ;;  %5149 = vmatprep.subr.mxu1 %v7470_v16 }
 0x974   :  { %2916 = vmatpush1.msra.mxu0 %v6591_v61  ;;  %5150 = vmatpush3.msra.mxu1 %v6700_v53 }
 0x975   :  { %2917 = vmatprep.subr.mxu0 %v6594_v56  ;;  %5151 = vmatprep.subr.mxu1 %v7470_v16 }
 0x976   :  { %2918 = vmatpush1.msra.mxu0 %v6597_v63  ;;  %5152 = vmatpush3.msra.mxu1 %v6707_v13 }
 0x977   :  { %2919 = vmatprep.subr.mxu0 %v6600_v57  ;;  %5153 = vmatprep.subr.mxu1 %v7470_v16 }
 0x978   :  { %2920 = vmatpush1.msra.mxu0 %v6603_v9  ;;  %5154 = vmatpush3.msra.mxu1 %v6712_v54 }
 0x979   :  { %2921 = vmatprep.subr.mxu0 %v6606_v58  ;;  %5155 = vmatprep.subr.mxu1 %v7470_v16 }
 0x97a   :  { %2922 = vmatpush1.msra.mxu0 %v6609_v60  ;;  %5156 = vmatpush3.msra.mxu1 %v6718_v59 }
 0x97b   :  { %2923 = vmatprep.subr.mxu0 %v6612_v3  ;;  %5157 = vmatprep.subr.mxu1 %v7470_v16 }
 0x97c   :  { %2924 = vmatpush1.msra.mxu0 %v6615_v4  ;;  %5158 = vmatpush3.msra.mxu1 %v6724_v46 }
 0x97d   :  { %2925 = vmatprep.subr.mxu0 %v6618_v6  ;;  %5159 = vmatprep.subr.mxu1 %v7470_v16 }
 0x97e   :  { %2926 = vmatpush1.msra.mxu0 %v6621_v7  ;;  %5160 = vmatpush3.msra.mxu1 %v6730_v23 }
 0x97f   :  { %2927 = vmatprep.subr.mxu0 %v6624_v10  ;;  %5161 = vmatprep.subr.mxu1 %v7470_v16 }
 0x980   :  { %2928 = vmatpush1.msra.mxu0 %v6627_v15  ;;  %5162 = vmatpush3.msra.mxu1 %v6736_v2 }
 0x981   :  { %2929 = vmatprep.subr.mxu0 %v6630_v19  ;;  %5163 = vmatprep.subr.mxu1 %v7470_v16 }
 0x982   :  { %2930 = vmatpush1.msra.mxu0 %v6633_v20  ;;  %5164 = vmatpush3.msra.mxu1 %v6742_v5 }
 0x983   :  { %2931 = vmatprep.subr.mxu0 %v6636_v24  ;;  %5165 = vmatprep.subr.mxu1 %v7470_v16 }
 0x984   :  { %2932 = vmatpush1.msra.mxu0 %v6638_v25  ;;  %5166 = vmatpush3.msra.mxu1 %v6748_v8 }
 0x985   :  { %2933 = vmatprep.subr.mxu0 %v6641_v47  ;;  %5167 = vmatprep.subr.mxu1 %v7470_v16 }
 0x986   :  { %2934 = vmatpush1.msra.mxu0 %v6643_v26  ;;  %5168 = vmatpush3.msra.mxu1 %v6754_v17 }
 0x987   :  { %2935 = vmatprep.subr.mxu0 %v6646_v28  ;;  %5169 = vmatprep.subr.mxu1 %v7470_v16 }
 0x988   :  { %2936 = vmatpush1.msra.mxu0 %v6649_v1  ;;  %5170 = vmatpush3.msra.mxu1 %v6760_v22 }
 0x989   :  { %2937 = vmatprep.subr.mxu0 %v6652_v39  ;;  %5171 = vmatprep.subr.mxu1 %v7470_v16 }
 0x98a   :  { %2938 = vmatpush1.msra.mxu0 %v6655_v29  ;;  %5172 = vmatpush3.msra.mxu1 %v6766_v43 }
 0x98b   :  { %2939 = vmatprep.subr.mxu0 %v6660_v42  ;;  %5173 = vmatprep.subr.mxu1 %v7470_v16 }
 0x98c   :  { %2940 = vmatpush1.msra.mxu0 %v6662_v44  ;;  %5174 = vmatpush3.msra.mxu1 %v6772_v27 }
 0x98d   :  { %2941 = vmatprep.subr.mxu0 %v7509_v55  ;;  %5175 = vmatprep.subr.mxu1 %v7470_v16 }
 0x98e   :  { %2942 = vmatpush1.msra.mxu0 %v7510_v31  ;;  %2975 = vmatprep.mubr.f32.mxu0 %v7470_v16 }
 0x98f   :  { %5176 = vmatpush3.msra.mxu1 %v7511_v21  ;;  %5177 = vmatprep.mubr.msk.f32.mxu1 %vm5677_vm1, %v7470_v16 }
 0x990   :  { %3150 = vmatprep.subr.mxu0 %v7512_v40  ;;  %5180 = vmatprep.subr.mxu1 %v7470_v16 }
 0xa2f   :  { %v2738_v35 = vpop.f32.mrf.mxu0  ;;  %v2809_v33 = vpop.f32.mrf.mxu1 }
 0xa30   :  { %v2814_v34 = vrot.slane %v2738_v35, 6  ;;  %v2840_v40 = vadd.f32 %v6837_v14, %v2809_v33  ;;  %v2623_v35 = vld [vmem:[#allocation2 + $0x8] sm:$0xc]  ;;  %v7028_v33 = vld [vmem:[#allocation9 + $0x110] sm:$0xff] }
 0xa31   :  { %v5144_v38 = vpop.f32.mrf.mxu1  ;;  %v2740_v41 = vpop.f32.mrf.mxu0 }
 0xa32   :  { %v2816_v36 = vadd.f32 %v2814_v34, %v2621_v62  ;;  %v2824_v48 = vrot.slane %v2740_v41, 6  ;;  %v2842_v31 = vrot.slane %v2840_v40, 6  ;;  %v7038_v40 = vld [vmem:[#allocation9 + $0xf8] sm:$0xff] }
 0xa34   :  { %v4419_v37 = vmul.f32 -1.442695, %v2816_v36  ;;  %v2826_v30 = vadd.f32 %v2824_v48, %v2622_v32 }
 0xa36   :  { %5491 = vpow2.f32 %v4419_v37  ;;  %v4420_v21 = vmul.f32 -1.442695, %v2826_v30 }
 0xa43   :  { %v5492_v49 = vpop.eup %5491 }
 0xa44   :  { %v2820_v51 = vadd.f32 1.0, %v5492_v49  ;;  %v7032_v49 = vld [vmem:[#allocation9 + $0x108] sm:$0xff] }
 0xa46   :  { %5493 = vrcp.f32 %v2820_v51  ;;  %v7034_v51 = vld [vmem:[#allocation9 + $0x118] sm:$0xff] }
 0xa47   :  { %5495 = vpow2.f32 %v4420_v21 }
 0xa53   :  { %v5494_v55 = vpop.eup %5493 }
 0xa54   :  { %v2844_v27 = vmul.f32 %v5494_v55, %v2842_v31  ;;  %v5496_v38 = vpop.eup %5495  ;;  %v7024_v55 = vld [vmem:[#allocation9 + $0x120] sm:$0xff]  ;;  %v7026_v31 = vld [vmem:[#allocation9 + $0x130] sm:$0xff] }
 0xa55   :  { %v2830_v34 = vadd.f32 1.0, %v5496_v38  ;;  %v7044_v38 = vld [vmem:[#allocation9 + $0x100] sm:$0xff] }
 0xa56   :  { %v2845_v44 = vadd.f32 %v2844_v27, %v2623_v35  ;;  %v7018_v27 = vld [vmem:[#allocation9 + $0x148] sm:$0xff]  ;;  %v7042_v35 = vld [vmem:[#allocation9 + $0xf0] sm:$0xff] }
 0xa58   :  { %5497 = vtanh.f32 %v2845_v44 }
 0xa59   :  { %5499 = vrcp.f32 %v2830_v34  ;;  %v7048_v34 = vld [vmem:[#allocation9 + $0xe0] sm:$0xff] }
 0xa65   :  { %v5498_v62 = vpop.eup %5497 }
 0xa66   :  { %v2848_v36 = vrot.slane %v5498_v62, 2  ;;  %v5500_v48 = vpop.eup %5499 }
 0xa68   :  { %v2850_v37 = vsub.f32 %v6840_v12, %v2848_v36  ;;  %v7020_v12 = vld [vmem:[#allocation9 + $0x128] sm:$0xff] }
 0xa69   :  { %v7054_v36 = vld [vmem:[#allocation9 + $0xe8] sm:$0xff] }
 0xa6a   :  { %v2852_v41 = vrot.slane %v2850_v37, 6  ;;  %v7058_v37 = vld [vmem:[#allocation9 + $0xc8] sm:$0xff] }
 0xa6c   :  { %v2854_v32 = vmul.f32 %v5500_v48, %v2852_v41  ;;  %v7062_v41 = vld [vmem:[#allocation9 + $0xc0] sm:$0xff]  ;;  %v7064_v48 = vld [vmem:[#allocation9 + $0xd0] sm:$0xff] }
 0xa6e   :  { %v6914_v30 = vadd.f32 %v5498_v62, %v2854_v32  ;;  %v7052_v62 = vld [vmem:[#allocation9 + $0xd8] sm:$0xff]  ;;  %v7068_v32 = vld [vmem:[#allocation9 + $0xb0] sm:$0xff] }
 0xa70   :  { %2856 = vst [vmem:[#allocation3] sm:$0xc] %v6914_v30  ;;  %v2909_v21 = vrot.slane %v6914_v30, 2 }
 0xa72   :  { %2976 = vmatmul.mubr.f32.vlgmr.msra.gmra.mxu0 %v2909_v21  ;;  %5178 = vmatmul.mubr.f32.vlgmr.msra.gmra.mxu1 %v2909_v21  ;;  %v7074_v21 = vld [vmem:[#allocation9 + $0xb8] sm:$0xff] }
 0xa73   :  { %3151 = vmatpush1.msra.mxu0 %v6579_v18  ;;  %5181 = vmatpush3.msra.mxu1 %v6693_v50  ;;  %v7513_v18 = vld [vmem:[#allocation16_spill] sm:$0xff] }
 0xa74   :  { %3152 = vmatprep.subr.mxu0 %v6582_v45  ;;  %5182 = vmatprep.subr.mxu1 %v7470_v16  ;;  %v7514_v45 = vld [vmem:[#allocation18_spill] sm:$0xff] }
 0xa75   :  { %3153 = vmatpush1.msra.mxu0 %v6585_v11  ;;  %5183 = vmatpush3.msra.mxu1 %v6695_v52  ;;  %v7515_v11 = vld [vmem:[#allocation19_spill] sm:$0xff] }
 0xa76   :  { %3154 = vmatprep.subr.mxu0 %v6588_v0  ;;  %5184 = vmatprep.subr.mxu1 %v7470_v16  ;;  %v7516_v0 = vld [vmem:[#allocation17_spill] sm:$0xff] }
 0xa77   :  { %3155 = vmatpush1.msra.mxu0 %v6591_v61  ;;  %5185 = vmatpush3.msra.mxu1 %v6700_v53  ;;  %v7517_v61 = vld [vmem:[#allocation20_spill] sm:$0xff] }
 0xa78   :  { %3156 = vmatprep.subr.mxu0 %v6594_v56  ;;  %5186 = vmatprep.subr.mxu1 %v7470_v16 }
 0xa79   :  { %3157 = vmatpush1.msra.mxu0 %v6597_v63  ;;  %5187 = vmatpush3.msra.mxu1 %v6707_v13 }
 0xa7a   :  { %3158 = vmatprep.subr.mxu0 %v6600_v57  ;;  %5188 = vmatprep.subr.mxu1 %v7470_v16 }
 0xa7b   :  { %3159 = vmatpush1.msra.mxu0 %v6603_v9  ;;  %5189 = vmatpush3.msra.mxu1 %v6712_v54  ;;  %v2857_v9 = vld [vmem:[#allocation2 + $0x28] sm:$0x30] }
 0xa7c   :  { %3160 = vmatprep.subr.mxu0 %v6606_v58  ;;  %5190 = vmatprep.subr.mxu1 %v7470_v16 }
 0xa7d   :  { %3161 = vmatpush1.msra.mxu0 %v6609_v60  ;;  %5191 = vmatpush3.msra.mxu1 %v6718_v59 }
 0xa7e   :  { %3162 = vmatprep.subr.mxu0 %v6612_v3  ;;  %5192 = vmatprep.subr.mxu1 %v7470_v16 }
 0xa7f   :  { %3163 = vmatpush1.msra.mxu0 %v6615_v4  ;;  %5193 = vmatpush3.msra.mxu1 %v6724_v46  ;;  %v6993_v46 = vld [vmem:[#allocation9 + $0x170] sm:$0xff] }
 0xa80   :  { %3164 = vmatprep.subr.mxu0 %v6618_v6  ;;  %5194 = vmatprep.subr.mxu1 %v7470_v16  ;;  %7518 = vst [vmem:[#allocation21_spill] sm:$0xff] %v6993_v46 }
 0xa81   :  { %3165 = vmatpush1.msra.mxu0 %v6621_v7  ;;  %5195 = vmatpush3.msra.mxu1 %v6730_v23  ;;  %v2858_v7 = vld [vmem:[#allocation2 + $0x10] sm:$0x30]  ;;  %v6996_v23 = vld [vmem:[#allocation9 + $0x168] sm:$0xff] }
 0xa82   :  { %3166 = vmatprep.subr.mxu0 %v6624_v10  ;;  %5196 = vmatprep.subr.mxu1 %v7470_v16 }
 0xa83   :  { %3167 = vmatpush1.msra.mxu0 %v6627_v15  ;;  %5197 = vmatpush3.msra.mxu1 %v6736_v2  ;;  %v6998_v2 = vld [vmem:[#allocation9 + $0x178] sm:$0xff] }
 0xa84   :  { %3168 = vmatprep.subr.mxu0 %v6630_v19  ;;  %5198 = vmatprep.subr.mxu1 %v7470_v16 }
 0xa85   :  { %3169 = vmatpush1.msra.mxu0 %v6633_v20  ;;  %5199 = vmatpush3.msra.mxu1 %v6742_v5  ;;  %v7002_v5 = vld [vmem:[#allocation9 + $0x158] sm:$0xff] }
 0xa86   :  { %3170 = vmatprep.subr.mxu0 %v6636_v24  ;;  %5200 = vmatprep.subr.mxu1 %v7470_v16 }
 0xa87   :  { %3171 = vmatpush1.msra.mxu0 %v6638_v25  ;;  %5201 = vmatpush3.msra.mxu1 %v6748_v8  ;;  %v7006_v8 = vld [vmem:[#allocation9 + $0x150] sm:$0xff] }
 0xa88   :  { %3172 = vmatprep.subr.mxu0 %v6641_v47  ;;  %5202 = vmatprep.subr.mxu1 %v7470_v16 }
 0xa89   :  { %3173 = vmatpush1.msra.mxu0 %v6643_v26  ;;  %5203 = vmatpush3.msra.mxu1 %v6754_v17  ;;  %v7008_v17 = vld [vmem:[#allocation9 + $0x160] sm:$0xff] }
 0xa8a   :  { %3174 = vmatprep.subr.mxu0 %v6646_v28  ;;  %5204 = vmatprep.subr.mxu1 %v7470_v16  ;;  %v2859_v28 = vld [vmem:[#allocation2 + $0x8] sm:$0x30] }
 0xa8b   :  { %3175 = vmatpush1.msra.mxu0 %v6649_v1  ;;  %5205 = vmatpush3.msra.mxu1 %v6760_v22  ;;  %v7012_v22 = vld [vmem:[#allocation9 + $0x140] sm:$0xff] }
 0xa8c   :  { %3176 = vmatprep.subr.mxu0 %v6652_v39  ;;  %5206 = vmatprep.subr.mxu1 %v7470_v16 }
 0xa8d   :  { %3177 = vmatpush1.msra.mxu0 %v6655_v29  ;;  %5207 = vmatpush3.msra.mxu1 %v6766_v43  ;;  %v7016_v43 = vld [vmem:[#allocation9 + $0x138] sm:$0xff] }
 0xa8e   :  { %3178 = vmatprep.subr.mxu0 %v6660_v42  ;;  %5208 = vmatprep.subr.mxu1 %v7470_v16 }
 0xa8f   :  { %3179 = vmatpush1.msra.mxu0 %v7513_v18  ;;  %5209 = vmatpush3.msra.mxu1 %v7514_v45  ;;  %v7078_v18 = vld [vmem:[#allocation9 + $0x98] sm:$0xff]  ;;  %v7082_v45 = vld [vmem:[#allocation9 + $0x90] sm:$0xff] }
 0xa90   :  { %3180 = vmatprep.subr.mxu0 %v7515_v11  ;;  %5210 = vmatprep.subr.mxu1 %v7470_v16  ;;  %v7084_v11 = vld [vmem:[#allocation9 + $0xa0] sm:$0xff] }
 0xa91   :  { %3181 = vmatpush1.msra.mxu0 %v7516_v0  ;;  %3214 = vmatprep.mubr.f32.mxu0 %v7470_v16  ;;  %v7088_v0 = vld [vmem:[#allocation9 + $0x80] sm:$0xff] }
 0xa92   :  { %5211 = vmatpush3.msra.mxu1 %v7517_v61  ;;  %5212 = vmatprep.mubr.msk.f32.mxu1 %vm5677_vm1, %v7470_v16  ;;  %v7092_v61 = vld [vmem:[#allocation9 + $0x78] sm:$0xff] }
 0xa93   :  { %5215 = vmatprep.subr.mxu1 %v7470_v16  ;;  %3389 = vmatprep.subr.mxu0 %v6993_v46 }
 0xb32   :  { %v2977_v56 = vpop.f32.mrf.mxu0  ;;  %v3048_v63 = vpop.f32.mrf.mxu1 }
 0xb33   :  { %v3053_v57 = vrot.slane %v2977_v56, 4  ;;  %v3079_v24 = vadd.f32 %v6837_v14, %v3048_v63  ;;  %v7094_v56 = vld [vmem:[#allocation9 + $0x88] sm:$0xff] }
 0xb34   :  { %v5179_v58 = vpop.f32.mrf.mxu1  ;;  %v2979_v4 = vpop.f32.mrf.mxu0  ;;  %v7098_v63 = vld [vmem:[#allocation9 + $0x68] sm:$0xff] }
 0xb35   :  { %v3055_v60 = vadd.f32 %v3053_v57, %v2857_v9  ;;  %v3063_v6 = vrot.slane %v2979_v4, 4  ;;  %v3081_v25 = vrot.slane %v3079_v24, 4  ;;  %v7102_v57 = vld [vmem:[#allocation9 + $0x60] sm:$0xff]  ;;  %v7104_v9 = vld [vmem:[#allocation9 + $0x70] sm:$0xff]  ;;  %v7118_v4 = vld [vmem:[#allocation9 + $0x38] sm:$0xff] }
 0xb36   :  { %v7108_v58 = vld [vmem:[#allocation9 + $0x50] sm:$0xff]  ;;  %v7142_v24 = vld [vmem:[#allocation9] sm:$0xff] }
 0xb37   :  { %v4422_v3 = vmul.f32 -1.442695, %v3055_v60  ;;  %v3065_v10 = vadd.f32 %v3063_v6, %v2858_v7  ;;  %v7112_v60 = vld [vmem:[#allocation9 + $0x48] sm:$0xff]  ;;  %v7122_v6 = vld [vmem:[#allocation9 + $0x30] sm:$0xff]  ;;  %v7124_v7 = vld [vmem:[#allocation9 + $0x40] sm:$0xff]  ;;  %7522 = vst [vmem:[#allocation19_spill] sm:$0xff] %v7142_v24 }
 0xb39   :  { %5501 = vpow2.f32 %v4422_v3  ;;  %v4423_v20 = vmul.f32 -1.442695, %v3065_v10  ;;  %v7114_v3 = vld [vmem:[#allocation9 + $0x58] sm:$0xff]  ;;  %v7128_v10 = vld [vmem:[#allocation9 + $0x20] sm:$0xff] }
 0xb46   :  { %v5502_v15 = vpop.eup %5501 }
 0xb47   :  { %v3059_v19 = vadd.f32 1.0, %v5502_v15  ;;  %v7132_v15 = vld [vmem:[#allocation9 + $0x18] sm:$0xff] }
 0xb48   :  { %7519 = vst [vmem:[#allocation15_spill] sm:$0xff] %v7132_v15 }
 0xb49   :  { %5503 = vrcp.f32 %v3059_v19  ;;  %v7134_v19 = vld [vmem:[#allocation9 + $0x28] sm:$0xff] }
 0xb4a   :  { %5505 = vpow2.f32 %v4423_v20  ;;  %7520 = vst [vmem:[#allocation16_spill] sm:$0xff] %v7134_v19  ;;  %v7138_v20 = vld [vmem:[#allocation9 + $0x8] sm:$0xff] }
 0xb4b   :  { %7521 = vst [vmem:[#allocation18_spill] sm:$0xff] %v7138_v20 }
 0xb56   :  { %v5504_v47 = vpop.eup %5503 }
 0xb57   :  { %v3083_v26 = vmul.f32 %v5504_v47, %v3081_v25  ;;  %v5506_v39 = vpop.eup %5505  ;;  %v7144_v25 = vld [vmem:[#allocation9 + $0x10] sm:$0xff] }
 0xb58   :  { %v3069_v29 = vadd.f32 1.0, %v5506_v39  ;;  %7523 = vst [vmem:[#allocation17_spill] sm:$0xff] %v7144_v25 }
 0xb59   :  { %v3084_v1 = vadd.f32 %v3083_v26, %v2859_v28 }
 0xb5b   :  { %5507 = vtanh.f32 %v3084_v1  ;;  %v3096_v1 = vld [vmem:[#allocation2 + $0x28] sm:$0xc0] }
 0xb5c   :  { %5509 = vrcp.f32 %v3069_v29 }
 0xb68   :  { %v5508_v42 = vpop.eup %5507 }
 0xb69   :  { %v3087_v44 = vrot.slane %v5508_v42, 2  ;;  %v5510_v53 = vpop.eup %5509 }
 0xb6b   :  { %v3089_v50 = vsub.f32 %v6914_v30, %v3087_v44  ;;  %v7072_v30 = vld [vmem:[#allocation9 + $0xa8] sm:$0xff] }
 0xb6d   :  { %v3091_v52 = vrot.slane %v3089_v50, 6 }
 0xb6f   :  { %v3093_v13 = vmul.f32 %v5510_v53, %v3091_v52  ;;  %v3097_v52 = vld [vmem:[#allocation2 + $0x10] sm:$0xc0] }
 0xb71   :  { %v6986_v54 = vadd.f32 %v5508_v42, %v3093_v13 }
 0xb73   :  { %3095 = vst [vmem:[#allocation3] sm:$0x30] %v6986_v54  ;;  %v3148_v59 = vrot.slane %v6986_v54, 4 }
 0xb75   :  { %3215 = vmatmul.mubr.f32.vlgmr.msra.gmra.mxu0 %v3148_v59  ;;  %5213 = vmatmul.mubr.f32.vlgmr.msra.gmra.mxu1 %v3148_v59 }
 0xb76   :  { %3453 = vmatprep.mubr.f32.mxu0 %v7470_v16  ;;  %5247 = vmatprep.mubr.msk.f32.mxu1 %vm5677_vm1, %v7470_v16 }
 0xb77   :  { %3390 = vmatpush1.msra.mxu0 %v6996_v23  ;;  %5216 = vmatpush3.msra.mxu1 %v6998_v2 }
 0xb78   :  { %3391 = vmatprep.subr.mxu0 %v7002_v5  ;;  %5217 = vmatprep.subr.mxu1 %v7470_v16 }
 0xb79   :  { %3392 = vmatpush1.msra.mxu0 %v7006_v8  ;;  %5218 = vmatpush3.msra.mxu1 %v7008_v17 }
 0xb7a   :  { %3393 = vmatprep.subr.mxu0 %v7012_v22  ;;  %5219 = vmatprep.subr.mxu1 %v7470_v16 }
 0xb7b   :  { %3394 = vmatpush1.msra.mxu0 %v7016_v43  ;;  %5220 = vmatpush3.msra.mxu1 %v7018_v27 }
 0xb7c   :  { %3395 = vmatprep.subr.mxu0 %v7020_v12  ;;  %5221 = vmatprep.subr.mxu1 %v7470_v16 }
 0xb7d   :  { %3396 = vmatpush1.msra.mxu0 %v7024_v55  ;;  %5222 = vmatpush3.msra.mxu1 %v7026_v31 }
 0xb7e   :  { %3397 = vmatprep.subr.mxu0 %v7028_v33  ;;  %5223 = vmatprep.subr.mxu1 %v7470_v16 }
 0xb7f   :  { %3398 = vmatpush1.msra.mxu0 %v7032_v49  ;;  %5224 = vmatpush3.msra.mxu1 %v7034_v51 }
 0xb80   :  { %3399 = vmatprep.subr.mxu0 %v7038_v40  ;;  %5225 = vmatprep.subr.mxu1 %v7470_v16 }
 0xb81   :  { %3400 = vmatpush1.msra.mxu0 %v7042_v35  ;;  %5226 = vmatpush3.msra.mxu1 %v7044_v38 }
 0xb82   :  { %3401 = vmatprep.subr.mxu0 %v7048_v34  ;;  %5227 = vmatprep.subr.mxu1 %v7470_v16 }
 0xb83   :  { %3402 = vmatpush1.msra.mxu0 %v7052_v62  ;;  %5228 = vmatpush3.msra.mxu1 %v7054_v36 }
 0xb84   :  { %3403 = vmatprep.subr.mxu0 %v7058_v37  ;;  %5229 = vmatprep.subr.mxu1 %v7470_v16 }
 0xb85   :  { %3404 = vmatpush1.msra.mxu0 %v7062_v41  ;;  %5230 = vmatpush3.msra.mxu1 %v7064_v48 }
 0xb86   :  { %3405 = vmatprep.subr.mxu0 %v7068_v32  ;;  %5231 = vmatprep.subr.mxu1 %v7470_v16 }
 0xb87   :  { %3406 = vmatpush1.msra.mxu0 %v7072_v30  ;;  %5232 = vmatpush3.msra.mxu1 %v7074_v21 }
 0xb88   :  { %3407 = vmatprep.subr.mxu0 %v7078_v18  ;;  %5233 = vmatprep.subr.mxu1 %v7470_v16 }
 0xb89   :  { %3408 = vmatpush1.msra.mxu0 %v7082_v45  ;;  %5234 = vmatpush3.msra.mxu1 %v7084_v11 }
 0xb8a   :  { %3409 = vmatprep.subr.mxu0 %v7088_v0  ;;  %5235 = vmatprep.subr.mxu1 %v7470_v16 }
 0xb8b   :  { %3410 = vmatpush1.msra.mxu0 %v7092_v61  ;;  %5236 = vmatpush3.msra.mxu1 %v7094_v56 }
 0xb8c   :  { %3411 = vmatprep.subr.mxu0 %v7098_v63  ;;  %5237 = vmatprep.subr.mxu1 %v7470_v16 }
 0xb8d   :  { %3412 = vmatpush1.msra.mxu0 %v7102_v57  ;;  %5238 = vmatpush3.msra.mxu1 %v7104_v9 }
 0xb8e   :  { %3413 = vmatprep.subr.mxu0 %v7108_v58  ;;  %5239 = vmatprep.subr.mxu1 %v7470_v16 }
 0xb8f   :  { %3414 = vmatpush1.msra.mxu0 %v7112_v60  ;;  %5240 = vmatpush3.msra.mxu1 %v7114_v3 }
 0xb90   :  { %3415 = vmatprep.subr.mxu0 %v7118_v4  ;;  %5241 = vmatprep.subr.mxu1 %v7470_v16 }
 0xb91   :  { %3416 = vmatpush1.msra.mxu0 %v7122_v6  ;;  %5242 = vmatpush3.msra.mxu1 %v7124_v7 }
 0xb92   :  { %3417 = vmatprep.subr.mxu0 %v7128_v10  ;;  %5243 = vmatprep.subr.mxu1 %v7470_v16 }
 0xb93   :  { %3418 = vmatpush1.msra.mxu0 %v7132_v15  ;;  %5244 = vmatpush3.msra.mxu1 %v7134_v19 }
 0xb94   :  { %3419 = vmatprep.subr.mxu0 %v7138_v20  ;;  %5245 = vmatprep.subr.mxu1 %v7470_v16 }
 0xb95   :  { %3420 = vmatpush1.msra.mxu0 %v7142_v24  ;;  %5246 = vmatpush3.msra.mxu1 %v7144_v25 }
 0xb96   :  { %3616 = vmatprep.subr.mxu0 %v6993_v46  ;;  %5250 = vmatprep.subr.mxu1 %v7470_v16 }
 0xc35   :  { %v3216_v47 = vpop.f32.mrf.mxu0  ;;  %v3287_v26 = vpop.f32.mrf.mxu1 }
 0xc36   :  { %v3292_v28 = vrot.slane %v3216_v47, 2  ;;  %v3318_v46 = vadd.f32 %v6837_v14, %v3287_v26  ;;  %v3098_v47 = vld [vmem:[#allocation2 + $0x8] sm:$0xc0] }
 0xc37   :  { %v5214_v39 = vpop.f32.mrf.mxu1  ;;  %v3218_v44 = vpop.f32.mrf.mxu0 }
 0xc38   :  { %v3294_v29 = vadd.f32 %v3292_v28, %v3096_v1  ;;  %v3302_v50 = vrot.slane %v3218_v44, 2  ;;  %v3320_v24 = vrot.slane %v3318_v46, 2  ;;  %v7525_v46 = vld [vmem:[#allocation16_spill] sm:$0xff] }
 0xc3a   :  { %v4425_v42 = vmul.f32 -1.442695, %v3294_v29  ;;  %v3304_v53 = vadd.f32 %v3302_v50, %v3097_v52 }
 0xc3c   :  { %5511 = vpow2.f32 %v4425_v42  ;;  %v4426_v25 = vmul.f32 -1.442695, %v3304_v53 }
 0xc49   :  { %v5512_v13 = vpop.eup %5511 }
 0xc4a   :  { %v3298_v59 = vadd.f32 1.0, %v5512_v13 }
 0xc4c   :  { %5513 = vrcp.f32 %v3298_v59 }
 0xc4d   :  { %5515 = vpow2.f32 %v4426_v25  ;;  %v3335_v25 = vld [vmem:[#allocation2] sm:$0x3] }
 0xc59   :  { %v5514_v20 = vpop.eup %5513 }
 0xc5a   :  { %v3322_v19 = vmul.f32 %v5514_v20, %v3320_v24  ;;  %v5516_v39 = vpop.eup %5515  ;;  %v7528_v20 = vld [vmem:[#allocation17_spill] sm:$0xff] }
 0xc5b   :  { %v3308_v28 = vadd.f32 1.0, %v5516_v39  ;;  %v7529_v24 = vld [vmem:[#allocation21_spill] sm:$0xff] }
 0xc5c   :  { %v3323_v15 = vadd.f32 %v3322_v19, %v3098_v47  ;;  %v7527_v19 = vld [vmem:[#allocation19_spill] sm:$0xff] }
 0xc5e   :  { %5517 = vtanh.f32 %v3323_v15  ;;  %v7526_v15 = vld [vmem:[#allocation18_spill] sm:$0xff] }
 0xc5f   :  { %5519 = vrcp.f32 %v3308_v28 }
 0xc6b   :  { %v5518_v1 = vpop.eup %5517 }
 0xc6c   :  { %v3326_v29 = vrot.slane %v5518_v1, 2  ;;  %v5520_v50 = vpop.eup %5519 }
 0xc6e   :  { %v3328_v42 = vsub.f32 %v6986_v54, %v3326_v29  ;;  %v7524_v54 = vld [vmem:[#allocation15_spill] sm:$0xff] }
 0xc70   :  { %v3330_v44 = vrot.slane %v3328_v42, 6 }
 0xc72   :  { %v3332_v52 = vmul.f32 %v5520_v50, %v3330_v44 }
 0xc74   :  { %v7156_v53 = vadd.f32 %v5518_v1, %v3332_v52  ;;  %v3336_v1 = vld [vmem:[#allocation2 + $0x18] sm:$0x3]  ;;  %v7230_v52 = vld [vmem:[%s7402_s8] ss:$0 sm:$0xff] }
 0xc76   :  { %3334 = vst [vmem:[#allocation3] sm:$0xc0] %v7156_v53  ;;  %v3387_v14 = vrot.slane %v7156_v53, 6 }
 0xc78   :  { %3454 = vmatmul.mubr.f32.vlgmr.msra.gmra.mxu0 %v3387_v14  ;;  %5248 = vmatmul.mubr.f32.vlgmr.msra.gmra.mxu1 %v3387_v14 }
 0xc79   :  { %3617 = vmatpush1.msra.mxu0 %v6996_v23  ;;  %5251 = vmatpush3.msra.mxu1 %v6998_v2 }
 0xc7a   :  { %3618 = vmatprep.subr.mxu0 %v7002_v5  ;;  %5252 = vmatprep.subr.mxu1 %v7470_v16 }
 0xc7b   :  { %3619 = vmatpush1.msra.mxu0 %v7006_v8  ;;  %5253 = vmatpush3.msra.mxu1 %v7008_v17 }
 0xc7c   :  { %3620 = vmatprep.subr.mxu0 %v7012_v22  ;;  %5254 = vmatprep.subr.mxu1 %v7470_v16 }
 0xc7d   :  { %3621 = vmatpush1.msra.mxu0 %v7016_v43  ;;  %5255 = vmatpush3.msra.mxu1 %v7018_v27 }
 0xc7e   :  { %3622 = vmatprep.subr.mxu0 %v7020_v12  ;;  %5256 = vmatprep.subr.mxu1 %v7470_v16 }
 0xc7f   :  { %3623 = vmatpush1.msra.mxu0 %v7024_v55  ;;  %5257 = vmatpush3.msra.mxu1 %v7026_v31 }
 0xc80   :  { %3624 = vmatprep.subr.mxu0 %v7028_v33  ;;  %5258 = vmatprep.subr.mxu1 %v7470_v16 }
 0xc81   :  { %3625 = vmatpush1.msra.mxu0 %v7032_v49  ;;  %5259 = vmatpush3.msra.mxu1 %v7034_v51 }
 0xc82   :  { %3626 = vmatprep.subr.mxu0 %v7038_v40  ;;  %5260 = vmatprep.subr.mxu1 %v7470_v16 }
 0xc83   :  { %3627 = vmatpush1.msra.mxu0 %v7042_v35  ;;  %5261 = vmatpush3.msra.mxu1 %v7044_v38 }
 0xc84   :  { %3628 = vmatprep.subr.mxu0 %v7048_v34  ;;  %5262 = vmatprep.subr.mxu1 %v7470_v16 }
 0xc85   :  { %3629 = vmatpush1.msra.mxu0 %v7052_v62  ;;  %5263 = vmatpush3.msra.mxu1 %v7054_v36 }
 0xc86   :  { %3630 = vmatprep.subr.mxu0 %v7058_v37  ;;  %5264 = vmatprep.subr.mxu1 %v7470_v16 }
 0xc87   :  { %3631 = vmatpush1.msra.mxu0 %v7062_v41  ;;  %5265 = vmatpush3.msra.mxu1 %v7064_v48 }
 0xc88   :  { %3632 = vmatprep.subr.mxu0 %v7068_v32  ;;  %5266 = vmatprep.subr.mxu1 %v7470_v16 }
 0xc89   :  { %3633 = vmatpush1.msra.mxu0 %v7072_v30  ;;  %5267 = vmatpush3.msra.mxu1 %v7074_v21 }
 0xc8a   :  { %3634 = vmatprep.subr.mxu0 %v7078_v18  ;;  %5268 = vmatprep.subr.mxu1 %v7470_v16 }
 0xc8b   :  { %3635 = vmatpush1.msra.mxu0 %v7082_v45  ;;  %5269 = vmatpush3.msra.mxu1 %v7084_v11 }
 0xc8c   :  { %3636 = vmatprep.subr.mxu0 %v7088_v0  ;;  %5270 = vmatprep.subr.mxu1 %v7470_v16 }
 0xc8d   :  { %3637 = vmatpush1.msra.mxu0 %v7092_v61  ;;  %5271 = vmatpush3.msra.mxu1 %v7094_v56 }
 0xc8e   :  { %3638 = vmatprep.subr.mxu0 %v7098_v63  ;;  %5272 = vmatprep.subr.mxu1 %v7470_v16 }
 0xc8f   :  { %3639 = vmatpush1.msra.mxu0 %v7102_v57  ;;  %5273 = vmatpush3.msra.mxu1 %v7104_v9 }
 0xc90   :  { %3640 = vmatprep.subr.mxu0 %v7108_v58  ;;  %5274 = vmatprep.subr.mxu1 %v7470_v16 }
 0xc91   :  { %3641 = vmatpush1.msra.mxu0 %v7112_v60  ;;  %5275 = vmatpush3.msra.mxu1 %v7114_v3 }
 0xc92   :  { %3642 = vmatprep.subr.mxu0 %v7118_v4  ;;  %5276 = vmatprep.subr.mxu1 %v7470_v16 }
 0xc93   :  { %3643 = vmatpush1.msra.mxu0 %v7122_v6  ;;  %5277 = vmatpush3.msra.mxu1 %v7124_v7 }
 0xc94   :  { %3644 = vmatprep.subr.mxu0 %v7128_v10  ;;  %5278 = vmatprep.subr.mxu1 %v7470_v16 }
 0xc95   :  { %3645 = vmatpush1.msra.mxu0 %v7524_v54  ;;  %5279 = vmatpush3.msra.mxu1 %v7525_v46 }
 0xc96   :  { %3646 = vmatprep.subr.mxu0 %v7526_v15  ;;  %5280 = vmatprep.subr.mxu1 %v7470_v16 }
 0xc97   :  { %3647 = vmatpush1.msra.mxu0 %v7527_v19  ;;  %3680 = vmatprep.mubr.f32.mxu0 %v7470_v16 }
 0xc98   :  { %5281 = vmatpush3.msra.mxu1 %v7528_v20  ;;  %5282 = vmatprep.mubr.msk.f32.mxu1 %vm5677_vm1, %v7470_v16 }
 0xc99   :  { %3855 = vmatprep.subr.mxu0 %v7529_v24  ;;  %5285 = vmatprep.subr.mxu1 %v7470_v16 }
 0xd38   :  { %v3455_v26 = vpop.f32.mrf.mxu0  ;;  %v3526_v13 = vpop.f32.mrf.mxu1 }
 0xd39   :  { %v3530_v59 = vadd.f32 %v3455_v26, %v3335_v25  ;;  %v3551_v14 = vadd.f32 %v7230_v52, %v3526_v13  ;;  %v3337_v26 = vld [vmem:[#allocation2 + $0x20] sm:$0x3] }
 0xd3a   :  { %v5249_v47 = vpop.f32.mrf.mxu1  ;;  %v3457_v28 = vpop.f32.mrf.mxu0 }
 0xd3b   :  { %v4428_v39 = vmul.f32 -1.442695, %v3530_v59  ;;  %v3537_v29 = vadd.f32 %v3457_v28, %v3336_v1 }
 0xd3d   :  { %5521 = vpow2.f32 %v4428_v39  ;;  %v4429_v50 = vmul.f32 -1.442695, %v3537_v29 }
 0xd4a   :  { %v5522_v42 = vpop.eup %5521 }
 0xd4b   :  { %v3534_v44 = vadd.f32 1.0, %v5522_v42 }
 0xd4d   :  { %5523 = vrcp.f32 %v3534_v44 }
 0xd4e   :  { %5525 = vpow2.f32 %v4429_v50 }
 0xd5a   :  { %v5524_v24 = vpop.eup %5523 }
 0xd5b   :  { %v3552_v25 = vmul.f32 %v5524_v24, %v3551_v14  ;;  %v5526_v47 = vpop.eup %5525  ;;  %v7531_v24 = vld [vmem:[#allocation21_spill] sm:$0xff] }
 0xd5c   :  { %v3541_v39 = vadd.f32 1.0, %v5526_v47 }
 0xd5d   :  { %v3553_v59 = vadd.f32 %v3552_v25, %v3337_v26  ;;  %v3565_v26 = vld [vmem:[#allocation2] sm:$0xc] }
 0xd5f   :  { %5527 = vtanh.f32 %v3553_v59 }
 0xd60   :  { %5529 = vrcp.f32 %v3541_v39 }
 0xd6c   :  { %v5528_v28 = vpop.eup %5527 }
 0xd6d   :  { %v3556_v1 = vrot.slane %v5528_v28, 2  ;;  %v5530_v44 = vpop.eup %5529 }
 0xd6f   :  { %v3558_v29 = vsub.f32 %v7156_v53, %v3556_v1  ;;  %v7530_v53 = vld [vmem:[#allocation17_spill] sm:$0xff] }
 0xd71   :  { %v3560_v42 = vrot.slane %v3558_v29, 6  ;;  %v3566_v29 = vld [vmem:[#allocation2 + $0x18] sm:$0xc] }
 0xd73   :  { %v3562_v50 = vmul.f32 %v5530_v44, %v3560_v42 }
 0xd75   :  { %v7234_v20 = vadd.f32 %v5528_v28, %v3562_v50 }
 0xd77   :  { %3564 = vst [vmem:[#allocation3 + $0x8] sm:$0x3] %v7234_v20  ;;  %3681 = vmatmul.mubr.f32.vlgmr.msra.gmra.mxu0 %v7234_v20  ;;  %5283 = vmatmul.mubr.f32.vlgmr.msra.gmra.mxu1 %v7234_v20 }
 0xd78   :  { %3856 = vmatpush1.msra.mxu0 %v6996_v23  ;;  %5286 = vmatpush3.msra.mxu1 %v6998_v2 }
 0xd79   :  { %3857 = vmatprep.subr.mxu0 %v7002_v5  ;;  %5287 = vmatprep.subr.mxu1 %v7470_v16 }
 0xd7a   :  { %3858 = vmatpush1.msra.mxu0 %v7006_v8  ;;  %5288 = vmatpush3.msra.mxu1 %v7008_v17 }
 0xd7b   :  { %3859 = vmatprep.subr.mxu0 %v7012_v22  ;;  %5289 = vmatprep.subr.mxu1 %v7470_v16 }
 0xd7c   :  { %3860 = vmatpush1.msra.mxu0 %v7016_v43  ;;  %5290 = vmatpush3.msra.mxu1 %v7018_v27 }
 0xd7d   :  { %3861 = vmatprep.subr.mxu0 %v7020_v12  ;;  %5291 = vmatprep.subr.mxu1 %v7470_v16 }
 0xd7e   :  { %3862 = vmatpush1.msra.mxu0 %v7024_v55  ;;  %5292 = vmatpush3.msra.mxu1 %v7026_v31 }
 0xd7f   :  { %3863 = vmatprep.subr.mxu0 %v7028_v33  ;;  %5293 = vmatprep.subr.mxu1 %v7470_v16 }
 0xd80   :  { %3864 = vmatpush1.msra.mxu0 %v7032_v49  ;;  %5294 = vmatpush3.msra.mxu1 %v7034_v51 }
 0xd81   :  { %3865 = vmatprep.subr.mxu0 %v7038_v40  ;;  %5295 = vmatprep.subr.mxu1 %v7470_v16 }
 0xd82   :  { %3866 = vmatpush1.msra.mxu0 %v7042_v35  ;;  %5296 = vmatpush3.msra.mxu1 %v7044_v38 }
 0xd83   :  { %3867 = vmatprep.subr.mxu0 %v7048_v34  ;;  %5297 = vmatprep.subr.mxu1 %v7470_v16 }
 0xd84   :  { %3868 = vmatpush1.msra.mxu0 %v7052_v62  ;;  %5298 = vmatpush3.msra.mxu1 %v7054_v36 }
 0xd85   :  { %3869 = vmatprep.subr.mxu0 %v7058_v37  ;;  %5299 = vmatprep.subr.mxu1 %v7470_v16 }
 0xd86   :  { %3870 = vmatpush1.msra.mxu0 %v7062_v41  ;;  %5300 = vmatpush3.msra.mxu1 %v7064_v48 }
 0xd87   :  { %3871 = vmatprep.subr.mxu0 %v7068_v32  ;;  %5301 = vmatprep.subr.mxu1 %v7470_v16 }
 0xd88   :  { %3872 = vmatpush1.msra.mxu0 %v7072_v30  ;;  %5302 = vmatpush3.msra.mxu1 %v7074_v21 }
 0xd89   :  { %3873 = vmatprep.subr.mxu0 %v7078_v18  ;;  %5303 = vmatprep.subr.mxu1 %v7470_v16 }
 0xd8a   :  { %3874 = vmatpush1.msra.mxu0 %v7082_v45  ;;  %5304 = vmatpush3.msra.mxu1 %v7084_v11 }
 0xd8b   :  { %3875 = vmatprep.subr.mxu0 %v7088_v0  ;;  %5305 = vmatprep.subr.mxu1 %v7470_v16 }
 0xd8c   :  { %3876 = vmatpush1.msra.mxu0 %v7092_v61  ;;  %5306 = vmatpush3.msra.mxu1 %v7094_v56 }
 0xd8d   :  { %3877 = vmatprep.subr.mxu0 %v7098_v63  ;;  %5307 = vmatprep.subr.mxu1 %v7470_v16 }
 0xd8e   :  { %3878 = vmatpush1.msra.mxu0 %v7102_v57  ;;  %5308 = vmatpush3.msra.mxu1 %v7104_v9 }
 0xd8f   :  { %3879 = vmatprep.subr.mxu0 %v7108_v58  ;;  %5309 = vmatprep.subr.mxu1 %v7470_v16 }
 0xd90   :  { %3880 = vmatpush1.msra.mxu0 %v7112_v60  ;;  %5310 = vmatpush3.msra.mxu1 %v7114_v3 }
 0xd91   :  { %3881 = vmatprep.subr.mxu0 %v7118_v4  ;;  %5311 = vmatprep.subr.mxu1 %v7470_v16 }
 0xd92   :  { %3882 = vmatpush1.msra.mxu0 %v7122_v6  ;;  %5312 = vmatpush3.msra.mxu1 %v7124_v7 }
 0xd93   :  { %3883 = vmatprep.subr.mxu0 %v7128_v10  ;;  %5313 = vmatprep.subr.mxu1 %v7470_v16 }
 0xd94   :  { %3884 = vmatpush1.msra.mxu0 %v7524_v54  ;;  %5314 = vmatpush3.msra.mxu1 %v7525_v46 }
 0xd95   :  { %3885 = vmatprep.subr.mxu0 %v7526_v15  ;;  %5315 = vmatprep.subr.mxu1 %v7470_v16 }
 0xd96   :  { %3886 = vmatpush1.msra.mxu0 %v7527_v19  ;;  %3919 = vmatprep.mubr.f32.mxu0 %v7470_v16 }
 0xd97   :  { %5316 = vmatpush3.msra.mxu1 %v7530_v53  ;;  %5317 = vmatprep.mubr.msk.f32.mxu1 %vm5677_vm1, %v7470_v16 }
 0xd98   :  { %4094 = vmatprep.subr.mxu0 %v7531_v24  ;;  %5320 = vmatprep.subr.mxu1 %v7470_v16 }
 0xe37   :  { %v3682_v13 = vpop.f32.mrf.mxu0  ;;  %v3753_v14 = vpop.f32.mrf.mxu1 }
 0xe38   :  { %v3758_v25 = vrot.slane %v3682_v13, 6  ;;  %v3784_v24 = vadd.f32 %v7230_v52, %v3753_v14  ;;  %v3567_v13 = vld [vmem:[#allocation2 + $0x20] sm:$0xc]  ;;  %v4284_v14 = vld [vmem:[#allocation11 + $0x18] sm:$0xff] }
 0xe39   :  { %v5284_v59 = vpop.f32.mrf.mxu1  ;;  %v3684_v28 = vpop.f32.mrf.mxu0 }
 0xe3a   :  { %v3760_v47 = vadd.f32 %v3758_v25, %v3565_v26  ;;  %v3768_v1 = vrot.slane %v3684_v28, 6  ;;  %v3786_v19 = vrot.slane %v3784_v24, 6  ;;  %v4281_v24 = vld [vmem:[#allocation11] sm:$0xff] }
 0xe3c   :  { %v4431_v39 = vmul.f32 -1.442695, %v3760_v47  ;;  %v3770_v42 = vadd.f32 %v3768_v1, %v3566_v29 }
 0xe3e   :  { %5531 = vpow2.f32 %v4431_v39  ;;  %v4432_v53 = vmul.f32 -1.442695, %v3770_v42 }
 0xe4b   :  { %v5532_v44 = vpop.eup %5531 }
 0xe4c   :  { %v3764_v50 = vadd.f32 1.0, %v5532_v44  ;;  %v4283_v44 = vld [vmem:[#allocation11 + $0x10] sm:$0xff] }
 0xe4e   :  { %5533 = vrcp.f32 %v3764_v50  ;;  %v4282_v50 = vld [vmem:[#allocation11 + $0x8] sm:$0xff] }
 0xe4f   :  { %5535 = vpow2.f32 %v4432_v53 }
 0xe5b   :  { %v5534_v15 = vpop.eup %5533 }
 0xe5c   :  { %v3788_v46 = vmul.f32 %v5534_v15, %v3786_v19  ;;  %v5536_v59 = vpop.eup %5535  ;;  %v4287_v15 = vld [vmem:[#allocation11 + $0x30] sm:$0xff]  ;;  %v4286_v19 = vld [vmem:[#allocation11 + $0x28] sm:$0xff] }
 0xe5d   :  { %v3774_v25 = vadd.f32 1.0, %v5536_v59 }
 0xe5e   :  { %v3789_v54 = vadd.f32 %v3788_v46, %v3567_v13  ;;  %v4288_v46 = vld [vmem:[#allocation11 + $0x38] sm:$0xff] }
 0xe60   :  { %5537 = vtanh.f32 %v3789_v54  ;;  %v4289_v54 = vld [vmem:[#allocation11 + $0x40] sm:$0xff] }
 0xe61   :  { %5539 = vrcp.f32 %v3774_v25 }
 0xe6d   :  { %v5538_v26 = vpop.eup %5537 }
 0xe6e   :  { %v3792_v47 = vrot.slane %v5538_v26, 2  ;;  %v5540_v1 = vpop.eup %5539 }
 0xe70   :  { %v3794_v39 = vsub.f32 %v7234_v20, %v3792_v47  ;;  %v4285_v20 = vld [vmem:[#allocation11 + $0x20] sm:$0xff] }
 0xe72   :  { %v3796_v28 = vrot.slane %v3794_v39, 6 }
 0xe74   :  { %v3798_v29 = vmul.f32 %v5540_v1, %v3796_v28 }
 0xe76   :  { %v7308_v42 = vadd.f32 %v5538_v26, %v3798_v29  ;;  %v4040_v26 = vld [vmem:[#allocation2] sm:$0xc0] }
 0xe78   :  { %3800 = vst [vmem:[#allocation3 + $0x8] sm:$0xc] %v7308_v42  ;;  %v3853_v53 = vrot.slane %v7308_v42, 2 }
 0xe7a   :  { %3920 = vmatmul.mubr.f32.vlgmr.msra.gmra.mxu0 %v3853_v53  ;;  %5318 = vmatmul.mubr.f32.vlgmr.msra.gmra.mxu1 %v3853_v53 }
 0xe7b   :  { %4095 = vmatpush1.msra.mxu0 %v6996_v23  ;;  %5321 = vmatpush3.msra.mxu1 %v6998_v2  ;;  %v7532_v23 = vld [vmem:[#allocation15_spill] sm:$0xff]  ;;  %v7533_v2 = vld [vmem:[#allocation16_spill] sm:$0xff] }
 0xe7c   :  { %4096 = vmatprep.subr.mxu0 %v7002_v5  ;;  %5322 = vmatprep.subr.mxu1 %v7470_v16  ;;  %v7534_v5 = vld [vmem:[#allocation18_spill] sm:$0xff] }
 0xe7d   :  { %4097 = vmatpush1.msra.mxu0 %v7006_v8  ;;  %5323 = vmatpush3.msra.mxu1 %v7008_v17  ;;  %v7535_v8 = vld [vmem:[#allocation19_spill] sm:$0xff]  ;;  %v7536_v17 = vld [vmem:[#allocation17_spill] sm:$0xff] }
 0xe7e   :  { %4098 = vmatprep.subr.mxu0 %v7012_v22  ;;  %5324 = vmatprep.subr.mxu1 %v7470_v16 }
 0xe7f   :  { %4099 = vmatpush1.msra.mxu0 %v7016_v43  ;;  %5325 = vmatpush3.msra.mxu1 %v7018_v27 }
 0xe80   :  { %4100 = vmatprep.subr.mxu0 %v7020_v12  ;;  %5326 = vmatprep.subr.mxu1 %v7470_v16  ;;  %v3801_v12 = vld [vmem:[#allocation2] sm:$0x30] }
 0xe81   :  { %4101 = vmatpush1.msra.mxu0 %v7024_v55  ;;  %5327 = vmatpush3.msra.mxu1 %v7026_v31 }
 0xe82   :  { %4102 = vmatprep.subr.mxu0 %v7028_v33  ;;  %5328 = vmatprep.subr.mxu1 %v7470_v16 }
 0xe83   :  { %4103 = vmatpush1.msra.mxu0 %v7032_v49  ;;  %5329 = vmatpush3.msra.mxu1 %v7034_v51 }
 0xe84   :  { %4104 = vmatprep.subr.mxu0 %v7038_v40  ;;  %5330 = vmatprep.subr.mxu1 %v7470_v16  ;;  %v3802_v40 = vld [vmem:[#allocation2 + $0x18] sm:$0x30] }
 0xe85   :  { %4105 = vmatpush1.msra.mxu0 %v7042_v35  ;;  %5331 = vmatpush3.msra.mxu1 %v7044_v38 }
 0xe86   :  { %4106 = vmatprep.subr.mxu0 %v7048_v34  ;;  %5332 = vmatprep.subr.mxu1 %v7470_v16 }
 0xe87   :  { %4107 = vmatpush1.msra.mxu0 %v7052_v62  ;;  %5333 = vmatpush3.msra.mxu1 %v7054_v36 }
 0xe88   :  { %4108 = vmatprep.subr.mxu0 %v7058_v37  ;;  %5334 = vmatprep.subr.mxu1 %v7470_v16 }
 0xe89   :  { %4109 = vmatpush1.msra.mxu0 %v7062_v41  ;;  %5335 = vmatpush3.msra.mxu1 %v7064_v48  ;;  %v3803_v48 = vld [vmem:[#allocation2 + $0x20] sm:$0x30] }
 0xe8a   :  { %4110 = vmatprep.subr.mxu0 %v7068_v32  ;;  %5336 = vmatprep.subr.mxu1 %v7470_v16 }
 0xe8b   :  { %4111 = vmatpush1.msra.mxu0 %v7072_v30  ;;  %5337 = vmatpush3.msra.mxu1 %v7074_v21 }
 0xe8c   :  { %4112 = vmatprep.subr.mxu0 %v7078_v18  ;;  %5338 = vmatprep.subr.mxu1 %v7470_v16 }
 0xe8d   :  { %4113 = vmatpush1.msra.mxu0 %v7082_v45  ;;  %5339 = vmatpush3.msra.mxu1 %v7084_v11 }
 0xe8e   :  { %4114 = vmatprep.subr.mxu0 %v7088_v0  ;;  %5340 = vmatprep.subr.mxu1 %v7470_v16 }
 0xe8f   :  { %4115 = vmatpush1.msra.mxu0 %v7092_v61  ;;  %5341 = vmatpush3.msra.mxu1 %v7094_v56 }
 0xe90   :  { %4116 = vmatprep.subr.mxu0 %v7098_v63  ;;  %5342 = vmatprep.subr.mxu1 %v7470_v16 }
 0xe91   :  { %4117 = vmatpush1.msra.mxu0 %v7102_v57  ;;  %5343 = vmatpush3.msra.mxu1 %v7104_v9  ;;  %v4279_v9 = vld [vmem:[#allocation3] sm:$0xff] }
 0xe92   :  { %4118 = vmatprep.subr.mxu0 %v7108_v58  ;;  %5344 = vmatprep.subr.mxu1 %v7470_v16  ;;  %v4296_v58 = vld [vmem:[#allocation11 + $0x78] sm:$0xff] }
 0xe93   :  { %4119 = vmatpush1.msra.mxu0 %v7112_v60  ;;  %5345 = vmatpush3.msra.mxu1 %v7114_v3  ;;  %v4295_v60 = vld [vmem:[#allocation11 + $0x70] sm:$0xff]  ;;  %v4294_v3 = vld [vmem:[#allocation11 + $0x68] sm:$0xff] }
 0xe94   :  { %4120 = vmatprep.subr.mxu0 %v7118_v4  ;;  %5346 = vmatprep.subr.mxu1 %v7470_v16  ;;  %v4293_v4 = vld [vmem:[#allocation11 + $0x60] sm:$0xff] }
 0xe95   :  { %4121 = vmatpush1.msra.mxu0 %v7122_v6  ;;  %5347 = vmatpush3.msra.mxu1 %v7124_v7  ;;  %v4292_v6 = vld [vmem:[#allocation11 + $0x58] sm:$0xff]  ;;  %v4291_v7 = vld [vmem:[#allocation11 + $0x50] sm:$0xff] }
 0xe96   :  { %4122 = vmatprep.subr.mxu0 %v7128_v10  ;;  %5348 = vmatprep.subr.mxu1 %v7470_v16  ;;  %v4290_v10 = vld [vmem:[#allocation11 + $0x48] sm:$0xff] }
 0xe97   :  { %4123 = vmatpush1.msra.mxu0 %v7532_v23  ;;  %5349 = vmatpush3.msra.mxu1 %v7533_v2 }
 0xe98   :  { %4124 = vmatprep.subr.mxu0 %v7534_v5  ;;  %5350 = vmatprep.subr.mxu1 %v7470_v16 }
 0xe99   :  { %4125 = vmatpush1.msra.mxu0 %v7535_v8  ;;  %4158 = vmatprep.mubr.f32.mxu0 %v7470_v16 }
 0xe9a   :  { %5351 = vmatpush3.msra.mxu1 %v7536_v17  ;;  %5352 = vmatprep.mubr.msk.f32.mxu1 %vm5677_vm1, %v7470_v16 }
 0xe9b   :  { %5355 = vmatprep.subr.mxu0 %v4296_v58 }
 0xf3a   :  { %v3921_v22 = vpop.f32.mrf.mxu0  ;;  %v3992_v43 = vpop.f32.mrf.mxu1 }
 0xf3b   :  { %v3997_v27 = vrot.slane %v3921_v22, 4  ;;  %v4023_v36 = vadd.f32 %v7230_v52, %v3992_v43 }
 0xf3c   :  { %v5319_v55 = vpop.f32.mrf.mxu1  ;;  %v3923_v49 = vpop.f32.mrf.mxu0 }
 0xf3d   :  { %v3999_v31 = vadd.f32 %v3997_v27, %v3801_v12  ;;  %v4007_v51 = vrot.slane %v3923_v49, 4  ;;  %v4025_v16 = vrot.slane %v4023_v36, 4  ;;  %v4042_v27 = vld [vmem:[#allocation2 + $0x20] sm:$0xc0] }
 0xf3f   :  { %v4434_v33 = vmul.f32 -1.442695, %v3999_v31  ;;  %v4009_v35 = vadd.f32 %v4007_v51, %v3802_v40 }
 0xf41   :  { %5541 = vpow2.f32 %v4434_v33  ;;  %v4435_v62 = vmul.f32 -1.442695, %v4009_v35 }
 0xf4e   :  { %v5542_v38 = vpop.eup %5541 }
 0xf4f   :  { %v4003_v34 = vadd.f32 1.0, %v5542_v38 }
 0xf51   :  { %5543 = vrcp.f32 %v4003_v34 }
 0xf52   :  { %5545 = vpow2.f32 %v4435_v62 }
 0xf5e   :  { %v5544_v37 = vpop.eup %5543 }
 0xf5f   :  { %v4027_v41 = vmul.f32 %v5544_v37, %v4025_v16  ;;  %v5546_v30 = vpop.eup %5545 }
 0xf60   :  { %v4013_v21 = vadd.f32 1.0, %v5546_v30 }
 0xf61   :  { %v4028_v32 = vadd.f32 %v4027_v41, %v3803_v48 }
 0xf63   :  { %5547 = vtanh.f32 %v4028_v32 }
 0xf64   :  { %5549 = vrcp.f32 %v4013_v21 }
 0xf70   :  { %v5548_v18 = vpop.eup %5547 }
 0xf71   :  { %v4031_v45 = vrot.slane %v5548_v18, 2  ;;  %v5550_v61 = vpop.eup %5549 }
 0xf73   :  { %v4033_v11 = vsub.f32 %v7308_v42, %v4031_v45  ;;  %v4041_v42 = vld [vmem:[#allocation2 + $0x18] sm:$0xc0] }
 0xf75   :  { %v4035_v0 = vrot.slane %v4033_v11, 6 }
 0xf77   :  { %v4037_v56 = vmul.f32 %v5550_v61, %v4035_v0 }
 0xf79   :  { %v7379_v63 = vadd.f32 %v5548_v18, %v4037_v56 }
 0xf7b   :  { %4039 = vst [vmem:[#allocation3 + $0x8] sm:$0x30] %v7379_v63  ;;  %v4092_v57 = vrot.slane %v7379_v63, 4 }
 0xf7d   :  { %4159 = vmatmul.mubr.f32.vlgmr.msra.gmra.mxu0 %v4092_v57  ;;  %5353 = vmatmul.mubr.f32.vlgmr.msra.gmra.mxu1 %v4092_v57 }
 0xf7e   :  { %5387 = vmatprep.mubr.f32.mxu0 %v4279_v9  ;;  %5356 = vmatpush3.msra.mxu0 %v4296_v58 }
 0xf7f   :  { %5357 = vmatprep.subr.mxu0 %v4295_v60 }
 0xf80   :  { %5358 = vmatpush3.msra.mxu0 %v4295_v60 }
 0xf81   :  { %5359 = vmatprep.subr.mxu0 %v4294_v3 }
 0xf82   :  { %5360 = vmatpush3.msra.mxu0 %v4294_v3 }
 0xf83   :  { %5361 = vmatprep.subr.mxu0 %v4293_v4 }
 0xf84   :  { %5362 = vmatpush3.msra.mxu0 %v4293_v4 }
 0xf85   :  { %5363 = vmatprep.subr.mxu0 %v4292_v6 }
 0xf86   :  { %5364 = vmatpush3.msra.mxu0 %v4292_v6 }
 0xf87   :  { %5365 = vmatprep.subr.mxu0 %v4291_v7 }
 0xf88   :  { %5366 = vmatpush3.msra.mxu0 %v4291_v7 }
 0xf89   :  { %5367 = vmatprep.subr.mxu0 %v4290_v10 }
 0xf8a   :  { %5368 = vmatpush3.msra.mxu0 %v4290_v10 }
 0xf8b   :  { %5369 = vmatprep.subr.mxu0 %v4289_v54 }
 0xf8c   :  { %5370 = vmatpush3.msra.mxu0 %v4289_v54 }
 0xf8d   :  { %5371 = vmatprep.subr.mxu0 %v4288_v46 }
 0xf8e   :  { %5372 = vmatpush3.msra.mxu0 %v4288_v46 }
 0xf8f   :  { %5373 = vmatprep.subr.mxu0 %v4287_v15 }
 0xf90   :  { %5374 = vmatpush3.msra.mxu0 %v4287_v15 }
 0xf91   :  { %5375 = vmatprep.subr.mxu0 %v4286_v19 }
 0xf92   :  { %5376 = vmatpush3.msra.mxu0 %v4286_v19 }
 0xf93   :  { %5377 = vmatprep.subr.mxu0 %v4285_v20 }
 0xf94   :  { %5378 = vmatpush3.msra.mxu0 %v4285_v20 }
 0xf95   :  { %5379 = vmatprep.subr.mxu0 %v4284_v14 }
 0xf96   :  { %5380 = vmatpush3.msra.mxu0 %v4284_v14 }
 0xf97   :  { %5381 = vmatprep.subr.mxu0 %v4283_v44 }
 0xf98   :  { %5382 = vmatpush3.msra.mxu0 %v4283_v44 }
 0xf99   :  { %5383 = vmatprep.subr.mxu0 %v4282_v50 }
 0xf9a   :  { %5384 = vmatpush3.msra.mxu0 %v4282_v50 }
 0xf9b   :  { %5385 = vmatprep.subr.mxu0 %v4281_v24 }
 0xf9c   :  { %5386 = vmatpush3.msra.mxu0 %v4281_v24 }
0x103d   :  { %v4160_v13 = vpop.f32.mrf.mxu0  ;;  %v4231_v59 = vpop.f32.mrf.mxu1 }
0x103e   :  { %v4236_v25 = vrot.slane %v4160_v13, 2  ;;  %v4262_v8 = vadd.f32 %v7230_v52, %v4231_v59  ;;  %v4440_v52 = vld [vmem:[%s7404_s10] ss:$0 sm:$0xff] }
0x103f   :  { %v5354_v47 = vpop.f32.mrf.mxu1  ;;  %v4162_v1 = vpop.f32.mrf.mxu0 }
0x1040   :  { %v4238_v39 = vadd.f32 %v4236_v25, %v4040_v26  ;;  %v4246_v29 = vrot.slane %v4162_v1, 2  ;;  %v4264_v17 = vrot.slane %v4262_v8, 2 }
0x1042   :  { %v4437_v28 = vmul.f32 -1.442695, %v4238_v39  ;;  %v4248_v53 = vadd.f32 %v4246_v29, %v4041_v42 }
0x1044   :  { %5551 = vpow2.f32 %v4437_v28  ;;  %v4438_v5 = vmul.f32 -1.442695, %v4248_v53 }
0x1051   :  { %v5552_v23 = vpop.eup %5551 }
0x1052   :  { %v4242_v2 = vadd.f32 1.0, %v5552_v23 }
0x1054   :  { %5553 = vrcp.f32 %v4242_v2 }
0x1055   :  { %5555 = vpow2.f32 %v4438_v5 }
0x1061   :  { %v5554_v22 = vpop.eup %5553 }
0x1062   :  { %v4266_v43 = vmul.f32 %v5554_v22, %v4264_v17  ;;  %v5556_v55 = vpop.eup %5555 }
0x1063   :  { %v4252_v31 = vadd.f32 1.0, %v5556_v55 }
0x1064   :  { %v4267_v12 = vadd.f32 %v4266_v43, %v4042_v27 }
0x1066   :  { %5557 = vtanh.f32 %v4267_v12 }
0x1067   :  { %5559 = vrcp.f32 %v4252_v31 }
0x1073   :  { %v5558_v33 = vpop.eup %5557 }
0x1074   :  { %v4270_v49 = vrot.slane %v5558_v33, 2  ;;  %v5560_v35 = vpop.eup %5559 }
0x1076   :  { %v4272_v51 = vsub.f32 %v7379_v63, %v4270_v49 }
0x1078   :  { %v4274_v40 = vrot.slane %v4272_v51, 6 }
0x107a   :  { %v4276_v38 = vmul.f32 %v5560_v35, %v4274_v40 }
0x107c   :  { %v4277_v34 = vadd.f32 %v5558_v33, %v4276_v38 }
0x107e   :  { %4278 = vst [vmem:[#allocation3 + $0x8] sm:$0xc0] %v4277_v34 }
0x1085   :  { %v4280_v62 = vld [vmem:[#allocation3 + $0x8] sm:$0xff] }
0x1086   :  { %5388 = vmatmul.mubr.f32.vlgmr.msra.gmra.mxu0 %v4280_v62 }
0x1146   :  { %v5389_v36 = vpop.f32.mrf.mxu0 }
0x1147   :  { %v4376_v16 = vadd.f32 %v5389_v36, %v4440_v52 }
0x1148   :  { %v4370_v37 = vpop.f32.mrf.mxu0 }
0x1149   :  { %4380 = vst [vmem:[%s7405_s11 + $0x8] sm:$0xff] %v4376_v16  ;;  %v4371_v41 = vadd.f32 %v4440_v52, %v4370_v37 }
0x114b   :  { %4379 = vst [vmem:[%s7405_s11] sm:$0xff] %v4371_v41 }
0x114c   :  { %4385 = vsyncpa [#allocation5], 1 }
0x114d   :  { %4386 = vsyncpa [#allocation7], 1 }
0x114e   :  { %4387 = vsyncpa [#allocation10], 1 }

</bundles_post_ra>
